<compile_context>
chip_gen: v5e
topology: v5e:2x2
jax: 0.10.0
libtpu: 0.0.40
codegen_flags: <defaults>
</compile_context>

<pallas_src>
import functools

import jax
import jax.numpy as jnp
from jax.experimental import pallas as pl
from jax.experimental.pallas import tpu as pltpu


# Transposed-conv (k=4, s=2, p=1) tap table, indexed by output-row/col parity:
# each entry is (kernel index, input offset).
_DEC_TAPS = (((1, 0), (3, -1)),   # even output rows / cols
             ((0, 1), (2, 0)))    # odd  output rows / cols


def _autoencoder_kernel(x_ref, w1_ref, b1_ref, w2_ref, b2_ref,
                        wd1_ref, bd1_ref, wd2_ref, bd2_ref,
                        wc1_ref, bc1_ref, wc2_ref, bc2_ref, wc3_ref, bc3_ref,
                        o_ref,
                        pad1, pad2, pd2u, pd3):
    f32 = jnp.float32

    # Zero the padded scratch buffers; interiors are overwritten below, borders
    # stay zero and implement the conv / conv-transpose zero padding.
    pad1[...] = jnp.zeros_like(pad1)
    pad2[...] = jnp.zeros_like(pad2)
    pd2u[...] = jnp.zeros_like(pd2u)
    pd3[...] = jnp.zeros_like(pd3)

    # -------- encoder conv1: 4 -> 8, k3, s2, p1  (16x16 -> 8x8) -----------
    # x block: (1, 8, 2, 8, 8) = (n, row-pair, row-parity, col-pair, col-parity*4ch)
    pad1[1:9, :, 1:9, :] = x_ref[0]
    taps = []
    for kh in range(3):
        rp, rq = (kh + 1) // 2, (kh + 1) % 2
        for kw in range(3):
            cp, cq = (kw + 1) // 2, (kw + 1) % 2
            patch = pad1[rp:rp + 8, rq:rq + 1, cp:cp + 8, cq * 4:cq * 4 + 4]
            taps.append(patch.reshape(64, 4))
    h1 = jnp.dot(jnp.concatenate(taps, axis=1), w1_ref[...],
                 preferred_element_type=f32) + b1_ref[...]
    h1 = jnp.maximum(h1, 0.0).reshape(8, 8, 8)          # (h, w, 8)

    # -------- encoder conv2: 8 -> 16, k3, s2, p1  (8x8 -> 4x4) ------------
    # Repack h1 into the parity-paired padded buffer: lanes hold (col-parity, ch).
    pairs = [jnp.concatenate([h1[:, 2 * c:2 * c + 1, :],
                              h1[:, 2 * c + 1:2 * c + 2, :]], axis=2)
             for c in range(4)]                          # 4 x (8, 1, 16)
    pad2[1:5, :, 1:5, :] = jnp.concatenate(pairs, axis=1).reshape(4, 2, 4, 16)
    taps = []
    for kh in range(3):
        rp, rq = (kh + 1) // 2, (kh + 1) % 2
        for kw in range(3):
            cp, cq = (kw + 1) // 2, (kw + 1) % 2
            patch = pad2[rp:rp + 4, rq:rq + 1, cp:cp + 4, cq * 8:cq * 8 + 8]
            taps.append(patch.reshape(16, 8))
    h2 = jnp.dot(jnp.concatenate(taps, axis=1), w2_ref[...],
                 preferred_element_type=f32) + b2_ref[...]
    h2 = jnp.maximum(h2, 0.0)                            # (16, 16) = (h*w, ch)

    # -------- dense bottleneck: 256 -> 64 -> 256 ---------------------------
    # (channel-minor flatten order; differs from torch's channel-major only by a
    #  fixed permutation of the Wd1 rows, absorbed by the random init.)
    z = jnp.concatenate([h2[p:p + 1, :] for p in range(16)], axis=1)   # (1, 256)
    z = jnp.maximum(jnp.dot(z, wd1_ref[...], preferred_element_type=f32)
                    + bd1_ref[...], 0.0)
    z = jnp.maximum(jnp.dot(z, wd2_ref[...], preferred_element_type=f32)
                    + bd2_ref[...], 0.0)

    # -------- decoder convT1: 256 -> 16, k4, s1, p0  (1x1 -> 4x4) + ReLU ---
    d1 = jnp.maximum(jnp.dot(z, wc1_ref[...], preferred_element_type=f32)
                     + bc1_ref[...], 0.0)                # (1, 256) = (kh, kw, 16)
    rows = []
    for i in range(4):
        rows.append(jnp.concatenate(
            [d1[0:1, (4 * i + j) * 16:(4 * i + j + 1) * 16].reshape(1, 1, 16)
             for j in range(4)], axis=1))                # (1, 4, 16)
    pd2u[1:5, 1:5, :] = jnp.concatenate(rows, axis=0)    # (4, 4, 16) interior

    # -------- decoder convT2: 16 -> 8, k4, s2, p1  (4x4 -> 8x8) + ReLU -----
    cls2 = []
    for r in range(2):
        for s in range(2):
            pieces = []
            for _kh, dr in _DEC_TAPS[r]:
                for _kw, dc in _DEC_TAPS[s]:
                    pieces.append(
                        pd2u[1 + dr:5 + dr, 1 + dc:5 + dc, :].reshape(16, 16))
            acc = jnp.dot(jnp.concatenate(pieces, axis=1), wc2_ref[2 * r + s],
                          preferred_element_type=f32) + bc2_ref[...]
            cls2.append(jnp.maximum(acc, 0.0).reshape(4, 4, 8))
    halves = []
    for r in range(2):
        a = cls2[2 * r + 0].reshape(4, 4, 1, 8)
        b = cls2[2 * r + 1].reshape(4, 4, 1, 8)
        halves.append(jnp.concatenate([a, b], axis=2).reshape(4, 1, 8, 8))
    pd3[1:9, 1:9, :] = jnp.concatenate(halves, axis=1).reshape(8, 8, 8)

    # -------- decoder convT3: 8 -> 4, k4, s2, p1  (8x8 -> 16x16), no act ---
    cls3 = []
    for r in range(2):
        for s in range(2):
            pieces = []
            for _kh, dr in _DEC_TAPS[r]:
                for _kw, dc in _DEC_TAPS[s]:
                    pieces.append(
                        pd3[1 + dr:9 + dr, 1 + dc:9 + dc, :].reshape(64, 8))
            acc = jnp.dot(jnp.concatenate(pieces, axis=1), wc3_ref[2 * r + s],
                          preferred_element_type=f32) + bc3_ref[...]
            cls3.append(acc.reshape(8, 8, 4))            # last layer: no ReLU
    halves = []
    for r in range(2):
        a = cls3[2 * r + 0].reshape(8, 8, 1, 4)
        b = cls3[2 * r + 1].reshape(8, 8, 1, 4)
        halves.append(jnp.concatenate([a, b], axis=2).reshape(8, 1, 16, 4))
    o_ref[0] = jnp.concatenate(halves, axis=1).reshape(16, 16, 4)


# ---------------------------------------------------------------------------
# Parameters (deterministic init) — weights are stored directly in the matmul
# layouts the kernel consumes (equivalent to the torch layouts up to the fixed
# permutations / spatial flips noted above, which the random init absorbs).
# ---------------------------------------------------------------------------
def _pack_deconv_weight(w):
    """(kh, kw, cin, cout) -> (4, 4*cin, cout): one packed K-block per output
    parity class (r, s), row order matching the kernel's tap concatenation."""
    cls = []
    for row_taps in _DEC_TAPS:
        for col_taps in _DEC_TAPS:
            blocks = [w[kh, kw] for kh, _ in row_taps for kw, _ in col_taps]
            cls.append(jnp.concatenate(blocks, axis=0))
    return jnp.stack(cls, axis=0)


def init_params(key):
    ks = jax.random.split(key, 16)

    def kaiming(k, shape, fan_in):
        return jnp.sqrt(2.0 / fan_in) * jax.random.normal(k, shape, jnp.float32)

    def bias(k, n):
        return 0.01 * jax.random.normal(k, (1, n), jnp.float32)

    p = {}
    p["w1"], p["b1"] = kaiming(ks[0], (36, 8), 36), bias(ks[1], 8)          # Conv 4->8
    p["w2"], p["b2"] = kaiming(ks[2], (72, 16), 72), bias(ks[3], 16)        # Conv 8->16
    p["wd1"], p["bd1"] = kaiming(ks[4], (256, 64), 256), bias(ks[5], 64)    # Linear 256->64
    p["wd2"], p["bd2"] = kaiming(ks[6], (64, 256), 64), bias(ks[7], 256)    # Linear 64->256
    p["wc1"] = kaiming(ks[8], (256, 256), 256)                              # ConvT 256->16, 1x1->4x4
    p["bc1"] = jnp.tile(bias(ks[9], 16), (1, 16))        # per-channel bias tiled over 4x4 spatial
    p["wc2"] = _pack_deconv_weight(kaiming(ks[10], (4, 4, 16, 8), 16 * 16))  # ConvT 16->8
    p["bc2"] = bias(ks[11], 8)
    p["wc3"] = _pack_deconv_weight(kaiming(ks[12], (4, 4, 8, 4), 8 * 16))    # ConvT 8->4
    p["bc3"] = bias(ks[13], 4)
    return p


# ---------------------------------------------------------------------------
# Forward pass: NCHW in / NCHW out (PyTorch convention).
# ---------------------------------------------------------------------------
def conv_autoencoder_dense(params, x_nchw):
    n = x_nchw.shape[0]
    x = jnp.transpose(x_nchw.astype(jnp.float32), (0, 2, 3, 1))  # NHWC (n,16,16,4)
    # parity-paired layout: (n, row-pair, row-parity, col-pair, col-parity*4ch)
    x5 = x.reshape(n, 8, 2, 8, 8)

    weights = (params["w1"], params["b1"], params["w2"], params["b2"],
               params["wd1"], params["bd1"], params["wd2"], params["bd2"],
               params["wc1"], params["bc1"], params["wc2"], params["bc2"],
               params["wc3"], params["bc3"])

    def resident(a):          # same block every grid step -> stays in VMEM
        nd = a.ndim
        return pl.BlockSpec(a.shape, lambda i, _nd=nd: (0,) * _nd)

    out_nhwc = pl.pallas_call(
        _autoencoder_kernel,
        out_shape=jax.ShapeDtypeStruct((n, 16, 16, 4), jnp.float32),
        grid=(n,),
        in_specs=[pl.BlockSpec((1, 8, 2, 8, 8), lambda i: (i, 0, 0, 0, 0))]
                 + [resident(a) for a in weights],
        out_specs=pl.BlockSpec((1, 16, 16, 4), lambda i: (i, 0, 0, 0)),
        scratch_shapes=[
            pltpu.VMEM((10, 2, 10, 8), jnp.float32),   # conv1 padded parity-paired input
            pltpu.VMEM((6, 2, 6, 16), jnp.float32),    # conv2 padded parity-paired input
            pltpu.VMEM((6, 6, 16), jnp.float32),       # convT2 zero-padded input
            pltpu.VMEM((10, 10, 8), jnp.float32),      # convT3 zero-padded input
        ],
        compiler_params=pltpu.CompilerParams(dimension_semantics=("parallel",)),
    )(x5, *weights)

    return jnp.transpose(out_nhwc, (0, 3, 1, 2))                 # -> NCHW


if __name__ == "__main__":
    key = jax.random.PRNGKey(0)
    kp, kx = jax.random.split(key)

    params = init_params(kp)
    x = jax.random.normal(kx, (2, 4, 16, 16), jnp.float32)       # NCHW, img_dim=(4,16,16)

    fwd = jax.jit(conv_autoencoder_dense)
    out = jax.block_until_ready(fwd(params, x))

    assert out.shape == (2, 4, 16, 16), out.shape
    assert out.dtype == jnp.float32
    assert bool(jnp.isfinite(out).all())
    print("KERNEL_OK")
</pallas_src>

<mosaic_0001>
module attributes {stable_mosaic.version = 11 : i64} {
  func.func @_autoencoder_kernel(%arg0: i32, %arg1: memref<1x8x2x8x8xf32, #tpu.memory_space<vmem>>, %arg2: memref<36x8xf32, #tpu.memory_space<vmem>>, %arg3: memref<1x8xf32, #tpu.memory_space<vmem>>, %arg4: memref<72x16xf32, #tpu.memory_space<vmem>>, %arg5: memref<1x16xf32, #tpu.memory_space<vmem>>, %arg6: memref<256x64xf32, #tpu.memory_space<vmem>>, %arg7: memref<1x64xf32, #tpu.memory_space<vmem>>, %arg8: memref<64x256xf32, #tpu.memory_space<vmem>>, %arg9: memref<1x256xf32, #tpu.memory_space<vmem>>, %arg10: memref<256x256xf32, #tpu.memory_space<vmem>>, %arg11: memref<1x256xf32, #tpu.memory_space<vmem>>, %arg12: memref<4x64x8xf32, #tpu.memory_space<vmem>>, %arg13: memref<1x8xf32, #tpu.memory_space<vmem>>, %arg14: memref<4x32x4xf32, #tpu.memory_space<vmem>>, %arg15: memref<1x4xf32, #tpu.memory_space<vmem>>, %arg16: memref<1x16x16x4xf32, #tpu.memory_space<vmem>>, %arg17: memref<10x2x10x8xf32, #tpu.memory_space<vmem>>, %arg18: memref<6x2x6x16xf32, #tpu.memory_space<vmem>>, %arg19: memref<6x6x16xf32, #tpu.memory_space<vmem>>, %arg20: memref<10x10x8xf32, #tpu.memory_space<vmem>>) attributes {dimension_semantics = [#tpu.dimension_semantics<parallel>], iteration_bounds = array<i64: 2>, scalar_prefetch = 0 : i64, scratch_operands = 4 : i64, tpu.core_type = #tpu.core_type<tc>, window_params = [{transform_indices = @transform_0, window_bounds = array<i64: 1, 8, 2, 8, 8>}, {pipeline_mode = #tpu.pipeline_mode<synchronous>, transform_indices = @transform_1, window_bounds = array<i64: 36, 8>}, {pipeline_mode = #tpu.pipeline_mode<synchronous>, transform_indices = @transform_2, window_bounds = array<i64: 1, 8>}, {pipeline_mode = #tpu.pipeline_mode<synchronous>, transform_indices = @transform_3, window_bounds = array<i64: 72, 16>}, {pipeline_mode = #tpu.pipeline_mode<synchronous>, transform_indices = @transform_4, window_bounds = array<i64: 1, 16>}, {pipeline_mode = #tpu.pipeline_mode<synchronous>, transform_indices = @transform_5, window_bounds = array<i64: 256, 64>}, {pipeline_mode = #tpu.pipeline_mode<synchronous>, transform_indices = @transform_6, window_bounds = array<i64: 1, 64>}, {pipeline_mode = #tpu.pipeline_mode<synchronous>, transform_indices = @transform_7, window_bounds = array<i64: 64, 256>}, {pipeline_mode = #tpu.pipeline_mode<synchronous>, transform_indices = @transform_8, window_bounds = array<i64: 1, 256>}, {pipeline_mode = #tpu.pipeline_mode<synchronous>, transform_indices = @transform_9, window_bounds = array<i64: 256, 256>}, {pipeline_mode = #tpu.pipeline_mode<synchronous>, transform_indices = @transform_10, window_bounds = array<i64: 1, 256>}, {pipeline_mode = #tpu.pipeline_mode<synchronous>, transform_indices = @transform_11, window_bounds = array<i64: 4, 64, 8>}, {pipeline_mode = #tpu.pipeline_mode<synchronous>, transform_indices = @transform_12, window_bounds = array<i64: 1, 8>}, {pipeline_mode = #tpu.pipeline_mode<synchronous>, transform_indices = @transform_13, window_bounds = array<i64: 4, 32, 4>}, {pipeline_mode = #tpu.pipeline_mode<synchronous>, transform_indices = @transform_14, window_bounds = array<i64: 1, 4>}, {transform_indices = @transform_15, window_bounds = array<i64: 1, 16, 16, 4>}]} {
    %cst = arith.constant 0.000000e+00 : f32
    %0 = vector.broadcast %cst : f32 to vector<10x2x10x8xf32>
    %c0 = arith.constant 0 : index
    %c0_0 = arith.constant 0 : index
    %c0_1 = arith.constant 0 : index
    %c0_2 = arith.constant 0 : index
    %1 = vector.load %arg17[%c0, %c0_0, %c0_1, %c0_2] : memref<10x2x10x8xf32, #tpu.memory_space<vmem>>, vector<10x2x10x8xf32>
    tpu.vector_store %arg17[%c0, %c0_0, %c0_1, %c0_2], %0 {strides = array<i32>} : memref<10x2x10x8xf32, #tpu.memory_space<vmem>>, vector<10x2x10x8xf32>,
    %cst_3 = arith.constant 0.000000e+00 : f32
    %2 = vector.broadcast %cst_3 : f32 to vector<6x2x6x16xf32>
    %c0_4 = arith.constant 0 : index
    %c0_5 = arith.constant 0 : index
    %c0_6 = arith.constant 0 : index
    %c0_7 = arith.constant 0 : index
    %3 = vector.load %arg18[%c0_4, %c0_5, %c0_6, %c0_7] : memref<6x2x6x16xf32, #tpu.memory_space<vmem>>, vector<6x2x6x16xf32>
    tpu.vector_store %arg18[%c0_4, %c0_5, %c0_6, %c0_7], %2 {strides = array<i32>} : memref<6x2x6x16xf32, #tpu.memory_space<vmem>>, vector<6x2x6x16xf32>,
    %cst_8 = arith.constant 0.000000e+00 : f32
    %4 = vector.broadcast %cst_8 : f32 to vector<6x6x16xf32>
    %c0_9 = arith.constant 0 : index
    %c0_10 = arith.constant 0 : index
    %c0_11 = arith.constant 0 : index
    %5 = vector.load %arg19[%c0_9, %c0_10, %c0_11] : memref<6x6x16xf32, #tpu.memory_space<vmem>>, vector<6x6x16xf32>
    tpu.vector_store %arg19[%c0_9, %c0_10, %c0_11], %4 {strides = array<i32>} : memref<6x6x16xf32, #tpu.memory_space<vmem>>, vector<6x6x16xf32>,
    %cst_12 = arith.constant 0.000000e+00 : f32
    %6 = vector.broadcast %cst_12 : f32 to vector<10x10x8xf32>
    %c0_13 = arith.constant 0 : index
    %c0_14 = arith.constant 0 : index
    %c0_15 = arith.constant 0 : index
    %7 = vector.load %arg20[%c0_13, %c0_14, %c0_15] : memref<10x10x8xf32, #tpu.memory_space<vmem>>, vector<10x10x8xf32>
    tpu.vector_store %arg20[%c0_13, %c0_14, %c0_15], %6 {strides = array<i32>} : memref<10x10x8xf32, #tpu.memory_space<vmem>>, vector<10x10x8xf32>,
    %c0_16 = arith.constant 0 : index
    %c0_17 = arith.constant 0 : index
    %c0_18 = arith.constant 0 : index
    %c0_19 = arith.constant 0 : index
    %c0_20 = arith.constant 0 : index
    %8 = vector.load %arg1[%c0_16, %c0_17, %c0_18, %c0_19, %c0_20] : memref<1x8x2x8x8xf32, #tpu.memory_space<vmem>>, vector<1x8x2x8x8xf32>
    %9 = vector.shape_cast %8 : vector<1x8x2x8x8xf32> to vector<8x2x8x8xf32>
    %c1 = arith.constant 1 : index
    %c0_21 = arith.constant 0 : index
    %c1_22 = arith.constant 1 : index
    %c0_23 = arith.constant 0 : index
    %10 = vector.load %arg17[%c1, %c0_21, %c1_22, %c0_23] : memref<10x2x10x8xf32, #tpu.memory_space<vmem>>, vector<8x2x8x8xf32>
    tpu.vector_store %arg17[%c1, %c0_21, %c1_22, %c0_23], %9 {strides = array<i32>} : memref<10x2x10x8xf32, #tpu.memory_space<vmem>>, vector<8x2x8x8xf32>,
    %c0_24 = arith.constant 0 : index
    %c1_25 = arith.constant 1 : index
    %c0_26 = arith.constant 0 : index
    %c4 = arith.constant 4 : index
    %11 = vector.load %arg17[%c0_24, %c1_25, %c0_26, %c4] : memref<10x2x10x8xf32, #tpu.memory_space<vmem>>, vector<8x1x8x4xf32>
    %12 = vector.shape_cast %11 : vector<8x1x8x4xf32> to vector<64x4xf32>
    %c0_27 = arith.constant 0 : index
    %c1_28 = arith.constant 1 : index
    %c1_29 = arith.constant 1 : index
    %c0_30 = arith.constant 0 : index
    %13 = vector.load %arg17[%c0_27, %c1_28, %c1_29, %c0_30] : memref<10x2x10x8xf32, #tpu.memory_space<vmem>>, vector<8x1x8x4xf32>
    %14 = vector.shape_cast %13 : vector<8x1x8x4xf32> to vector<64x4xf32>
    %c0_31 = arith.constant 0 : index
    %c1_32 = arith.constant 1 : index
    %c1_33 = arith.constant 1 : index
    %c4_34 = arith.constant 4 : index
    %15 = vector.load %arg17[%c0_31, %c1_32, %c1_33, %c4_34] : memref<10x2x10x8xf32, #tpu.memory_space<vmem>>, vector<8x1x8x4xf32>
    %16 = vector.shape_cast %15 : vector<8x1x8x4xf32> to vector<64x4xf32>
    %c1_35 = arith.constant 1 : index
    %c0_36 = arith.constant 0 : index
    %c0_37 = arith.constant 0 : index
    %c4_38 = arith.constant 4 : index
    %17 = vector.load %arg17[%c1_35, %c0_36, %c0_37, %c4_38] : memref<10x2x10x8xf32, #tpu.memory_space<vmem>>, vector<8x1x8x4xf32>
    %18 = vector.shape_cast %17 : vector<8x1x8x4xf32> to vector<64x4xf32>
    %c1_39 = arith.constant 1 : index
    %c0_40 = arith.constant 0 : index
    %c1_41 = arith.constant 1 : index
    %c0_42 = arith.constant 0 : index
    %19 = vector.load %arg17[%c1_39, %c0_40, %c1_41, %c0_42] : memref<10x2x10x8xf32, #tpu.memory_space<vmem>>, vector<8x1x8x4xf32>
    %20 = vector.shape_cast %19 : vector<8x1x8x4xf32> to vector<64x4xf32>
    %c1_43 = arith.constant 1 : index
    %c0_44 = arith.constant 0 : index
    %c1_45 = arith.constant 1 : index
    %c4_46 = arith.constant 4 : index
    %21 = vector.load %arg17[%c1_43, %c0_44, %c1_45, %c4_46] : memref<10x2x10x8xf32, #tpu.memory_space<vmem>>, vector<8x1x8x4xf32>
    %22 = vector.shape_cast %21 : vector<8x1x8x4xf32> to vector<64x4xf32>
    %c1_47 = arith.constant 1 : index
    %c1_48 = arith.constant 1 : index
    %c0_49 = arith.constant 0 : index
    %c4_50 = arith.constant 4 : index
    %23 = vector.load %arg17[%c1_47, %c1_48, %c0_49, %c4_50] : memref<10x2x10x8xf32, #tpu.memory_space<vmem>>, vector<8x1x8x4xf32>
    %24 = vector.shape_cast %23 : vector<8x1x8x4xf32> to vector<64x4xf32>
    %c1_51 = arith.constant 1 : index
    %c1_52 = arith.constant 1 : index
    %c1_53 = arith.constant 1 : index
    %c0_54 = arith.constant 0 : index
    %25 = vector.load %arg17[%c1_51, %c1_52, %c1_53, %c0_54] : memref<10x2x10x8xf32, #tpu.memory_space<vmem>>, vector<8x1x8x4xf32>
    %26 = vector.shape_cast %25 : vector<8x1x8x4xf32> to vector<64x4xf32>
    %c1_55 = arith.constant 1 : index
    %c1_56 = arith.constant 1 : index
    %c1_57 = arith.constant 1 : index
    %c4_58 = arith.constant 4 : index
    %27 = vector.load %arg17[%c1_55, %c1_56, %c1_57, %c4_58] : memref<10x2x10x8xf32, #tpu.memory_space<vmem>>, vector<8x1x8x4xf32>
    %28 = vector.shape_cast %27 : vector<8x1x8x4xf32> to vector<64x4xf32>
    %29 = tpu.concatenate %12, %14, %16, %18, %20, %22, %24, %26, %28 in 1 : vector<64x4xf32>, vector<64x4xf32>, vector<64x4xf32>, vector<64x4xf32>, vector<64x4xf32>, vector<64x4xf32>, vector<64x4xf32>, vector<64x4xf32>, vector<64x4xf32> -> vector<64x36xf32>
    %c0_59 = arith.constant 0 : index
    %c0_60 = arith.constant 0 : index
    %30 = vector.load %arg2[%c0_59, %c0_60] : memref<36x8xf32, #tpu.memory_space<vmem>>, vector<36x8xf32>
    %cst_61 = arith.constant dense<0.000000e+00> : vector<64x8xf32>
    %31 = tpu.matmul %29, %30, %cst_61 {dimension_numbers = #tpu.dot_dimension_numbers<[1], [0], [0], [1], [0, 0, 1, 1], [], []>} : vector<64x36xf32>, vector<36x8xf32>, vector<64x8xf32> -> vector<64x8xf32>
    %c0_62 = arith.constant 0 : index
    %c0_63 = arith.constant 0 : index
    %32 = vector.load %arg3[%c0_62, %c0_63] : memref<1x8xf32, #tpu.memory_space<vmem>>, vector<1x8xf32>
    %33 = vector.broadcast %32 : vector<1x8xf32> to vector<64x8xf32>
    %34 = arith.addf %31, %33 : vector<64x8xf32>
    %cst_64 = arith.constant 0.000000e+00 : f32
    %35 = vector.broadcast %cst_64 : f32 to vector<64x8xf32>
    %36 = arith.maximumf %34, %35 : vector<64x8xf32>
    %37 = vector.shape_cast %36 : vector<64x8xf32> to vector<8x8x8xf32>
    %38 = vector.extract_strided_slice %37 {offsets = [0, 0, 0], sizes = [8, 1, 8], strides = [1, 1, 1]} : vector<8x8x8xf32> to vector<8x1x8xf32>
    %39 = vector.extract_strided_slice %37 {offsets = [0, 1, 0], sizes = [8, 1, 8], strides = [1, 1, 1]} : vector<8x8x8xf32> to vector<8x1x8xf32>
    %40 = tpu.concatenate %38, %39 in 2 : vector<8x1x8xf32>, vector<8x1x8xf32> -> vector<8x1x16xf32>
    %41 = vector.extract_strided_slice %37 {offsets = [0, 2, 0], sizes = [8, 1, 8], strides = [1, 1, 1]} : vector<8x8x8xf32> to vector<8x1x8xf32>
    %42 = vector.extract_strided_slice %37 {offsets = [0, 3, 0], sizes = [8, 1, 8], strides = [1, 1, 1]} : vector<8x8x8xf32> to vector<8x1x8xf32>
    %43 = tpu.concatenate %41, %42 in 2 : vector<8x1x8xf32>, vector<8x1x8xf32> -> vector<8x1x16xf32>
    %44 = vector.extract_strided_slice %37 {offsets = [0, 4, 0], sizes = [8, 1, 8], strides = [1, 1, 1]} : vector<8x8x8xf32> to vector<8x1x8xf32>
    %45 = vector.extract_strided_slice %37 {offsets = [0, 5, 0], sizes = [8, 1, 8], strides = [1, 1, 1]} : vector<8x8x8xf32> to vector<8x1x8xf32>
    %46 = tpu.concatenate %44, %45 in 2 : vector<8x1x8xf32>, vector<8x1x8xf32> -> vector<8x1x16xf32>
    %47 = vector.extract_strided_slice %37 {offsets = [0, 6, 0], sizes = [8, 1, 8], strides = [1, 1, 1]} : vector<8x8x8xf32> to vector<8x1x8xf32>
    %48 = vector.extract_strided_slice %37 {offsets = [0, 7, 0], sizes = [8, 1, 8], strides = [1, 1, 1]} : vector<8x8x8xf32> to vector<8x1x8xf32>
    %49 = tpu.concatenate %47, %48 in 2 : vector<8x1x8xf32>, vector<8x1x8xf32> -> vector<8x1x16xf32>
    %50 = tpu.concatenate %40, %43, %46, %49 in 1 : vector<8x1x16xf32>, vector<8x1x16xf32>, vector<8x1x16xf32>, vector<8x1x16xf32> -> vector<8x4x16xf32>
    %51 = vector.shape_cast %50 : vector<8x4x16xf32> to vector<4x2x4x16xf32>
    %c1_65 = arith.constant 1 : index
    %c0_66 = arith.constant 0 : index
    %c1_67 = arith.constant 1 : index
    %c0_68 = arith.constant 0 : index
    %52 = vector.load %arg18[%c1_65, %c0_66, %c1_67, %c0_68] : memref<6x2x6x16xf32, #tpu.memory_space<vmem>>, vector<4x2x4x16xf32>
    tpu.vector_store %arg18[%c1_65, %c0_66, %c1_67, %c0_68], %51 {strides = array<i32>} : memref<6x2x6x16xf32, #tpu.memory_space<vmem>>, vector<4x2x4x16xf32>,
    %c0_69 = arith.constant 0 : index
    %c1_70 = arith.constant 1 : index
    %c0_71 = arith.constant 0 : index
    %c8 = arith.constant 8 : index
    %53 = vector.load %arg18[%c0_69, %c1_70, %c0_71, %c8] : memref<6x2x6x16xf32, #tpu.memory_space<vmem>>, vector<4x1x4x8xf32>
    %54 = vector.shape_cast %53 : vector<4x1x4x8xf32> to vector<16x8xf32>
    %c0_72 = arith.constant 0 : index
    %c1_73 = arith.constant 1 : index
    %c1_74 = arith.constant 1 : index
    %c0_75 = arith.constant 0 : index
    %55 = vector.load %arg18[%c0_72, %c1_73, %c1_74, %c0_75] : memref<6x2x6x16xf32, #tpu.memory_space<vmem>>, vector<4x1x4x8xf32>
    %56 = vector.shape_cast %55 : vector<4x1x4x8xf32> to vector<16x8xf32>
    %c0_76 = arith.constant 0 : index
    %c1_77 = arith.constant 1 : index
    %c1_78 = arith.constant 1 : index
    %c8_79 = arith.constant 8 : index
    %57 = vector.load %arg18[%c0_76, %c1_77, %c1_78, %c8_79] : memref<6x2x6x16xf32, #tpu.memory_space<vmem>>, vector<4x1x4x8xf32>
    %58 = vector.shape_cast %57 : vector<4x1x4x8xf32> to vector<16x8xf32>
    %c1_80 = arith.constant 1 : index
    %c0_81 = arith.constant 0 : index
    %c0_82 = arith.constant 0 : index
    %c8_83 = arith.constant 8 : index
    %59 = vector.load %arg18[%c1_80, %c0_81, %c0_82, %c8_83] : memref<6x2x6x16xf32, #tpu.memory_space<vmem>>, vector<4x1x4x8xf32>
    %60 = vector.shape_cast %59 : vector<4x1x4x8xf32> to vector<16x8xf32>
    %c1_84 = arith.constant 1 : index
    %c0_85 = arith.constant 0 : index
    %c1_86 = arith.constant 1 : index
    %c0_87 = arith.constant 0 : index
    %61 = vector.load %arg18[%c1_84, %c0_85, %c1_86, %c0_87] : memref<6x2x6x16xf32, #tpu.memory_space<vmem>>, vector<4x1x4x8xf32>
    %62 = vector.shape_cast %61 : vector<4x1x4x8xf32> to vector<16x8xf32>
    %c1_88 = arith.constant 1 : index
    %c0_89 = arith.constant 0 : index
    %c1_90 = arith.constant 1 : index
    %c8_91 = arith.constant 8 : index
    %63 = vector.load %arg18[%c1_88, %c0_89, %c1_90, %c8_91] : memref<6x2x6x16xf32, #tpu.memory_space<vmem>>, vector<4x1x4x8xf32>
    %64 = vector.shape_cast %63 : vector<4x1x4x8xf32> to vector<16x8xf32>
    %c1_92 = arith.constant 1 : index
    %c1_93 = arith.constant 1 : index
    %c0_94 = arith.constant 0 : index
    %c8_95 = arith.constant 8 : index
    %65 = vector.load %arg18[%c1_92, %c1_93, %c0_94, %c8_95] : memref<6x2x6x16xf32, #tpu.memory_space<vmem>>, vector<4x1x4x8xf32>
    %66 = vector.shape_cast %65 : vector<4x1x4x8xf32> to vector<16x8xf32>
    %c1_96 = arith.constant 1 : index
    %c1_97 = arith.constant 1 : index
    %c1_98 = arith.constant 1 : index
    %c0_99 = arith.constant 0 : index
    %67 = vector.load %arg18[%c1_96, %c1_97, %c1_98, %c0_99] : memref<6x2x6x16xf32, #tpu.memory_space<vmem>>, vector<4x1x4x8xf32>
    %68 = vector.shape_cast %67 : vector<4x1x4x8xf32> to vector<16x8xf32>
    %c1_100 = arith.constant 1 : index
    %c1_101 = arith.constant 1 : index
    %c1_102 = arith.constant 1 : index
    %c8_103 = arith.constant 8 : index
    %69 = vector.load %arg18[%c1_100, %c1_101, %c1_102, %c8_103] : memref<6x2x6x16xf32, #tpu.memory_space<vmem>>, vector<4x1x4x8xf32>
    %70 = vector.shape_cast %69 : vector<4x1x4x8xf32> to vector<16x8xf32>
    %71 = tpu.concatenate %54, %56, %58, %60, %62, %64, %66, %68, %70 in 1 : vector<16x8xf32>, vector<16x8xf32>, vector<16x8xf32>, vector<16x8xf32>, vector<16x8xf32>, vector<16x8xf32>, vector<16x8xf32>, vector<16x8xf32>, vector<16x8xf32> -> vector<16x72xf32>
    %c0_104 = arith.constant 0 : index
    %c0_105 = arith.constant 0 : index
    %72 = vector.load %arg4[%c0_104, %c0_105] : memref<72x16xf32, #tpu.memory_space<vmem>>, vector<72x16xf32>
    %cst_106 = arith.constant dense<0.000000e+00> : vector<16x16xf32>
    %73 = tpu.matmul %71, %72, %cst_106 {dimension_numbers = #tpu.dot_dimension_numbers<[1], [0], [0], [1], [0, 0, 1, 1], [], []>} : vector<16x72xf32>, vector<72x16xf32>, vector<16x16xf32> -> vector<16x16xf32>
    %c0_107 = arith.constant 0 : index
    %c0_108 = arith.constant 0 : index
    %74 = vector.load %arg5[%c0_107, %c0_108] : memref<1x16xf32, #tpu.memory_space<vmem>>, vector<1x16xf32>
    %75 = vector.broadcast %74 : vector<1x16xf32> to vector<16x16xf32>
    %76 = arith.addf %73, %75 : vector<16x16xf32>
    %cst_109 = arith.constant 0.000000e+00 : f32
    %77 = vector.broadcast %cst_109 : f32 to vector<16x16xf32>
    %78 = arith.maximumf %76, %77 : vector<16x16xf32>
    %79 = vector.extract_strided_slice %78 {offsets = [0, 0], sizes = [1, 16], strides = [1, 1]} : vector<16x16xf32> to vector<1x16xf32>
    %80 = vector.extract_strided_slice %78 {offsets = [1, 0], sizes = [1, 16], strides = [1, 1]} : vector<16x16xf32> to vector<1x16xf32>
    %81 = vector.extract_strided_slice %78 {offsets = [2, 0], sizes = [1, 16], strides = [1, 1]} : vector<16x16xf32> to vector<1x16xf32>
    %82 = vector.extract_strided_slice %78 {offsets = [3, 0], sizes = [1, 16], strides = [1, 1]} : vector<16x16xf32> to vector<1x16xf32>
    %83 = vector.extract_strided_slice %78 {offsets = [4, 0], sizes = [1, 16], strides = [1, 1]} : vector<16x16xf32> to vector<1x16xf32>
    %84 = vector.extract_strided_slice %78 {offsets = [5, 0], sizes = [1, 16], strides = [1, 1]} : vector<16x16xf32> to vector<1x16xf32>
    %85 = vector.extract_strided_slice %78 {offsets = [6, 0], sizes = [1, 16], strides = [1, 1]} : vector<16x16xf32> to vector<1x16xf32>
    %86 = vector.extract_strided_slice %78 {offsets = [7, 0], sizes = [1, 16], strides = [1, 1]} : vector<16x16xf32> to vector<1x16xf32>
    %87 = vector.extract_strided_slice %78 {offsets = [8, 0], sizes = [1, 16], strides = [1, 1]} : vector<16x16xf32> to vector<1x16xf32>
    %88 = vector.extract_strided_slice %78 {offsets = [9, 0], sizes = [1, 16], strides = [1, 1]} : vector<16x16xf32> to vector<1x16xf32>
    %89 = vector.extract_strided_slice %78 {offsets = [10, 0], sizes = [1, 16], strides = [1, 1]} : vector<16x16xf32> to vector<1x16xf32>
    %90 = vector.extract_strided_slice %78 {offsets = [11, 0], sizes = [1, 16], strides = [1, 1]} : vector<16x16xf32> to vector<1x16xf32>
    %91 = vector.extract_strided_slice %78 {offsets = [12, 0], sizes = [1, 16], strides = [1, 1]} : vector<16x16xf32> to vector<1x16xf32>
    %92 = vector.extract_strided_slice %78 {offsets = [13, 0], sizes = [1, 16], strides = [1, 1]} : vector<16x16xf32> to vector<1x16xf32>
    %93 = vector.extract_strided_slice %78 {offsets = [14, 0], sizes = [1, 16], strides = [1, 1]} : vector<16x16xf32> to vector<1x16xf32>
    %94 = vector.extract_strided_slice %78 {offsets = [15, 0], sizes = [1, 16], strides = [1, 1]} : vector<16x16xf32> to vector<1x16xf32>
    %95 = tpu.concatenate %79, %80, %81, %82, %83, %84, %85, %86, %87, %88, %89, %90, %91, %92, %93, %94 in 1 : vector<1x16xf32>, vector<1x16xf32>, vector<1x16xf32>, vector<1x16xf32>, vector<1x16xf32>, vector<1x16xf32>, vector<1x16xf32>, vector<1x16xf32>, vector<1x16xf32>, vector<1x16xf32>, vector<1x16xf32>, vector<1x16xf32>, vector<1x16xf32>, vector<1x16xf32>, vector<1x16xf32>, vector<1x16xf32> -> vector<1x256xf32>
    %c0_110 = arith.constant 0 : index
    %c0_111 = arith.constant 0 : index
    %96 = vector.load %arg6[%c0_110, %c0_111] : memref<256x64xf32, #tpu.memory_space<vmem>>, vector<256x64xf32>
    %cst_112 = arith.constant dense<0.000000e+00> : vector<1x64xf32>
    %97 = tpu.matmul %95, %96, %cst_112 {dimension_numbers = #tpu.dot_dimension_numbers<[1], [0], [0], [1], [0, 0, 1, 1], [], []>} : vector<1x256xf32>, vector<256x64xf32>, vector<1x64xf32> -> vector<1x64xf32>
    %c0_113 = arith.constant 0 : index
    %c0_114 = arith.constant 0 : index
    %98 = vector.load %arg7[%c0_113, %c0_114] : memref<1x64xf32, #tpu.memory_space<vmem>>, vector<1x64xf32>
    %99 = arith.addf %97, %98 : vector<1x64xf32>
    %cst_115 = arith.constant 0.000000e+00 : f32
    %100 = vector.broadcast %cst_115 : f32 to vector<1x64xf32>
    %101 = arith.maximumf %99, %100 : vector<1x64xf32>
    %c0_116 = arith.constant 0 : index
    %c0_117 = arith.constant 0 : index
    %102 = vector.load %arg8[%c0_116, %c0_117] : memref<64x256xf32, #tpu.memory_space<vmem>>, vector<64x256xf32>
    %cst_118 = arith.constant dense<0.000000e+00> : vector<1x256xf32>
    %103 = tpu.matmul %101, %102, %cst_118 {dimension_numbers = #tpu.dot_dimension_numbers<[1], [0], [0], [1], [0, 0, 1, 1], [], []>} : vector<1x64xf32>, vector<64x256xf32>, vector<1x256xf32> -> vector<1x256xf32>
    %c0_119 = arith.constant 0 : index
    %c0_120 = arith.constant 0 : index
    %104 = vector.load %arg9[%c0_119, %c0_120] : memref<1x256xf32, #tpu.memory_space<vmem>>, vector<1x256xf32>
    %105 = arith.addf %103, %104 : vector<1x256xf32>
    %cst_121 = arith.constant 0.000000e+00 : f32
    %106 = vector.broadcast %cst_121 : f32 to vector<1x256xf32>
    %107 = arith.maximumf %105, %106 : vector<1x256xf32>
    %c0_122 = arith.constant 0 : index
    %c0_123 = arith.constant 0 : index
    %108 = vector.load %arg10[%c0_122, %c0_123] : memref<256x256xf32, #tpu.memory_space<vmem>>, vector<256x256xf32>
    %cst_124 = arith.constant dense<0.000000e+00> : vector<1x256xf32>
    %109 = tpu.matmul %107, %108, %cst_124 {dimension_numbers = #tpu.dot_dimension_numbers<[1], [0], [0], [1], [0, 0, 1, 1], [], []>} : vector<1x256xf32>, vector<256x256xf32>, vector<1x256xf32> -> vector<1x256xf32>
    %c0_125 = arith.constant 0 : index
    %c0_126 = arith.constant 0 : index
    %110 = vector.load %arg11[%c0_125, %c0_126] : memref<1x256xf32, #tpu.memory_space<vmem>>, vector<1x256xf32>
    %111 = arith.addf %109, %110 : vector<1x256xf32>
    %cst_127 = arith.constant 0.000000e+00 : f32
    %112 = vector.broadcast %cst_127 : f32 to vector<1x256xf32>
    %113 = arith.maximumf %111, %112 : vector<1x256xf32>
    %114 = vector.extract_strided_slice %113 {offsets = [0, 0], sizes = [1, 16], strides = [1, 1]} : vector<1x256xf32> to vector<1x16xf32>
    %115 = vector.shape_cast %114 : vector<1x16xf32> to vector<1x1x16xf32>
    %116 = vector.extract_strided_slice %113 {offsets = [0, 16], sizes = [1, 16], strides = [1, 1]} : vector<1x256xf32> to vector<1x16xf32>
    %117 = vector.shape_cast %116 : vector<1x16xf32> to vector<1x1x16xf32>
    %118 = vector.extract_strided_slice %113 {offsets = [0, 32], sizes = [1, 16], strides = [1, 1]} : vector<1x256xf32> to vector<1x16xf32>
    %119 = vector.shape_cast %118 : vector<1x16xf32> to vector<1x1x16xf32>
    %120 = vector.extract_strided_slice %113 {offsets = [0, 48], sizes = [1, 16], strides = [1, 1]} : vector<1x256xf32> to vector<1x16xf32>
    %121 = vector.shape_cast %120 : vector<1x16xf32> to vector<1x1x16xf32>
    %122 = tpu.concatenate %115, %117, %119, %121 in 1 : vector<1x1x16xf32>, vector<1x1x16xf32>, vector<1x1x16xf32>, vector<1x1x16xf32> -> vector<1x4x16xf32>
    %123 = vector.extract_strided_slice %113 {offsets = [0, 64], sizes = [1, 16], strides = [1, 1]} : vector<1x256xf32> to vector<1x16xf32>
    %124 = vector.shape_cast %123 : vector<1x16xf32> to vector<1x1x16xf32>
    %125 = vector.extract_strided_slice %113 {offsets = [0, 80], sizes = [1, 16], strides = [1, 1]} : vector<1x256xf32> to vector<1x16xf32>
    %126 = vector.shape_cast %125 : vector<1x16xf32> to vector<1x1x16xf32>
    %127 = vector.extract_strided_slice %113 {offsets = [0, 96], sizes = [1, 16], strides = [1, 1]} : vector<1x256xf32> to vector<1x16xf32>
    %128 = vector.shape_cast %127 : vector<1x16xf32> to vector<1x1x16xf32>
    %129 = vector.extract_strided_slice %113 {offsets = [0, 112], sizes = [1, 16], strides = [1, 1]} : vector<1x256xf32> to vector<1x16xf32>
    %130 = vector.shape_cast %129 : vector<1x16xf32> to vector<1x1x16xf32>
    %131 = tpu.concatenate %124, %126, %128, %130 in 1 : vector<1x1x16xf32>, vector<1x1x16xf32>, vector<1x1x16xf32>, vector<1x1x16xf32> -> vector<1x4x16xf32>
    %132 = vector.extract_strided_slice %113 {offsets = [0, 128], sizes = [1, 16], strides = [1, 1]} : vector<1x256xf32> to vector<1x16xf32>
    %133 = vector.shape_cast %132 : vector<1x16xf32> to vector<1x1x16xf32>
    %134 = vector.extract_strided_slice %113 {offsets = [0, 144], sizes = [1, 16], strides = [1, 1]} : vector<1x256xf32> to vector<1x16xf32>
    %135 = vector.shape_cast %134 : vector<1x16xf32> to vector<1x1x16xf32>
    %136 = vector.extract_strided_slice %113 {offsets = [0, 160], sizes = [1, 16], strides = [1, 1]} : vector<1x256xf32> to vector<1x16xf32>
    %137 = vector.shape_cast %136 : vector<1x16xf32> to vector<1x1x16xf32>
    %138 = vector.extract_strided_slice %113 {offsets = [0, 176], sizes = [1, 16], strides = [1, 1]} : vector<1x256xf32> to vector<1x16xf32>
    %139 = vector.shape_cast %138 : vector<1x16xf32> to vector<1x1x16xf32>
    %140 = tpu.concatenate %133, %135, %137, %139 in 1 : vector<1x1x16xf32>, vector<1x1x16xf32>, vector<1x1x16xf32>, vector<1x1x16xf32> -> vector<1x4x16xf32>
    %141 = vector.extract_strided_slice %113 {offsets = [0, 192], sizes = [1, 16], strides = [1, 1]} : vector<1x256xf32> to vector<1x16xf32>
    %142 = vector.shape_cast %141 : vector<1x16xf32> to vector<1x1x16xf32>
    %143 = vector.extract_strided_slice %113 {offsets = [0, 208], sizes = [1, 16], strides = [1, 1]} : vector<1x256xf32> to vector<1x16xf32>
    %144 = vector.shape_cast %143 : vector<1x16xf32> to vector<1x1x16xf32>
    %145 = vector.extract_strided_slice %113 {offsets = [0, 224], sizes = [1, 16], strides = [1, 1]} : vector<1x256xf32> to vector<1x16xf32>
    %146 = vector.shape_cast %145 : vector<1x16xf32> to vector<1x1x16xf32>
    %147 = vector.extract_strided_slice %113 {offsets = [0, 240], sizes = [1, 16], strides = [1, 1]} : vector<1x256xf32> to vector<1x16xf32>
    %148 = vector.shape_cast %147 : vector<1x16xf32> to vector<1x1x16xf32>
    %149 = tpu.concatenate %142, %144, %146, %148 in 1 : vector<1x1x16xf32>, vector<1x1x16xf32>, vector<1x1x16xf32>, vector<1x1x16xf32> -> vector<1x4x16xf32>
    %150 = tpu.concatenate %122, %131, %140, %149 in 0 : vector<1x4x16xf32>, vector<1x4x16xf32>, vector<1x4x16xf32>, vector<1x4x16xf32> -> vector<4x4x16xf32>
    %c1_128 = arith.constant 1 : index
    %c1_129 = arith.constant 1 : index
    %c0_130 = arith.constant 0 : index
    %151 = vector.load %arg19[%c1_128, %c1_129, %c0_130] : memref<6x6x16xf32, #tpu.memory_space<vmem>>, vector<4x4x16xf32>
    tpu.vector_store %arg19[%c1_128, %c1_129, %c0_130], %150 {strides = array<i32>} : memref<6x6x16xf32, #tpu.memory_space<vmem>>, vector<4x4x16xf32>,
    %c1_131 = arith.constant 1 : index
    %c1_132 = arith.constant 1 : index
    %c0_133 = arith.constant 0 : index
    %152 = vector.load %arg19[%c1_131, %c1_132, %c0_133] : memref<6x6x16xf32, #tpu.memory_space<vmem>>, vector<4x4x16xf32>
    %153 = vector.shape_cast %152 : vector<4x4x16xf32> to vector<16x16xf32>
    %c1_134 = arith.constant 1 : index
    %c0_135 = arith.constant 0 : index
    %c0_136 = arith.constant 0 : index
    %154 = vector.load %arg19[%c1_134, %c0_135, %c0_136] : memref<6x6x16xf32, #tpu.memory_space<vmem>>, vector<4x4x16xf32>
    %155 = vector.shape_cast %154 : vector<4x4x16xf32> to vector<16x16xf32>
    %c0_137 = arith.constant 0 : index
    %c1_138 = arith.constant 1 : index
    %c0_139 = arith.constant 0 : index
    %156 = vector.load %arg19[%c0_137, %c1_138, %c0_139] : memref<6x6x16xf32, #tpu.memory_space<vmem>>, vector<4x4x16xf32>
    %157 = vector.shape_cast %156 : vector<4x4x16xf32> to vector<16x16xf32>
    %c0_140 = arith.constant 0 : index
    %c0_141 = arith.constant 0 : index
    %c0_142 = arith.constant 0 : index
    %158 = vector.load %arg19[%c0_140, %c0_141, %c0_142] : memref<6x6x16xf32, #tpu.memory_space<vmem>>, vector<4x4x16xf32>
    %159 = vector.shape_cast %158 : vector<4x4x16xf32> to vector<16x16xf32>
    %160 = tpu.concatenate %153, %155, %157, %159 in 1 : vector<16x16xf32>, vector<16x16xf32>, vector<16x16xf32>, vector<16x16xf32> -> vector<16x64xf32>
    %c0_143 = arith.constant 0 : index
    %c0_144 = arith.constant 0 : index
    %c0_145 = arith.constant 0 : index
    %161 = vector.load %arg12[%c0_143, %c0_144, %c0_145] : memref<4x64x8xf32, #tpu.memory_space<vmem>>, vector<1x64x8xf32>
    %162 = vector.shape_cast %161 : vector<1x64x8xf32> to vector<64x8xf32>
    %cst_146 = arith.constant dense<0.000000e+00> : vector<16x8xf32>
    %163 = tpu.matmul %160, %162, %cst_146 {dimension_numbers = #tpu.dot_dimension_numbers<[1], [0], [0], [1], [0, 0, 1, 1], [], []>} : vector<16x64xf32>, vector<64x8xf32>, vector<16x8xf32> -> vector<16x8xf32>
    %c0_147 = arith.constant 0 : index
    %c0_148 = arith.constant 0 : index
    %164 = vector.load %arg13[%c0_147, %c0_148] : memref<1x8xf32, #tpu.memory_space<vmem>>, vector<1x8xf32>
    %165 = vector.broadcast %164 : vector<1x8xf32> to vector<16x8xf32>
    %166 = arith.addf %163, %165 : vector<16x8xf32>
    %cst_149 = arith.constant 0.000000e+00 : f32
    %167 = vector.broadcast %cst_149 : f32 to vector<16x8xf32>
    %168 = arith.maximumf %166, %167 : vector<16x8xf32>
    %169 = vector.shape_cast %168 : vector<16x8xf32> to vector<4x4x8xf32>
    %c1_150 = arith.constant 1 : index
    %c2 = arith.constant 2 : index
    %c0_151 = arith.constant 0 : index
    %170 = vector.load %arg19[%c1_150, %c2, %c0_151] : memref<6x6x16xf32, #tpu.memory_space<vmem>>, vector<4x4x16xf32>
    %171 = vector.shape_cast %170 : vector<4x4x16xf32> to vector<16x16xf32>
    %c1_152 = arith.constant 1 : index
    %c1_153 = arith.constant 1 : index
    %c0_154 = arith.constant 0 : index
    %172 = vector.load %arg19[%c1_152, %c1_153, %c0_154] : memref<6x6x16xf32, #tpu.memory_space<vmem>>, vector<4x4x16xf32>
    %173 = vector.shape_cast %172 : vector<4x4x16xf32> to vector<16x16xf32>
    %c0_155 = arith.constant 0 : index
    %c2_156 = arith.constant 2 : index
    %c0_157 = arith.constant 0 : index
    %174 = vector.load %arg19[%c0_155, %c2_156, %c0_157] : memref<6x6x16xf32, #tpu.memory_space<vmem>>, vector<4x4x16xf32>
    %175 = vector.shape_cast %174 : vector<4x4x16xf32> to vector<16x16xf32>
    %c0_158 = arith.constant 0 : index
    %c1_159 = arith.constant 1 : index
    %c0_160 = arith.constant 0 : index
    %176 = vector.load %arg19[%c0_158, %c1_159, %c0_160] : memref<6x6x16xf32, #tpu.memory_space<vmem>>, vector<4x4x16xf32>
    %177 = vector.shape_cast %176 : vector<4x4x16xf32> to vector<16x16xf32>
    %178 = tpu.concatenate %171, %173, %175, %177 in 1 : vector<16x16xf32>, vector<16x16xf32>, vector<16x16xf32>, vector<16x16xf32> -> vector<16x64xf32>
    %c1_161 = arith.constant 1 : index
    %c0_162 = arith.constant 0 : index
    %c0_163 = arith.constant 0 : index
    %179 = vector.load %arg12[%c1_161, %c0_162, %c0_163] : memref<4x64x8xf32, #tpu.memory_space<vmem>>, vector<1x64x8xf32>
    %180 = vector.shape_cast %179 : vector<1x64x8xf32> to vector<64x8xf32>
    %cst_164 = arith.constant dense<0.000000e+00> : vector<16x8xf32>
    %181 = tpu.matmul %178, %180, %cst_164 {dimension_numbers = #tpu.dot_dimension_numbers<[1], [0], [0], [1], [0, 0, 1, 1], [], []>} : vector<16x64xf32>, vector<64x8xf32>, vector<16x8xf32> -> vector<16x8xf32>
    %c0_165 = arith.constant 0 : index
    %c0_166 = arith.constant 0 : index
    %182 = vector.load %arg13[%c0_165, %c0_166] : memref<1x8xf32, #tpu.memory_space<vmem>>, vector<1x8xf32>
    %183 = vector.broadcast %182 : vector<1x8xf32> to vector<16x8xf32>
    %184 = arith.addf %181, %183 : vector<16x8xf32>
    %cst_167 = arith.constant 0.000000e+00 : f32
    %185 = vector.broadcast %cst_167 : f32 to vector<16x8xf32>
    %186 = arith.maximumf %184, %185 : vector<16x8xf32>
    %187 = vector.shape_cast %186 : vector<16x8xf32> to vector<4x4x8xf32>
    %c2_168 = arith.constant 2 : index
    %c1_169 = arith.constant 1 : index
    %c0_170 = arith.constant 0 : index
    %188 = vector.load %arg19[%c2_168, %c1_169, %c0_170] : memref<6x6x16xf32, #tpu.memory_space<vmem>>, vector<4x4x16xf32>
    %189 = vector.shape_cast %188 : vector<4x4x16xf32> to vector<16x16xf32>
    %c2_171 = arith.constant 2 : index
    %c0_172 = arith.constant 0 : index
    %c0_173 = arith.constant 0 : index
    %190 = vector.load %arg19[%c2_171, %c0_172, %c0_173] : memref<6x6x16xf32, #tpu.memory_space<vmem>>, vector<4x4x16xf32>
    %191 = vector.shape_cast %190 : vector<4x4x16xf32> to vector<16x16xf32>
    %c1_174 = arith.constant 1 : index
    %c1_175 = arith.constant 1 : index
    %c0_176 = arith.constant 0 : index
    %192 = vector.load %arg19[%c1_174, %c1_175, %c0_176] : memref<6x6x16xf32, #tpu.memory_space<vmem>>, vector<4x4x16xf32>
    %193 = vector.shape_cast %192 : vector<4x4x16xf32> to vector<16x16xf32>
    %c1_177 = arith.constant 1 : index
    %c0_178 = arith.constant 0 : index
    %c0_179 = arith.constant 0 : index
    %194 = vector.load %arg19[%c1_177, %c0_178, %c0_179] : memref<6x6x16xf32, #tpu.memory_space<vmem>>, vector<4x4x16xf32>
    %195 = vector.shape_cast %194 : vector<4x4x16xf32> to vector<16x16xf32>
    %196 = tpu.concatenate %189, %191, %193, %195 in 1 : vector<16x16xf32>, vector<16x16xf32>, vector<16x16xf32>, vector<16x16xf32> -> vector<16x64xf32>
    %c2_180 = arith.constant 2 : index
    %c0_181 = arith.constant 0 : index
    %c0_182 = arith.constant 0 : index
    %197 = vector.load %arg12[%c2_180, %c0_181, %c0_182] : memref<4x64x8xf32, #tpu.memory_space<vmem>>, vector<1x64x8xf32>
    %198 = vector.shape_cast %197 : vector<1x64x8xf32> to vector<64x8xf32>
    %cst_183 = arith.constant dense<0.000000e+00> : vector<16x8xf32>
    %199 = tpu.matmul %196, %198, %cst_183 {dimension_numbers = #tpu.dot_dimension_numbers<[1], [0], [0], [1], [0, 0, 1, 1], [], []>} : vector<16x64xf32>, vector<64x8xf32>, vector<16x8xf32> -> vector<16x8xf32>
    %c0_184 = arith.constant 0 : index
    %c0_185 = arith.constant 0 : index
    %200 = vector.load %arg13[%c0_184, %c0_185] : memref<1x8xf32, #tpu.memory_space<vmem>>, vector<1x8xf32>
    %201 = vector.broadcast %200 : vector<1x8xf32> to vector<16x8xf32>
    %202 = arith.addf %199, %201 : vector<16x8xf32>
    %cst_186 = arith.constant 0.000000e+00 : f32
    %203 = vector.broadcast %cst_186 : f32 to vector<16x8xf32>
    %204 = arith.maximumf %202, %203 : vector<16x8xf32>
    %205 = vector.shape_cast %204 : vector<16x8xf32> to vector<4x4x8xf32>
    %c2_187 = arith.constant 2 : index
    %c2_188 = arith.constant 2 : index
    %c0_189 = arith.constant 0 : index
    %206 = vector.load %arg19[%c2_187, %c2_188, %c0_189] : memref<6x6x16xf32, #tpu.memory_space<vmem>>, vector<4x4x16xf32>
    %207 = vector.shape_cast %206 : vector<4x4x16xf32> to vector<16x16xf32>
    %c2_190 = arith.constant 2 : index
    %c1_191 = arith.constant 1 : index
    %c0_192 = arith.constant 0 : index
    %208 = vector.load %arg19[%c2_190, %c1_191, %c0_192] : memref<6x6x16xf32, #tpu.memory_space<vmem>>, vector<4x4x16xf32>
    %209 = vector.shape_cast %208 : vector<4x4x16xf32> to vector<16x16xf32>
    %c1_193 = arith.constant 1 : index
    %c2_194 = arith.constant 2 : index
    %c0_195 = arith.constant 0 : index
    %210 = vector.load %arg19[%c1_193, %c2_194, %c0_195] : memref<6x6x16xf32, #tpu.memory_space<vmem>>, vector<4x4x16xf32>
    %211 = vector.shape_cast %210 : vector<4x4x16xf32> to vector<16x16xf32>
    %c1_196 = arith.constant 1 : index
    %c1_197 = arith.constant 1 : index
    %c0_198 = arith.constant 0 : index
    %212 = vector.load %arg19[%c1_196, %c1_197, %c0_198] : memref<6x6x16xf32, #tpu.memory_space<vmem>>, vector<4x4x16xf32>
    %213 = vector.shape_cast %212 : vector<4x4x16xf32> to vector<16x16xf32>
    %214 = tpu.concatenate %207, %209, %211, %213 in 1 : vector<16x16xf32>, vector<16x16xf32>, vector<16x16xf32>, vector<16x16xf32> -> vector<16x64xf32>
    %c3 = arith.constant 3 : index
    %c0_199 = arith.constant 0 : index
    %c0_200 = arith.constant 0 : index
    %215 = vector.load %arg12[%c3, %c0_199, %c0_200] : memref<4x64x8xf32, #tpu.memory_space<vmem>>, vector<1x64x8xf32>
    %216 = vector.shape_cast %215 : vector<1x64x8xf32> to vector<64x8xf32>
    %cst_201 = arith.constant dense<0.000000e+00> : vector<16x8xf32>
    %217 = tpu.matmul %214, %216, %cst_201 {dimension_numbers = #tpu.dot_dimension_numbers<[1], [0], [0], [1], [0, 0, 1, 1], [], []>} : vector<16x64xf32>, vector<64x8xf32>, vector<16x8xf32> -> vector<16x8xf32>
    %c0_202 = arith.constant 0 : index
    %c0_203 = arith.constant 0 : index
    %218 = vector.load %arg13[%c0_202, %c0_203] : memref<1x8xf32, #tpu.memory_space<vmem>>, vector<1x8xf32>
    %219 = vector.broadcast %218 : vector<1x8xf32> to vector<16x8xf32>
    %220 = arith.addf %217, %219 : vector<16x8xf32>
    %cst_204 = arith.constant 0.000000e+00 : f32
    %221 = vector.broadcast %cst_204 : f32 to vector<16x8xf32>
    %222 = arith.maximumf %220, %221 : vector<16x8xf32>
    %223 = vector.shape_cast %222 : vector<16x8xf32> to vector<4x4x8xf32>
    %224 = vector.shape_cast %169 : vector<4x4x8xf32> to vector<4x4x1x8xf32>
    %225 = vector.shape_cast %187 : vector<4x4x8xf32> to vector<4x4x1x8xf32>
    %226 = tpu.concatenate %224, %225 in 2 : vector<4x4x1x8xf32>, vector<4x4x1x8xf32> -> vector<4x4x2x8xf32>
    %227 = vector.shape_cast %226 : vector<4x4x2x8xf32> to vector<4x1x8x8xf32>
    %228 = vector.shape_cast %205 : vector<4x4x8xf32> to vector<4x4x1x8xf32>
    %229 = vector.shape_cast %223 : vector<4x4x8xf32> to vector<4x4x1x8xf32>
    %230 = tpu.concatenate %228, %229 in 2 : vector<4x4x1x8xf32>, vector<4x4x1x8xf32> -> vector<4x4x2x8xf32>
    %231 = vector.shape_cast %230 : vector<4x4x2x8xf32> to vector<4x1x8x8xf32>
    %232 = tpu.concatenate %227, %231 in 1 : vector<4x1x8x8xf32>, vector<4x1x8x8xf32> -> vector<4x2x8x8xf32>
    %233 = vector.shape_cast %232 : vector<4x2x8x8xf32> to vector<8x8x8xf32>
    %c1_205 = arith.constant 1 : index
    %c1_206 = arith.constant 1 : index
    %c0_207 = arith.constant 0 : index
    %234 = vector.load %arg20[%c1_205, %c1_206, %c0_207] : memref<10x10x8xf32, #tpu.memory_space<vmem>>, vector<8x8x8xf32>
    tpu.vector_store %arg20[%c1_205, %c1_206, %c0_207], %233 {strides = array<i32>} : memref<10x10x8xf32, #tpu.memory_space<vmem>>, vector<8x8x8xf32>,
    %c1_208 = arith.constant 1 : index
    %c1_209 = arith.constant 1 : index
    %c0_210 = arith.constant 0 : index
    %235 = vector.load %arg20[%c1_208, %c1_209, %c0_210] : memref<10x10x8xf32, #tpu.memory_space<vmem>>, vector<8x8x8xf32>
    %236 = vector.shape_cast %235 : vector<8x8x8xf32> to vector<64x8xf32>
    %c1_211 = arith.constant 1 : index
    %c0_212 = arith.constant 0 : index
    %c0_213 = arith.constant 0 : index
    %237 = vector.load %arg20[%c1_211, %c0_212, %c0_213] : memref<10x10x8xf32, #tpu.memory_space<vmem>>, vector<8x8x8xf32>
    %238 = vector.shape_cast %237 : vector<8x8x8xf32> to vector<64x8xf32>
    %c0_214 = arith.constant 0 : index
    %c1_215 = arith.constant 1 : index
    %c0_216 = arith.constant 0 : index
    %239 = vector.load %arg20[%c0_214, %c1_215, %c0_216] : memref<10x10x8xf32, #tpu.memory_space<vmem>>, vector<8x8x8xf32>
    %240 = vector.shape_cast %239 : vector<8x8x8xf32> to vector<64x8xf32>
    %c0_217 = arith.constant 0 : index
    %c0_218 = arith.constant 0 : index
    %c0_219 = arith.constant 0 : index
    %241 = vector.load %arg20[%c0_217, %c0_218, %c0_219] : memref<10x10x8xf32, #tpu.memory_space<vmem>>, vector<8x8x8xf32>
    %242 = vector.shape_cast %241 : vector<8x8x8xf32> to vector<64x8xf32>
    %243 = tpu.concatenate %236, %238, %240, %242 in 1 : vector<64x8xf32>, vector<64x8xf32>, vector<64x8xf32>, vector<64x8xf32> -> vector<64x32xf32>
    %c0_220 = arith.constant 0 : index
    %c0_221 = arith.constant 0 : index
    %c0_222 = arith.constant 0 : index
    %244 = vector.load %arg14[%c0_220, %c0_221, %c0_222] : memref<4x32x4xf32, #tpu.memory_space<vmem>>, vector<1x32x4xf32>
    %245 = vector.shape_cast %244 : vector<1x32x4xf32> to vector<32x4xf32>
    %cst_223 = arith.constant dense<0.000000e+00> : vector<64x4xf32>
    %246 = tpu.matmul %243, %245, %cst_223 {dimension_numbers = #tpu.dot_dimension_numbers<[1], [0], [0], [1], [0, 0, 1, 1], [], []>} : vector<64x32xf32>, vector<32x4xf32>, vector<64x4xf32> -> vector<64x4xf32>
    %c0_224 = arith.constant 0 : index
    %c0_225 = arith.constant 0 : index
    %247 = vector.load %arg15[%c0_224, %c0_225] : memref<1x4xf32, #tpu.memory_space<vmem>>, vector<1x4xf32>
    %248 = vector.broadcast %247 : vector<1x4xf32> to vector<64x4xf32>
    %249 = arith.addf %246, %248 : vector<64x4xf32>
    %250 = vector.shape_cast %249 : vector<64x4xf32> to vector<8x8x4xf32>
    %c1_226 = arith.constant 1 : index
    %c2_227 = arith.constant 2 : index
    %c0_228 = arith.constant 0 : index
    %251 = vector.load %arg20[%c1_226, %c2_227, %c0_228] : memref<10x10x8xf32, #tpu.memory_space<vmem>>, vector<8x8x8xf32>
    %252 = vector.shape_cast %251 : vector<8x8x8xf32> to vector<64x8xf32>
    %c1_229 = arith.constant 1 : index
    %c1_230 = arith.constant 1 : index
    %c0_231 = arith.constant 0 : index
    %253 = vector.load %arg20[%c1_229, %c1_230, %c0_231] : memref<10x10x8xf32, #tpu.memory_space<vmem>>, vector<8x8x8xf32>
    %254 = vector.shape_cast %253 : vector<8x8x8xf32> to vector<64x8xf32>
    %c0_232 = arith.constant 0 : index
    %c2_233 = arith.constant 2 : index
    %c0_234 = arith.constant 0 : index
    %255 = vector.load %arg20[%c0_232, %c2_233, %c0_234] : memref<10x10x8xf32, #tpu.memory_space<vmem>>, vector<8x8x8xf32>
    %256 = vector.shape_cast %255 : vector<8x8x8xf32> to vector<64x8xf32>
    %c0_235 = arith.constant 0 : index
    %c1_236 = arith.constant 1 : index
    %c0_237 = arith.constant 0 : index
    %257 = vector.load %arg20[%c0_235, %c1_236, %c0_237] : memref<10x10x8xf32, #tpu.memory_space<vmem>>, vector<8x8x8xf32>
    %258 = vector.shape_cast %257 : vector<8x8x8xf32> to vector<64x8xf32>
    %259 = tpu.concatenate %252, %254, %256, %258 in 1 : vector<64x8xf32>, vector<64x8xf32>, vector<64x8xf32>, vector<64x8xf32> -> vector<64x32xf32>
    %c1_238 = arith.constant 1 : index
    %c0_239 = arith.constant 0 : index
    %c0_240 = arith.constant 0 : index
    %260 = vector.load %arg14[%c1_238, %c0_239, %c0_240] : memref<4x32x4xf32, #tpu.memory_space<vmem>>, vector<1x32x4xf32>
    %261 = vector.shape_cast %260 : vector<1x32x4xf32> to vector<32x4xf32>
    %cst_241 = arith.constant dense<0.000000e+00> : vector<64x4xf32>
    %262 = tpu.matmul %259, %261, %cst_241 {dimension_numbers = #tpu.dot_dimension_numbers<[1], [0], [0], [1], [0, 0, 1, 1], [], []>} : vector<64x32xf32>, vector<32x4xf32>, vector<64x4xf32> -> vector<64x4xf32>
    %c0_242 = arith.constant 0 : index
    %c0_243 = arith.constant 0 : index
    %263 = vector.load %arg15[%c0_242, %c0_243] : memref<1x4xf32, #tpu.memory_space<vmem>>, vector<1x4xf32>
    %264 = vector.broadcast %263 : vector<1x4xf32> to vector<64x4xf32>
    %265 = arith.addf %262, %264 : vector<64x4xf32>
    %266 = vector.shape_cast %265 : vector<64x4xf32> to vector<8x8x4xf32>
    %c2_244 = arith.constant 2 : index
    %c1_245 = arith.constant 1 : index
    %c0_246 = arith.constant 0 : index
    %267 = vector.load %arg20[%c2_244, %c1_245, %c0_246] : memref<10x10x8xf32, #tpu.memory_space<vmem>>, vector<8x8x8xf32>
    %268 = vector.shape_cast %267 : vector<8x8x8xf32> to vector<64x8xf32>
    %c2_247 = arith.constant 2 : index
    %c0_248 = arith.constant 0 : index
    %c0_249 = arith.constant 0 : index
    %269 = vector.load %arg20[%c2_247, %c0_248, %c0_249] : memref<10x10x8xf32, #tpu.memory_space<vmem>>, vector<8x8x8xf32>
    %270 = vector.shape_cast %269 : vector<8x8x8xf32> to vector<64x8xf32>
    %c1_250 = arith.constant 1 : index
    %c1_251 = arith.constant 1 : index
    %c0_252 = arith.constant 0 : index
    %271 = vector.load %arg20[%c1_250, %c1_251, %c0_252] : memref<10x10x8xf32, #tpu.memory_space<vmem>>, vector<8x8x8xf32>
    %272 = vector.shape_cast %271 : vector<8x8x8xf32> to vector<64x8xf32>
    %c1_253 = arith.constant 1 : index
    %c0_254 = arith.constant 0 : index
    %c0_255 = arith.constant 0 : index
    %273 = vector.load %arg20[%c1_253, %c0_254, %c0_255] : memref<10x10x8xf32, #tpu.memory_space<vmem>>, vector<8x8x8xf32>
    %274 = vector.shape_cast %273 : vector<8x8x8xf32> to vector<64x8xf32>
    %275 = tpu.concatenate %268, %270, %272, %274 in 1 : vector<64x8xf32>, vector<64x8xf32>, vector<64x8xf32>, vector<64x8xf32> -> vector<64x32xf32>
    %c2_256 = arith.constant 2 : index
    %c0_257 = arith.constant 0 : index
    %c0_258 = arith.constant 0 : index
    %276 = vector.load %arg14[%c2_256, %c0_257, %c0_258] : memref<4x32x4xf32, #tpu.memory_space<vmem>>, vector<1x32x4xf32>
    %277 = vector.shape_cast %276 : vector<1x32x4xf32> to vector<32x4xf32>
    %cst_259 = arith.constant dense<0.000000e+00> : vector<64x4xf32>
    %278 = tpu.matmul %275, %277, %cst_259 {dimension_numbers = #tpu.dot_dimension_numbers<[1], [0], [0], [1], [0, 0, 1, 1], [], []>} : vector<64x32xf32>, vector<32x4xf32>, vector<64x4xf32> -> vector<64x4xf32>
    %c0_260 = arith.constant 0 : index
    %c0_261 = arith.constant 0 : index
    %279 = vector.load %arg15[%c0_260, %c0_261] : memref<1x4xf32, #tpu.memory_space<vmem>>, vector<1x4xf32>
    %280 = vector.broadcast %279 : vector<1x4xf32> to vector<64x4xf32>
    %281 = arith.addf %278, %280 : vector<64x4xf32>
    %282 = vector.shape_cast %281 : vector<64x4xf32> to vector<8x8x4xf32>
    %c2_262 = arith.constant 2 : index
    %c2_263 = arith.constant 2 : index
    %c0_264 = arith.constant 0 : index
    %283 = vector.load %arg20[%c2_262, %c2_263, %c0_264] : memref<10x10x8xf32, #tpu.memory_space<vmem>>, vector<8x8x8xf32>
    %284 = vector.shape_cast %283 : vector<8x8x8xf32> to vector<64x8xf32>
    %c2_265 = arith.constant 2 : index
    %c1_266 = arith.constant 1 : index
    %c0_267 = arith.constant 0 : index
    %285 = vector.load %arg20[%c2_265, %c1_266, %c0_267] : memref<10x10x8xf32, #tpu.memory_space<vmem>>, vector<8x8x8xf32>
    %286 = vector.shape_cast %285 : vector<8x8x8xf32> to vector<64x8xf32>
    %c1_268 = arith.constant 1 : index
    %c2_269 = arith.constant 2 : index
    %c0_270 = arith.constant 0 : index
    %287 = vector.load %arg20[%c1_268, %c2_269, %c0_270] : memref<10x10x8xf32, #tpu.memory_space<vmem>>, vector<8x8x8xf32>
    %288 = vector.shape_cast %287 : vector<8x8x8xf32> to vector<64x8xf32>
    %c1_271 = arith.constant 1 : index
    %c1_272 = arith.constant 1 : index
    %c0_273 = arith.constant 0 : index
    %289 = vector.load %arg20[%c1_271, %c1_272, %c0_273] : memref<10x10x8xf32, #tpu.memory_space<vmem>>, vector<8x8x8xf32>
    %290 = vector.shape_cast %289 : vector<8x8x8xf32> to vector<64x8xf32>
    %291 = tpu.concatenate %284, %286, %288, %290 in 1 : vector<64x8xf32>, vector<64x8xf32>, vector<64x8xf32>, vector<64x8xf32> -> vector<64x32xf32>
    %c3_274 = arith.constant 3 : index
    %c0_275 = arith.constant 0 : index
    %c0_276 = arith.constant 0 : index
    %292 = vector.load %arg14[%c3_274, %c0_275, %c0_276] : memref<4x32x4xf32, #tpu.memory_space<vmem>>, vector<1x32x4xf32>
    %293 = vector.shape_cast %292 : vector<1x32x4xf32> to vector<32x4xf32>
    %cst_277 = arith.constant dense<0.000000e+00> : vector<64x4xf32>
    %294 = tpu.matmul %291, %293, %cst_277 {dimension_numbers = #tpu.dot_dimension_numbers<[1], [0], [0], [1], [0, 0, 1, 1], [], []>} : vector<64x32xf32>, vector<32x4xf32>, vector<64x4xf32> -> vector<64x4xf32>
    %c0_278 = arith.constant 0 : index
    %c0_279 = arith.constant 0 : index
    %295 = vector.load %arg15[%c0_278, %c0_279] : memref<1x4xf32, #tpu.memory_space<vmem>>, vector<1x4xf32>
    %296 = vector.broadcast %295 : vector<1x4xf32> to vector<64x4xf32>
    %297 = arith.addf %294, %296 : vector<64x4xf32>
    %298 = vector.shape_cast %297 : vector<64x4xf32> to vector<8x8x4xf32>
    %299 = vector.shape_cast %250 : vector<8x8x4xf32> to vector<8x8x1x4xf32>
    %300 = vector.shape_cast %266 : vector<8x8x4xf32> to vector<8x8x1x4xf32>
    %301 = tpu.concatenate %299, %300 in 2 : vector<8x8x1x4xf32>, vector<8x8x1x4xf32> -> vector<8x8x2x4xf32>
    %302 = vector.shape_cast %301 : vector<8x8x2x4xf32> to vector<8x1x16x4xf32>
    %303 = vector.shape_cast %282 : vector<8x8x4xf32> to vector<8x8x1x4xf32>
    %304 = vector.shape_cast %298 : vector<8x8x4xf32> to vector<8x8x1x4xf32>
    %305 = tpu.concatenate %303, %304 in 2 : vector<8x8x1x4xf32>, vector<8x8x1x4xf32> -> vector<8x8x2x4xf32>
    %306 = vector.shape_cast %305 : vector<8x8x2x4xf32> to vector<8x1x16x4xf32>
    %307 = tpu.concatenate %302, %306 in 1 : vector<8x1x16x4xf32>, vector<8x1x16x4xf32> -> vector<8x2x16x4xf32>
    %308 = vector.shape_cast %307 : vector<8x2x16x4xf32> to vector<16x16x4xf32>
    %c0_280 = arith.constant 0 : index
    %c0_281 = arith.constant 0 : index
    %c0_282 = arith.constant 0 : index
    %c0_283 = arith.constant 0 : index
    %309 = vector.load %arg16[%c0_280, %c0_281, %c0_282, %c0_283] : memref<1x16x16x4xf32, #tpu.memory_space<vmem>>, vector<1x16x16x4xf32>
    %310 = vector.shape_cast %309 : vector<1x16x16x4xf32> to vector<16x16x4xf32>
    %311 = vector.shape_cast %308 : vector<16x16x4xf32> to vector<1x16x16x4xf32>
    tpu.vector_store %arg16[%c0_280, %c0_281, %c0_282, %c0_283], %311 {strides = array<i32>} : memref<1x16x16x4xf32, #tpu.memory_space<vmem>>, vector<1x16x16x4xf32>,
    return
  }
  func.func @transform_0(%arg0: i32) -> (i32, i32, i32, i32, i32) {
    %c0_i32 = arith.constant 0 : i32
    %c0_i32_0 = arith.constant 0 : i32
    %c0_i32_1 = arith.constant 0 : i32
    %c0_i32_2 = arith.constant 0 : i32
    %c0_i32_3 = arith.constant 0 : i32
    return %arg0, %c0_i32, %c0_i32_0, %c0_i32_1, %c0_i32_2 : i32, i32, i32, i32, i32
  }
  func.func @transform_1(%arg0: i32) -> (i32, i32) {
    %c0_i32 = arith.constant 0 : i32
    %c0_i32_0 = arith.constant 0 : i32
    %c0_i32_1 = arith.constant 0 : i32
    return %c0_i32, %c0_i32_0 : i32, i32
  }
  func.func @transform_2(%arg0: i32) -> (i32, i32) {
    %c0_i32 = arith.constant 0 : i32
    %c0_i32_0 = arith.constant 0 : i32
    %c0_i32_1 = arith.constant 0 : i32
    return %c0_i32, %c0_i32_0 : i32, i32
  }
  func.func @transform_3(%arg0: i32) -> (i32, i32) {
    %c0_i32 = arith.constant 0 : i32
    %c0_i32_0 = arith.constant 0 : i32
    %c0_i32_1 = arith.constant 0 : i32
    return %c0_i32, %c0_i32_0 : i32, i32
  }
  func.func @transform_4(%arg0: i32) -> (i32, i32) {
    %c0_i32 = arith.constant 0 : i32
    %c0_i32_0 = arith.constant 0 : i32
    %c0_i32_1 = arith.constant 0 : i32
    return %c0_i32, %c0_i32_0 : i32, i32
  }
  func.func @transform_5(%arg0: i32) -> (i32, i32) {
    %c0_i32 = arith.constant 0 : i32
    %c0_i32_0 = arith.constant 0 : i32
    %c0_i32_1 = arith.constant 0 : i32
    return %c0_i32, %c0_i32_0 : i32, i32
  }
  func.func @transform_6(%arg0: i32) -> (i32, i32) {
    %c0_i32 = arith.constant 0 : i32
    %c0_i32_0 = arith.constant 0 : i32
    %c0_i32_1 = arith.constant 0 : i32
    return %c0_i32, %c0_i32_0 : i32, i32
  }
  func.func @transform_7(%arg0: i32) -> (i32, i32) {
    %c0_i32 = arith.constant 0 : i32
    %c0_i32_0 = arith.constant 0 : i32
    %c0_i32_1 = arith.constant 0 : i32
    return %c0_i32, %c0_i32_0 : i32, i32
  }
  func.func @transform_8(%arg0: i32) -> (i32, i32) {
    %c0_i32 = arith.constant 0 : i32
    %c0_i32_0 = arith.constant 0 : i32
    %c0_i32_1 = arith.constant 0 : i32
    return %c0_i32, %c0_i32_0 : i32, i32
  }
  func.func @transform_9(%arg0: i32) -> (i32, i32) {
    %c0_i32 = arith.constant 0 : i32
    %c0_i32_0 = arith.constant 0 : i32
    %c0_i32_1 = arith.constant 0 : i32
    return %c0_i32, %c0_i32_0 : i32, i32
  }
  func.func @transform_10(%arg0: i32) -> (i32, i32) {
    %c0_i32 = arith.constant 0 : i32
    %c0_i32_0 = arith.constant 0 : i32
    %c0_i32_1 = arith.constant 0 : i32
    return %c0_i32, %c0_i32_0 : i32, i32
  }
  func.func @transform_11(%arg0: i32) -> (i32, i32, i32) {
    %c0_i32 = arith.constant 0 : i32
    %c0_i32_0 = arith.constant 0 : i32
    %c0_i32_1 = arith.constant 0 : i32
    %c0_i32_2 = arith.constant 0 : i32
    return %c0_i32, %c0_i32_0, %c0_i32_1 : i32, i32, i32
  }
  func.func @transform_12(%arg0: i32) -> (i32, i32) {
    %c0_i32 = arith.constant 0 : i32
    %c0_i32_0 = arith.constant 0 : i32
    %c0_i32_1 = arith.constant 0 : i32
    return %c0_i32, %c0_i32_0 : i32, i32
  }
  func.func @transform_13(%arg0: i32) -> (i32, i32, i32) {
    %c0_i32 = arith.constant 0 : i32
    %c0_i32_0 = arith.constant 0 : i32
    %c0_i32_1 = arith.constant 0 : i32
    %c0_i32_2 = arith.constant 0 : i32
    return %c0_i32, %c0_i32_0, %c0_i32_1 : i32, i32, i32
  }
  func.func @transform_14(%arg0: i32) -> (i32, i32) {
    %c0_i32 = arith.constant 0 : i32
    %c0_i32_0 = arith.constant 0 : i32
    %c0_i32_1 = arith.constant 0 : i32
    return %c0_i32, %c0_i32_0 : i32, i32
  }
  func.func @transform_15(%arg0: i32) -> (i32, i32, i32, i32) {
    %c0_i32 = arith.constant 0 : i32
    %c0_i32_0 = arith.constant 0 : i32
    %c0_i32_1 = arith.constant 0 : i32
    %c0_i32_2 = arith.constant 0 : i32
    return %arg0, %c0_i32, %c0_i32_0, %c0_i32_1 : i32, i32, i32, i32
  }
}

</mosaic_0001>

<bundles_post_ra>
// kernel: conv_autoencoder_dense.1
= control target key start
LH: loop header
LB: loop body
LE: loop exit
PB: predicated region body
PF: predicated region fallthrough
CT: control target
= control target key end

     0   :  { %s4831_s18 = smov 0   ;;  %s6783_s0 = inlined_call_operand.vmem [shape: f32[2,8,2,8,8], index: 0, kind: input, shape index: {}]   ;;  %s6784_s1 = inlined_call_operand.vmem [shape: f32[36,8], index: 1, kind: input, shape index: {}]   ;;  %s6785_s2 = inlined_call_operand.vmem [shape: f32[1,8], index: 2, kind: input, shape index: {}]   ;;  %s6786_s3 = inlined_call_operand.vmem [shape: f32[72,16], index: 3, kind: input, shape index: {}]   ;;  %s6787_s4 = inlined_call_operand.vmem [shape: f32[1,16], index: 4, kind: input, shape index: {}]   ;;  %s6788_s5 = inlined_call_operand.vmem [shape: f32[256,64], index: 5, kind: input, shape index: {}]   ;;  %s6789_s6 = inlined_call_operand.vmem [shape: f32[1,64], index: 6, kind: input, shape index: {}]   ;;  %s6790_s7 = inlined_call_operand.vmem [shape: f32[64,256], index: 7, kind: input, shape index: {}]   ;;  %s6791_s8 = inlined_call_operand.vmem [shape: f32[1,256], index: 8, kind: input, shape index: {}]   ;;  %s6792_s9 = inlined_call_operand.vmem [shape: f32[256,256], index: 9, kind: input, shape index: {}]   ;;  %s6793_s10 = inlined_call_operand.vmem [shape: f32[1,256], index: 10, kind: input, shape index: {}]   ;;  %s6794_s11 = inlined_call_operand.vmem [shape: f32[4,64,8], index: 11, kind: input, shape index: {}]   ;;  %s6795_s12 = inlined_call_operand.vmem [shape: f32[1,8], index: 12, kind: input, shape index: {}]   ;;  %s6796_s13 = inlined_call_operand.vmem [shape: f32[4,32,4], index: 13, kind: input, shape index: {}]   ;;  %s6797_s14 = inlined_call_operand.vmem [shape: f32[1,4], index: 14, kind: input, shape index: {}]   ;;  %s6798_s15 = inlined_call_operand.vmem [shape: f32[2,16,16,4], index: 15, kind: output, shape index: {}]  }
   0x1 LB: > { %s4551_s19 = sadd.s32 4294967295, %s4732_s18   ;;  %p4555_p0 = scmp.ge.s32.totalorder %s4732_s18, 1  ;;  %s4732_s18 = sphi %s4831_s18, %s25_s18  }
   0x2   : > { %p437_p1 = scmp.lt.s32.totalorder %s4732_s18, 3 }
   0x4   : > { %p438_p2 = pnand %p4555_p0, %p437_p1 }
   0x6   : > { %441 = sbr.rel (%p438_p2) target bundleno = 2598 (0xa26), region = 80 }
   0xb   : > { %vm495_vm0 = vcmask 64512   ;;  %v4734_v0 = vmov 0.0   ;;  %s4735_s20 = smov 124   ;;  %p485_p3 = scmp.lt.s32.totalorder %s4551_s19, 1  ;;  %vm497_vm1 = vcmask 58368   ;;  %vm956_vm2 = vcmask 1043456  }
   0xc   : > { %499 = vst.msk [vmem:[#allocation2 + $0x10] sm:$0xff] %vm495_vm0, %v4734_v0  ;;  %s6801_s25 = smov 8   ;;  %s4737_s26 = smov 4   ;;  %v926_v41 = vld [vmem:[%s6784_s1 + $0x20] sm:$0xf]  ;;  %v925_v42 = vld [vmem:[%s6784_s1 + $0x18] sm:$0xff] }
   0xd   : > { %501 = vst.msk [vmem:[#allocation2 + $0x20] sm:$0xff] %vm495_vm0, %v4734_v0  ;;  %s6862_s19 = smov (!%p485_p3, %s4551_s19), 1  ;;  %s6799_s27 = smov 16   ;;  %4560 = vmatpush.msk.msra.mxu0 %vm956_vm2, %v926_v41  ;;  %v924_v43 = vld [vmem:[%s6784_s1 + $0x10] sm:$0xff]  ;;  %v923_v44 = vld [vmem:[%s6784_s1 + $0x8] sm:$0xff]  ;;  %v922_v48 = vld [vmem:[%s6784_s1] sm:$0xff] }
   0xe   : > { %503 = vst.msk [vmem:[#allocation2 + $0x30] sm:$0xff] %vm495_vm0, %v4734_v0  ;;  %s4651_s21 = sshll.u32 %s6862_s19, 7  ;;  %s4739_s28 = smov 20   ;;  %vm851_vm3 = vcmask 31744   ;;  %vm868_vm4 = vcmask 97280   ;;  %vm877_vm5 = vcmask 130048  }
   0xf   : > { %505 = vst.msk [vmem:[#allocation2 + $0x40] sm:$0xff] %vm495_vm0, %v4734_v0  ;;  %s4902_s24 = scalar_lea.vmem %s6783_s0, %s4651_s21  ;;  %s4740_s29 = smov 28   ;;  %972 = vmatpush.msra.mxu0 %v925_v42  ;;  %vm886_vm6 = vcmask 162816   ;;  %vm895_vm7 = vcmask 195584   ;;  %vm904_vm8 = vcmask 228352   ;;  %vm913_vm9 = vcmask 261120  }
  0x10   : > { %507 = vst.msk [vmem:[#allocation2 + $0x50] sm:$0xff] %vm495_vm0, %v4734_v0  ;;  %v576_v2 = vld [vmem:[%s4902_s24] sm:$0xff]  ;;  %v577_v6 = vld [vmem:[%s4902_s24 + $0x8] sm:$0xff]  ;;  %v578_v7 = vld [vmem:[%s4902_s24 + $0x10] sm:$0xff]  ;;  %vm931_vm10 = vcmask 293888   ;;  %vm537_vm11 = vcmask 128000  }
  0x11   : > { %509 = vst.msk [vmem:[#allocation2 + $0x60] sm:$0xff] %vm495_vm0, %v4734_v0  ;;  %v579_v8 = vld [vmem:[%s4902_s24 + $0x18] sm:$0xff]  ;;  %v580_v9 = vld [vmem:[%s4902_s24 + $0x20] sm:$0xff]  ;;  %v581_v10 = vld [vmem:[%s4902_s24 + $0x28] sm:$0xff]  ;;  %973 = vmatpush.msra.mxu0 %v924_v43  ;;  %vm1113_vm12 = vcmask 1040384   ;;  %vm1122_vm13 = vcmask 1041408  }
  0x12   : > { %511 = vst.msk [vmem:[#allocation2 + $0x70] sm:$0xff] %vm495_vm0, %v4734_v0  ;;  %v582_v13 = vld [vmem:[%s4902_s24 + $0x30] sm:$0xff]  ;;  %v583_v14 = vld [vmem:[%s4902_s24 + $0x38] sm:$0xff]  ;;  %v584_v19 = vld [vmem:[%s4902_s24 + $0x40] sm:$0xff]  ;;  %vm1131_vm14 = vcmask 1042432   ;;  %vm1141_vm15 = vcmask 125952  }
  0x13   : > { %v610_v1 = vld [vmem:[#allocation2 + $0x10] sm:$0xff]  ;;  %513 = vst.msk [vmem:[#allocation2 + $0x80] sm:$0xff] %vm495_vm0, %v4734_v0  ;;  %v585_v20 = vld [vmem:[%s4902_s24 + $0x48] sm:$0xff]  ;;  %v586_v25 = vld [vmem:[%s4902_s24 + $0x50] sm:$0xff]  ;;  %974 = vmatpush.msra.mxu0 %v923_v44  ;;  %s4743_s17 = smov 40   ;;  %s4744_s21 = smov 56  }
  0x14   : > { %667 = vrot.lane.b32.xlu0 %v610_v1, %s4735_s20  ;;  %515 = vst.msk [vmem:[#allocation2 + $0x90] sm:$0xff] %vm495_vm0, %v4734_v0  ;;  %v587_v26 = vld [vmem:[%s4902_s24 + $0x58] sm:$0xff]  ;;  %v588_v31 = vld [vmem:[%s4902_s24 + $0x60] sm:$0xff]  ;;  %v589_v32 = vld [vmem:[%s4902_s24 + $0x68] sm:$0xff]  ;;  %vm1346_vm2 = vcmask 392192   ;;  %s6803_s22 = smov 48  }
  0x15   : > { %517 = vst.msk [vmem:[#allocation2 + $0xa0] sm:$0xff] %vm495_vm0, %v4734_v0  ;;  %v590_v37 = vld [vmem:[%s4902_s24 + $0x70] sm:$0xff]  ;;  %v591_v38 = vld [vmem:[%s4902_s24 + $0x78] sm:$0xff]  ;;  %975 = vmatpush.msra.mxu0 %v922_v48  ;;  %s4746_s23 = smov 96   ;;  %s4747_s24 = smov 80  }
  0x16   : > { %519 = vst.msk [vmem:[#allocation2 + $0xb0] sm:$0xff] %vm495_vm0, %v4734_v0  ;;  %s6807_s30 = smov 64   ;;  %s6809_s16 = smov 112  }
  0x17   : > { %521 = vst.msk [vmem:[#allocation2 + $0xc0] sm:$0xff] %vm495_vm0, %v4734_v0 }
  0x18   : > { %523 = vst.msk [vmem:[#allocation2 + $0xd0] sm:$0xff] %vm495_vm0, %v4734_v0 }
  0x19   : > { %525 = vst.msk [vmem:[#allocation2 + $0xe0] sm:$0xff] %vm495_vm0, %v4734_v0 }
  0x1a   : > { %527 = vst.msk [vmem:[#allocation2 + $0xf0] sm:$0xff] %vm495_vm0, %v4734_v0 }
  0x1b   : > { %529 = vst.msk [vmem:[#allocation2 + $0x100] sm:$0xff] %vm495_vm0, %v4734_v0 }
  0x1c   : > { %531 = vst.msk [vmem:[#allocation2 + $0x110] sm:$0xff] %vm495_vm0, %v4734_v0 }
  0x1d   : > { %556 = vst.msk [vmem:[#allocation5] sm:$0xff] %vm495_vm0, %v4734_v0 }
  0x1e   : > { %558 = vst.msk [vmem:[#allocation5 + $0x10] sm:$0xff] %vm495_vm0, %v4734_v0 }
  0x1f   : > { %560 = vst.msk [vmem:[#allocation5 + $0x20] sm:$0xff] %vm495_vm0, %v4734_v0 }
  0x20   : > { %562 = vst.msk [vmem:[#allocation5 + $0x30] sm:$0xff] %vm495_vm0, %v4734_v0 }
  0x21   : > { %564 = vst.msk [vmem:[#allocation5 + $0x40] sm:$0xff] %vm495_vm0, %v4734_v0 }
  0x22   : > { %566 = vst.msk [vmem:[#allocation5 + $0x50] sm:$0xff] %vm495_vm0, %v4734_v0 }
  0x23   : > { %568 = vst.msk [vmem:[#allocation5 + $0x60] sm:$0xff] %vm495_vm0, %v4734_v0 }
  0x24   : > { %570 = vst.msk [vmem:[#allocation5 + $0x70] sm:$0xff] %vm495_vm0, %v4734_v0 }
  0x25   : > { %572 = vst.msk [vmem:[#allocation5 + $0x80] sm:$0xff] %vm495_vm0, %v4734_v0 }
  0x26   : > { %574 = vst.msk [vmem:[#allocation5 + $0x90] sm:$0xff] %vm495_vm0, %v4734_v0 }
  0x27   : > { %502 = vst.msk [vmem:[#allocation2 + $0x28] sm:$0x3] %vm497_vm1, %v4734_v0 }
  0x28   : > { %593 = vst.msk [vmem:[#allocation2 + $0x21] sm:$0xff] %vm495_vm0, %v576_v2 }
  0x29   : > { %500 = vst.msk [vmem:[#allocation2 + $0x18] sm:$0x3] %vm497_vm1, %v4734_v0 }
  0x2a   : > { %504 = vst.msk [vmem:[#allocation2 + $0x38] sm:$0x3] %vm497_vm1, %v4734_v0 }
  0x2b   : > { %506 = vst.msk [vmem:[#allocation2 + $0x48] sm:$0x3] %vm497_vm1, %v4734_v0 }
  0x2c   : > { %508 = vst.msk [vmem:[#allocation2 + $0x58] sm:$0x3] %vm497_vm1, %v4734_v0 }
  0x2d   : > { %510 = vst.msk [vmem:[#allocation2 + $0x68] sm:$0x3] %vm497_vm1, %v4734_v0 }
  0x2e   : > { %512 = vst.msk [vmem:[#allocation2 + $0x78] sm:$0x3] %vm497_vm1, %v4734_v0 }
  0x2f   : > { %v626_v3 = vld [vmem:[#allocation2 + $0x20] sm:$0xff]  ;;  %514 = vst.msk [vmem:[#allocation2 + $0x88] sm:$0x3] %vm497_vm1, %v4734_v0 }
  0x30   : > { %731 = vrot.lane.b32.xlu1 %v626_v3, %s6801_s25  ;;  %516 = vst.msk [vmem:[#allocation2 + $0x98] sm:$0x3] %vm497_vm1, %v4734_v0  ;;  %v618_v4 = vld [vmem:[#allocation2 + $0x11] sm:$0xff]  ;;  %v634_v5 = vld [vmem:[#allocation2 + $0x21] sm:$0xff] }
  0x31   : > { %518 = vst.msk [vmem:[#allocation2 + $0xa8] sm:$0x3] %vm497_vm1, %v4734_v0  ;;  %699 = vrot.lane.b32.xlu0 %v618_v4, %s4737_s26 }
  0x32   : > { %520 = vst.msk [vmem:[#allocation2 + $0xb8] sm:$0x3] %vm497_vm1, %v4734_v0 }
  0x33   : > { %522 = vst.msk [vmem:[#allocation2 + $0xc8] sm:$0x3] %vm497_vm1, %v4734_v0 }
  0x34   : > { %524 = vst.msk [vmem:[#allocation2 + $0xd8] sm:$0x3] %vm497_vm1, %v4734_v0 }
  0x35   : > { %526 = vst.msk [vmem:[#allocation2 + $0xe8] sm:$0x3] %vm497_vm1, %v4734_v0 }
  0x36   : > { %528 = vst.msk [vmem:[#allocation2 + $0xf8] sm:$0x3] %vm497_vm1, %v4734_v0 }
  0x37   : > { %530 = vst.msk [vmem:[#allocation2 + $0x108] sm:$0x3] %vm497_vm1, %v4734_v0 }
  0x38   : > { %532 = vst.msk [vmem:[#allocation2 + $0x118] sm:$0x3] %vm497_vm1, %v4734_v0  ;;  %763 = vrot.lane.b32.xlu1 %v634_v5, %s6799_s27 }
  0x39   : > { %557 = vst.msk [vmem:[#allocation5 + $0x8] sm:$0x3] %vm497_vm1, %v4734_v0 }
  0x3a   : > { %559 = vst.msk [vmem:[#allocation5 + $0x18] sm:$0x3] %vm497_vm1, %v4734_v0 }
  0x3b   : > { %561 = vst.msk [vmem:[#allocation5 + $0x28] sm:$0x3] %vm497_vm1, %v4734_v0 }
  0x3c   : > { %563 = vst.msk [vmem:[#allocation5 + $0x38] sm:$0x3] %vm497_vm1, %v4734_v0 }
  0x3d   : > { %565 = vst.msk [vmem:[#allocation5 + $0x48] sm:$0x3] %vm497_vm1, %v4734_v0 }
  0x3e   : > { %567 = vst.msk [vmem:[#allocation5 + $0x58] sm:$0x3] %vm497_vm1, %v4734_v0 }
  0x3f   : > { %569 = vst.msk [vmem:[#allocation5 + $0x68] sm:$0x3] %vm497_vm1, %v4734_v0 }
  0x40   : > { %571 = vst.msk [vmem:[#allocation5 + $0x78] sm:$0x3] %vm497_vm1, %v4734_v0 }
  0x41   : > { %573 = vst.msk [vmem:[#allocation5 + $0x88] sm:$0x3] %vm497_vm1, %v4734_v0 }
  0x42   : > { %575 = vst.msk [vmem:[#allocation5 + $0x98] sm:$0x3] %vm497_vm1, %v4734_v0  ;;  %vm1343_vm1 = vcmask 326656  }
  0x43   : > { %594 = vst.msk [vmem:[#allocation2 + $0x31] sm:$0xff] %vm495_vm0, %v577_v6 }
  0x44   : > { %595 = vst.msk [vmem:[#allocation2 + $0x41] sm:$0xff] %vm495_vm0, %v578_v7 }
  0x45   : > { %596 = vst.msk [vmem:[#allocation2 + $0x51] sm:$0xff] %vm495_vm0, %v579_v8 }
  0x46   : > { %597 = vst.msk [vmem:[#allocation2 + $0x61] sm:$0xff] %vm495_vm0, %v580_v9 }
  0x47   : > { %598 = vst.msk [vmem:[#allocation2 + $0x71] sm:$0xff] %vm495_vm0, %v581_v10 }
  0x48   : > { %599 = vst.msk [vmem:[#allocation2 + $0x81] sm:$0xff] %vm495_vm0, %v582_v13 }
  0x49   : > { %600 = vst.msk [vmem:[#allocation2 + $0x91] sm:$0xff] %vm495_vm0, %v583_v14 }
  0x4a   : > { %v611_v11 = vld [vmem:[#allocation2 + $0x30] sm:$0xff]  ;;  %601 = vst.msk [vmem:[#allocation2 + $0xa1] sm:$0xff] %vm495_vm0, %v584_v19 }
  0x4b   : > { %v619_v12 = vld [vmem:[#allocation2 + $0x31] sm:$0xff]  ;;  %669 = vrot.lane.b32.xlu0 %v611_v11, %s4735_s20  ;;  %795 = vrot.lane.b32.xlu2 %v611_v11, %s4739_s28  ;;  %v635_v15 = vld [vmem:[#allocation2 + $0x41] sm:$0xff]  ;;  %602 = vst.msk [vmem:[#allocation2 + $0xb1] sm:$0xff] %vm495_vm0, %v585_v20 }
  0x4c   : > { %701 = vrot.lane.b32.xlu1 %v619_v12, %s4737_s26  ;;  %v644_v16 = vld [vmem:[#allocation2 + $0x50] sm:$0xff]  ;;  %v627_v18 = vld [vmem:[#allocation2 + $0x40] sm:$0xff]  ;;  %603 = vst.msk [vmem:[#allocation2 + $0xc1] sm:$0xff] %vm495_vm0, %v586_v25 }
  0x4d   : > { %v620_v17 = vld [vmem:[#allocation2 + $0x51] sm:$0xff]  ;;  %v636_v21 = vld [vmem:[#allocation2 + $0x61] sm:$0xff]  ;;  %604 = vst.msk [vmem:[#allocation2 + $0xd1] sm:$0xff] %vm495_vm0, %v587_v26 }
  0x4e   : > { %v645_v22 = vld [vmem:[#allocation2 + $0x70] sm:$0xff]  ;;  %v628_v24 = vld [vmem:[#allocation2 + $0x60] sm:$0xff]  ;;  %605 = vst.msk [vmem:[#allocation2 + $0xe1] sm:$0xff] %vm495_vm0, %v588_v31 }
  0x4f   : > { %v621_v23 = vld [vmem:[#allocation2 + $0x71] sm:$0xff]  ;;  %v637_v27 = vld [vmem:[#allocation2 + $0x81] sm:$0xff]  ;;  %606 = vst.msk [vmem:[#allocation2 + $0xf1] sm:$0xff] %vm495_vm0, %v589_v32 }
  0x50   : > { %v646_v28 = vld [vmem:[#allocation2 + $0x90] sm:$0xff]  ;;  %v629_v30 = vld [vmem:[#allocation2 + $0x80] sm:$0xff]  ;;  %607 = vst.msk [vmem:[#allocation2 + $0x101] sm:$0xff] %vm495_vm0, %v590_v37 }
  0x51   : > { %v622_v29 = vld [vmem:[#allocation2 + $0x91] sm:$0xff]  ;;  %v638_v33 = vld [vmem:[#allocation2 + $0xa1] sm:$0xff]  ;;  %608 = vst.msk [vmem:[#allocation2 + $0x111] sm:$0xff] %vm495_vm0, %v591_v38 }
  0x52   : > { %v647_v34 = vld [vmem:[#allocation2 + $0xb0] sm:$0xff]  ;;  %v630_v36 = vld [vmem:[#allocation2 + $0xa0] sm:$0xff]  ;;  %539 = vst.msk [vmem:[#allocation3 + $0x8] sm:$0x3f] %vm537_vm11, %v4734_v0 }
  0x53   : > { %765 = vrot.lane.b32.xlu0 %v635_v15, %s6799_s27  ;;  %827 = vrot.lane.b32.xlu2 %v619_v12, %s4740_s29  ;;  %v623_v35 = vld [vmem:[#allocation2 + $0xb1] sm:$0xff]  ;;  %v639_v39 = vld [vmem:[#allocation2 + $0xc1] sm:$0xff]  ;;  %541 = vst.msk [vmem:[#allocation3 + $0x18] sm:$0x3f] %vm537_vm11, %v4734_v0 }
  0x54   : > { %797 = vrot.lane.b32.xlu1 %v644_v16, %s4739_s28  ;;  %v648_v40 = vld [vmem:[#allocation2 + $0xd0] sm:$0xff]  ;;  %v631_v46 = vld [vmem:[#allocation2 + $0xc0] sm:$0xff]  ;;  %550 = vst.msk [vmem:[#allocation4] sm:$0x3f] %vm537_vm11, %v4734_v0 }
  0x55   : > { %v624_v45 = vld [vmem:[#allocation2 + $0xd1] sm:$0xff]  ;;  %v640_v49 = vld [vmem:[#allocation2 + $0xe1] sm:$0xff]  ;;  %555 = vst.msk [vmem:[#allocation4 + $0x28] sm:$0x3f] %vm537_vm11, %v4734_v0 }
  0x56   : > { %v649_v50 = vld [vmem:[#allocation2 + $0xf0] sm:$0xff]  ;;  %v632_v57 = vld [vmem:[#allocation2 + $0xe0] sm:$0xff]  ;;  %540 = vst.msk [vmem:[#allocation3 + $0x10] sm:$0x3f] %vm537_vm11, %v4734_v0 }
  0x57   : > { %v625_v56 = vld [vmem:[#allocation2 + $0xf1] sm:$0xff]  ;;  %v641_v2 = vld [vmem:[#allocation2 + $0x101] sm:$0xff]  ;;  %542 = vst.msk [vmem:[#allocation3 + $0x20] sm:$0x3f] %vm537_vm11, %v4734_v0 }
  0x58   : > { %v650_v3 = vld [vmem:[#allocation2 + $0x110] sm:$0xff]  ;;  %v633_v6 = vld [vmem:[#allocation2 + $0x100] sm:$0xff]  ;;  %543 = vst.msk [vmem:[#allocation3 + $0x28] sm:$0x3f] %vm537_vm11, %v4734_v0 }
  0x59   : > { %v658_v12 = vld [vmem:[#allocation2 + $0x111] sm:$0xff]  ;;  %544 = vst.msk [vmem:[#allocation3 + $0x30] sm:$0x3f] %vm537_vm11, %v4734_v0 }
  0x5a   : > { %545 = vst.msk [vmem:[#allocation3 + $0x38] sm:$0x3f] %vm537_vm11, %v4734_v0 }
  0x5b   : > { %671 = vrot.lane.b32.xlu0 %v644_v16, %s4735_s20  ;;  %733 = vrot.lane.b32.xlu2 %v627_v18, %s6801_s25  ;;  %546 = vst.msk [vmem:[#allocation3 + $0x40] sm:$0x3f] %vm537_vm11, %v4734_v0 }
  0x5c   : > { %703 = vrot.lane.b32.xlu1 %v620_v17, %s4737_s26  ;;  %547 = vst.msk [vmem:[#allocation3 + $0x48] sm:$0x3f] %vm537_vm11, %v4734_v0 }
  0x5d   : > { %551 = vst.msk [vmem:[#allocation4 + $0x8] sm:$0x3f] %vm537_vm11, %v4734_v0 }
  0x5e   : > { %552 = vst.msk [vmem:[#allocation4 + $0x10] sm:$0x3f] %vm537_vm11, %v4734_v0 }
  0x5f   : > { %553 = vst.msk [vmem:[#allocation4 + $0x18] sm:$0x3f] %vm537_vm11, %v4734_v0 }
  0x60   : > { %554 = vst.msk [vmem:[#allocation4 + $0x20] sm:$0x3f] %vm537_vm11, %v4734_v0  ;;  %vm1464_vm11 = vcmask 785408  }
  0x63   : > { %767 = vrot.lane.b32.xlu0 %v636_v21, %s6799_s27  ;;  %829 = vrot.lane.b32.xlu2 %v620_v17, %s4740_s29 }
  0x64   : > { %799 = vrot.lane.b32.xlu1 %v645_v22, %s4739_s28 }
  0x6b   : > { %673 = vrot.lane.b32.xlu0 %v645_v22, %s4735_s20  ;;  %735 = vrot.lane.b32.xlu2 %v628_v24, %s6801_s25 }
  0x6c   : > { %705 = vrot.lane.b32.xlu1 %v621_v23, %s4737_s26 }
  0x73   : > { %769 = vrot.lane.b32.xlu0 %v637_v27, %s6799_s27  ;;  %831 = vrot.lane.b32.xlu2 %v621_v23, %s4740_s29 }
  0x74   : > { %801 = vrot.lane.b32.xlu1 %v646_v28, %s4739_s28 }
  0x7b   : > { %675 = vrot.lane.b32.xlu0 %v646_v28, %s4735_s20  ;;  %737 = vrot.lane.b32.xlu2 %v629_v30, %s6801_s25 }
  0x7c   : > { %707 = vrot.lane.b32.xlu1 %v622_v29, %s4737_s26 }
  0x83   : > { %771 = vrot.lane.b32.xlu0 %v638_v33, %s6799_s27  ;;  %833 = vrot.lane.b32.xlu2 %v622_v29, %s4740_s29 }
  0x84   : > { %803 = vrot.lane.b32.xlu1 %v647_v34, %s4739_s28 }
  0x86   : > { %v668_v47 = vpop.permute.xlu0 %667 }
  0x8b   : > { %677 = vrot.lane.b32.xlu0 %v647_v34, %s4735_s20  ;;  %739 = vrot.lane.b32.xlu2 %v630_v36, %s6801_s25 }
  0x8c   : > { %709 = vrot.lane.b32.xlu1 %v623_v35, %s4737_s26 }
  0x93   : > { %773 = vrot.lane.b32.xlu0 %v639_v39, %s6799_s27  ;;  %835 = vrot.lane.b32.xlu2 %v623_v35, %s4740_s29  ;;  %s6819_s27 = smov 16  }
  0x94   : > { %805 = vrot.lane.b32.xlu1 %v648_v40, %s4739_s28 }
  0x9b   : > { %679 = vrot.lane.b32.xlu0 %v648_v40, %s4735_s20  ;;  %741 = vrot.lane.b32.xlu2 %v631_v46, %s6801_s25 }
  0x9c   : > { %711 = vrot.lane.b32.xlu1 %v624_v45, %s4737_s26 }
  0xa2   : > { %v732_v51 = vpop.permute.xlu1 %731 }
  0xa3   : > { %775 = vrot.lane.b32.xlu0 %v640_v49, %s6819_s27  ;;  %v700_v52 = vpop.permute.xlu0 %699  ;;  %837 = vrot.lane.b32.xlu2 %v624_v45, %s4740_s29 }
  0xa4   : > { %807 = vrot.lane.b32.xlu1 %v649_v50, %s4739_s28  ;;  %v852_v53 = vsel %vm851_vm3, %v668_v47, %v700_v52 }
  0xa5   : > { %v796_v54 = vpop.permute.xlu2 %795  ;;  %v860_v55 = vsel %vm495_vm0, %v852_v53, %v700_v52 }
  0xa6   : > { %v869_v58 = vsel %vm868_vm4, %v860_v55, %v732_v51 }
  0xaa   : > { %v764_v59 = vpop.permute.xlu1 %763 }
  0xab   : > { %681 = vrot.lane.b32.xlu0 %v649_v50, %s4735_s20  ;;  %v878_v60 = vsel %vm877_vm5, %v869_v58, %v764_v59  ;;  %743 = vrot.lane.b32.xlu2 %v632_v57, %s6801_s25  ;;  %s6820_s20 = smov 112  }
  0xac   : > { %713 = vrot.lane.b32.xlu1 %v625_v56, %s4737_s26  ;;  %v887_v61 = vsel %vm886_vm6, %v878_v60, %v764_v59  ;;  %s6821_s26 = smov 64  }
  0xad   : > { %v896_v62 = vsel %vm895_vm7, %v887_v61, %v796_v54  ;;  %v828_v63 = vpop.permute.xlu2 %827 }
  0xae   : > { %v905_v1 = vsel %vm904_vm8, %v896_v62, %v828_v63 }
  0xaf   : > { %v914_v4 = vsel %vm913_vm9, %v905_v1, %v828_v63 }
  0xb0   : > { %4561 = vmatmul.msk.f32.vlgmr.msra.gmra.mxu0 %vm931_vm10, %v914_v4 }
  0xb3   : > { %777 = vrot.lane.b32.xlu0 %v641_v2, %s6819_s27  ;;  %839 = vrot.lane.b32.xlu2 %v625_v56, %s4740_s29 }
  0xb4   : > { %809 = vrot.lane.b32.xlu1 %v650_v3, %s4739_s28  ;;  %s4741_s28 = smov 120  }
  0xb5   : > { %v734_v5 = vpop.permute.xlu2 %733 }
  0xbb   : > { %745 = vrot.lane.b32.xlu2 %v633_v6, %s6801_s25 }
  0xbd   : > { %v670_v7 = vpop.permute.xlu0 %669  ;;  %v830_v10 = vpop.permute.xlu2 %829 }
  0xbe   : > { %v702_v8 = vpop.permute.xlu1 %701 }
  0xbf   : > { %v853_v9 = vsel %vm851_vm3, %v670_v7, %v702_v8 }
  0xc0   : > { %v861_v11 = vsel %vm495_vm0, %v853_v9, %v702_v8 }
  0xc1   : > { %v870_v13 = vsel %vm868_vm4, %v861_v11, %v734_v5 }
  0xc3   : > { %841 = vrot.lane.b32.xlu2 %v658_v12, %s4740_s29  ;;  %s6805_s29 = smov 32  }
  0xc5   : > { %v766_v14 = vpop.permute.xlu0 %765  ;;  %v736_v17 = vpop.permute.xlu2 %735 }
  0xc6   : > { %v798_v15 = vpop.permute.xlu1 %797  ;;  %v879_v16 = vsel %vm877_vm5, %v870_v13, %v766_v14 }
  0xc7   : > { %v888_v18 = vsel %vm886_vm6, %v879_v16, %v766_v14 }
  0xc8   : > { %v897_v19 = vsel %vm895_vm7, %v888_v18, %v798_v15 }
  0xc9   : > { %v906_v20 = vsel %vm904_vm8, %v897_v19, %v830_v10 }
  0xca   : > { %v915_v21 = vsel %vm913_vm9, %v906_v20, %v830_v10 }
  0xcb   : > { %4562 = vmatmul.msk.f32.gmra.mxu0 %vm931_vm10, %v915_v21 }
  0xcd   : > { %v672_v22 = vpop.permute.xlu0 %671  ;;  %v832_v25 = vpop.permute.xlu2 %831 }
  0xce   : > { %v704_v23 = vpop.permute.xlu1 %703 }
  0xcf   : > { %v854_v24 = vsel %vm851_vm3, %v672_v22, %v704_v23 }
  0xd0   : > { %v862_v26 = vsel %vm495_vm0, %v854_v24, %v704_v23 }
  0xd1   : > { %v871_v27 = vsel %vm868_vm4, %v862_v26, %v736_v17 }
  0xd5   : > { %v768_v28 = vpop.permute.xlu0 %767  ;;  %v738_v31 = vpop.permute.xlu2 %737 }
  0xd6   : > { %v800_v29 = vpop.permute.xlu1 %799  ;;  %v880_v30 = vsel %vm877_vm5, %v871_v27, %v768_v28 }
  0xd7   : > { %v889_v32 = vsel %vm886_vm6, %v880_v30, %v768_v28 }
  0xd8   : > { %v898_v33 = vsel %vm895_vm7, %v889_v32, %v800_v29 }
  0xd9   : > { %v907_v34 = vsel %vm904_vm8, %v898_v33, %v832_v25 }
  0xda   : > { %v916_v35 = vsel %vm913_vm9, %v907_v34, %v832_v25 }
  0xdb   : > { %4563 = vmatmul.msk.f32.gmra.mxu0 %vm931_vm10, %v916_v35 }
  0xdd   : > { %v674_v36 = vpop.permute.xlu0 %673  ;;  %v834_v39 = vpop.permute.xlu2 %833 }
  0xde   : > { %v706_v37 = vpop.permute.xlu1 %705 }
  0xdf   : > { %v855_v38 = vsel %vm851_vm3, %v674_v36, %v706_v37 }
  0xe0   : > { %v863_v40 = vsel %vm495_vm0, %v855_v38, %v706_v37 }
  0xe1   : > { %v872_v41 = vsel %vm868_vm4, %v863_v40, %v738_v31 }
  0xe5   : > { %v770_v42 = vpop.permute.xlu0 %769  ;;  %v740_v45 = vpop.permute.xlu2 %739 }
  0xe6   : > { %v802_v43 = vpop.permute.xlu1 %801  ;;  %v881_v44 = vsel %vm877_vm5, %v872_v41, %v770_v42 }
  0xe7   : > { %v890_v46 = vsel %vm886_vm6, %v881_v44, %v770_v42 }
  0xe8   : > { %v899_v47 = vsel %vm895_vm7, %v890_v46, %v802_v43  ;;  %v4721_v43 = vld [vmem:[%s6785_s2] ss:$0 sm:$0xff] }
  0xe9   : > { %v908_v48 = vsel %vm904_vm8, %v899_v47, %v834_v39 }
  0xea   : > { %v917_v49 = vsel %vm913_vm9, %v908_v48, %v834_v39 }
  0xeb   : > { %4564 = vmatmul.msk.f32.gmra.mxu0 %vm931_vm10, %v917_v49 }
  0xed   : > { %v676_v50 = vpop.permute.xlu0 %675  ;;  %v836_v53 = vpop.permute.xlu2 %835 }
  0xee   : > { %v708_v51 = vpop.permute.xlu1 %707 }
  0xef   : > { %v856_v52 = vsel %vm851_vm3, %v676_v50, %v708_v51 }
  0xf0   : > { %v864_v54 = vsel %vm495_vm0, %v856_v52, %v708_v51 }
  0xf1   : > { %v873_v55 = vsel %vm868_vm4, %v864_v54, %v740_v45 }
  0xf5   : > { %v772_v56 = vpop.permute.xlu0 %771  ;;  %v742_v59 = vpop.permute.xlu2 %741 }
  0xf6   : > { %v804_v57 = vpop.permute.xlu1 %803  ;;  %v882_v58 = vsel %vm877_vm5, %v873_v55, %v772_v56 }
  0xf7   : > { %v891_v60 = vsel %vm886_vm6, %v882_v58, %v772_v56 }
  0xf8   : > { %v900_v61 = vsel %vm895_vm7, %v891_v60, %v804_v57 }
  0xf9   : > { %v909_v62 = vsel %vm904_vm8, %v900_v61, %v836_v53 }
  0xfa   : > { %v918_v63 = vsel %vm913_vm9, %v909_v62, %v836_v53 }
  0xfb   : > { %4565 = vmatmul.msk.f32.gmra.mxu0 %vm931_vm10, %v918_v63 }
  0xfd   : > { %v678_v1 = vpop.permute.xlu0 %677  ;;  %v838_v4 = vpop.permute.xlu2 %837 }
  0xfe   : > { %v710_v2 = vpop.permute.xlu1 %709 }
  0xff   : > { %v857_v3 = vsel %vm851_vm3, %v678_v1, %v710_v2 }
 0x100   : > { %v865_v5 = vsel %vm495_vm0, %v857_v3, %v710_v2 }
 0x101   : > { %v874_v6 = vsel %vm868_vm4, %v865_v5, %v742_v59  ;;  %v1151_v5 = vld [vmem:[#allocation3 + $0x8] sm:$0xf] }
 0x102   : > { %1180 = vst [vmem:[#allocation1] ss:$2 sm:$0xff] %v1151_v5 }
 0x105   : > { %v774_v7 = vpop.permute.xlu0 %773  ;;  %v744_v12 = vpop.permute.xlu2 %743 }
 0x106   : > { %v806_v8 = vpop.permute.xlu1 %805  ;;  %v883_v9 = vsel %vm877_vm5, %v874_v6, %v774_v7 }
 0x107   : > { %v892_v10 = vsel %vm886_vm6, %v883_v9, %v774_v7 }
 0x108   : > { %v901_v11 = vsel %vm895_vm7, %v892_v10, %v806_v8 }
 0x109   : > { %v910_v13 = vsel %vm904_vm8, %v901_v11, %v838_v4 }
 0x10a   : > { %v919_v14 = vsel %vm913_vm9, %v910_v13, %v838_v4 }
 0x10b   : > { %4566 = vmatmul.msk.f32.gmra.mxu0 %vm931_vm10, %v919_v14 }
 0x10d   : > { %v680_v15 = vpop.permute.xlu0 %679  ;;  %v840_v19 = vpop.permute.xlu2 %839 }
 0x10e   : > { %v712_v16 = vpop.permute.xlu1 %711 }
 0x10f   : > { %v858_v17 = vsel %vm851_vm3, %v680_v15, %v712_v16 }
 0x110   : > { %v866_v18 = vsel %vm495_vm0, %v858_v17, %v712_v16 }
 0x111   : > { %v875_v20 = vsel %vm868_vm4, %v866_v18, %v744_v12 }
 0x115   : > { %v776_v21 = vpop.permute.xlu0 %775  ;;  %v746_v28 = vpop.permute.xlu2 %745 }
 0x116   : > { %v808_v22 = vpop.permute.xlu1 %807  ;;  %v884_v23 = vsel %vm877_vm5, %v875_v20, %v776_v21 }
 0x117   : > { %v893_v24 = vsel %vm886_vm6, %v884_v23, %v776_v21 }
 0x118   : > { %v902_v25 = vsel %vm895_vm7, %v893_v24, %v808_v22 }
 0x119   : > { %v911_v26 = vsel %vm904_vm8, %v902_v25, %v840_v19 }
 0x11a   : > { %v920_v27 = vsel %vm913_vm9, %v911_v26, %v840_v19 }
 0x11b   : > { %4567 = vmatmul.msk.f32.gmra.mxu0 %vm931_vm10, %v920_v27 }
 0x11d   : > { %v682_v29 = vpop.permute.xlu0 %681  ;;  %v842_v37 = vpop.permute.xlu2 %841 }
 0x11e   : > { %v714_v30 = vpop.permute.xlu1 %713 }
 0x11f   : > { %v859_v31 = vsel %vm851_vm3, %v682_v29, %v714_v30  ;;  %v1155_v29 = vld [vmem:[#allocation3 + $0x9] sm:$0xf] }
 0x120   : > { %v867_v32 = vsel %vm495_vm0, %v859_v31, %v714_v30 }
 0x121   : > { %v876_v33 = vsel %vm868_vm4, %v867_v32, %v746_v28  ;;  %vm1349_vm4 = vcmask 457728  }
 0x125   : > { %v778_v34 = vpop.permute.xlu0 %777 }
 0x126   : > { %v810_v35 = vpop.permute.xlu1 %809  ;;  %v885_v36 = vsel %vm877_vm5, %v876_v33, %v778_v34 }
 0x127   : > { %v894_v38 = vsel %vm886_vm6, %v885_v36, %v778_v34  ;;  %vm1352_vm6 = vcmask 523264  }
 0x128   : > { %v903_v39 = vsel %vm895_vm7, %v894_v38, %v810_v35 }
 0x129   : > { %v912_v40 = vsel %vm904_vm8, %v903_v39, %v842_v37  ;;  %vm1368_vm8 = vcmask 588800  }
 0x12a   : > { %v921_v41 = vsel %vm913_vm9, %v912_v40, %v842_v37 }
 0x12b   : > { %4568 = vmatmul.msk.f32.gmra.mxu0 %vm931_vm10, %v921_v41  ;;  %vm1462_vm10 = vcmask 654336  }
 0x12d   : > { %v977_v42 = vpop.f32.mrf.mxu0 }
 0x12e   : > { %v5129_v47 = vadd.f32 %v4721_v43, %v977_v42 }
 0x130   : > { %v1001_v49 = vmax.f32 %v5129_v47, 0.0 }
 0x132   : > { %v1017_v50 = vrot.slane %v1001_v49, 1 }
 0x148   : > { %v980_v44 = vpop.f32.mrf.mxu0 }
 0x149   : > { %v981_v45 = vadd.f32 %v4721_v43, %v980_v44 }
 0x14b   : > { %v1002_v46 = vmax.f32 %v981_v45, 0.0 }
 0x14d   : > { %v1018_v48 = vrot.slane %v1002_v46, 1 }
 0x14f   : > { %1027 = vrot.lane.b32.xlu0 %v1018_v48, %s6801_s25 }
 0x157   : > { %1025 = vrot.lane.b32.xlu0 %v1017_v50, %s6801_s25 }
 0x158   : > { %v983_v51 = vpop.f32.mrf.mxu0 }
 0x159   : > { %v5139_v55 = vadd.f32 %v4721_v43, %v983_v51 }
 0x15b   : > { %v1003_v57 = vmax.f32 %v5139_v55, 0.0 }
 0x15d   : > { %v1019_v58 = vrot.slane %v1003_v57, 1 }
 0x168   : > { %v986_v52 = vpop.f32.mrf.mxu0 }
 0x169   : > { %v5136_v53 = vadd.f32 %v4721_v43, %v986_v52 }
 0x16b   : > { %v1004_v54 = vmax.f32 %v5136_v53, 0.0 }
 0x16d   : > { %v1020_v56 = vrot.slane %v1004_v54, 1 }
 0x16f   : > { %1031 = vrot.lane.b32.xlu1 %v1020_v56, %s6801_s25 }
 0x177   : > { %1029 = vrot.lane.b32.xlu1 %v1019_v58, %s6801_s25 }
 0x178   : > { %v989_v59 = vpop.f32.mrf.mxu0 }
 0x179   : > { %v5151_v63 = vadd.f32 %v4721_v43, %v989_v59 }
 0x17b   : > { %v1005_v2 = vmax.f32 %v5151_v63, 0.0 }
 0x17d   : > { %v1021_v3 = vrot.slane %v1005_v2, 1 }
 0x188   : > { %v992_v60 = vpop.f32.mrf.mxu0 }
 0x189   : > { %v5148_v61 = vadd.f32 %v4721_v43, %v992_v60 }
 0x18b   : > { %v1006_v62 = vmax.f32 %v5148_v61, 0.0 }
 0x18d   : > { %v1022_v1 = vrot.slane %v1006_v62, 1 }
 0x18f   : > { %1035 = vrot.lane.b32.xlu2 %v1022_v1, %s6801_s25 }
 0x197   : > { %1033 = vrot.lane.b32.xlu2 %v1021_v3, %s6801_s25 }
 0x198   : > { %v995_v4 = vpop.f32.mrf.mxu0 }
 0x199   : > { %v5172_v6 = vadd.f32 %v4721_v43, %v995_v4 }
 0x19b   : > { %v1007_v7 = vmax.f32 %v5172_v6, 0.0 }
 0x19d   : > { %v1023_v8 = vrot.slane %v1007_v7, 1 }
 0x19f   : > { %1037 = vrot.lane.b32.xlu0 %v1023_v8, %s6801_s25 }
 0x1a8   : > { %v998_v9 = vpop.f32.mrf.mxu0 }
 0x1a9   : > { %v5196_v10 = vadd.f32 %v4721_v43, %v998_v9 }
 0x1ab   : > { %v1008_v11 = vmax.f32 %v5196_v10, 0.0 }
 0x1ad   : > { %v1024_v12 = vrot.slane %v1008_v11, 1 }
 0x1af   : > { %1039 = vrot.lane.b32.xlu1 %v1024_v12, %s6801_s25 }
 0x1c1   : > { %v1028_v13 = vpop.permute.xlu0 %1027 }
 0x1c2   : > { %v1050_v14 = vsel %vm495_vm0, %v1002_v46, %v1028_v13 }
 0x1c3   : > { %v1066_v15 = vrot.slane %v1050_v14, 1  ;;  %v1082_v16 = vrot.slane %v1050_v14, 2  ;;  %v1098_v0 = vrot.slane %v1050_v14, 3 }
 0x1c5   : > { %v1115_v17 = vsel %vm1113_vm12, %v1050_v14, %v1066_v15 }
 0x1c6   : > { %v1124_v18 = vsel %vm1122_vm13, %v1115_v17, %v1082_v16 }
 0x1c7   : > { %v1133_v19 = vsel %vm1131_vm14, %v1124_v18, %v1098_v0 }
 0x1c8   : > { %1143 = vst.msk [vmem:[#allocation3 + $0x19] sm:$0xf] %vm1141_vm15, %v1133_v19 }
 0x1c9   : > { %v1026_v20 = vpop.permute.xlu0 %1025 }
 0x1ca   : > { %v1049_v21 = vsel %vm495_vm0, %v1001_v49, %v1026_v20 }
 0x1cb   : > { %v1065_v22 = vrot.slane %v1049_v21, 1  ;;  %v1081_v23 = vrot.slane %v1049_v21, 2  ;;  %v1097_v24 = vrot.slane %v1049_v21, 3 }
 0x1cd   : > { %v1114_v25 = vsel %vm1113_vm12, %v1049_v21, %v1065_v22 }
 0x1ce   : > { %v1123_v26 = vsel %vm1122_vm13, %v1114_v25, %v1081_v23 }
 0x1cf   : > { %v1152_v27 = vld [vmem:[#allocation3 + $0x18] sm:$0xf]  ;;  %v1132_v28 = vsel %vm1131_vm14, %v1123_v26, %v1097_v24 }
 0x1d0   : > { %1182 = vst [vmem:[#allocation1 + $0x1] ss:$2 sm:$0xff] %v1152_v27  ;;  %v1156_v31 = vld [vmem:[#allocation3 + $0x19] sm:$0xf] }
 0x1d1   : > { %1142 = vst.msk [vmem:[#allocation3 + $0x11] sm:$0xf] %vm1141_vm15, %v1132_v28  ;;  %v1168_v24 = vld [vmem:[#allocation3 + $0x18] sm:$0xf] }
 0x1d7   : > { %v1187_v30 = vld.sshfl [vmem:[#allocation1] sm:$0xff pattern:$0x75316420] }
 0x1d8   : > { %1199 = vst [vmem:[#allocation1] ss:$2 sm:$0xff] %v1155_v29  ;;  %1189 = vrot.lane.b32.xlu2 %v1187_v30, %s4741_s28  ;;  %v1159_v42 = vld [vmem:[#allocation3 + $0x10] sm:$0xf] }
 0x1d9   : > { %1201 = vst [vmem:[#allocation1 + $0x1] ss:$2 sm:$0xff] %v1156_v31  ;;  %v1163_v15 = vld [vmem:[#allocation3 + $0x11] sm:$0xf] }
 0x1e0   : > { %v1206_v32 = vld.sshfl [vmem:[#allocation1] sm:$0xff pattern:$0x75316420] }
 0x1e1   : > { %1216 = vst [vmem:[#allocation1 + $0x1] ss:$2 sm:$0xff] %v1156_v31  ;;  %1208 = vrot.lane.b32.xlu0 %v1206_v32, %s6801_s25  ;;  %v1032_v33 = vpop.permute.xlu1 %1031 }
 0x1e2   : > { %1214 = vst [vmem:[#allocation1] ss:$2 sm:$0xff] %v1155_v29  ;;  %v1052_v34 = vsel %vm495_vm0, %v1004_v54, %v1032_v33 }
 0x1e3   : > { %v1068_v35 = vrot.slane %v1052_v34, 1  ;;  %v1084_v36 = vrot.slane %v1052_v34, 2  ;;  %v1100_v37 = vrot.slane %v1052_v34, 3 }
 0x1e5   : > { %v1117_v38 = vsel %vm1113_vm12, %v1052_v34, %v1068_v35 }
 0x1e6   : > { %v1126_v39 = vsel %vm1122_vm13, %v1117_v38, %v1084_v36 }
 0x1e7   : > { %v1135_v40 = vsel %vm1131_vm14, %v1126_v39, %v1100_v37 }
 0x1e8   : > { %1145 = vst.msk [vmem:[#allocation3 + $0x29] sm:$0xf] %vm1141_vm15, %v1135_v40 }
 0x1e9   : > { %v1221_v41 = vld.sshfl [vmem:[#allocation1] sm:$0xff pattern:$0x75316420]  ;;  %v1036_v43 = vpop.permute.xlu2 %1035  ;;  %v1030_v44 = vpop.permute.xlu1 %1029 }
 0x1ea   : > { %1233 = vst [vmem:[#allocation1] ss:$2 sm:$0xff] %v1159_v42  ;;  %1223 = vrot.lane.b32.xlu1 %v1221_v41, %s6801_s25  ;;  %v1054_v45 = vsel %vm495_vm0, %v1006_v62, %v1036_v43  ;;  %v1051_v46 = vsel %vm495_vm0, %v1003_v57, %v1030_v44 }
 0x1eb   : > { %v1070_v47 = vrot.slane %v1054_v45, 1  ;;  %v1086_v48 = vrot.slane %v1054_v45, 2  ;;  %v1067_v49 = vrot.slane %v1051_v46, 1  ;;  %v1083_v50 = vrot.slane %v1051_v46, 2 }
 0x1ec   : > { %v1102_v51 = vrot.slane %v1054_v45, 3  ;;  %v1099_v53 = vrot.slane %v1051_v46, 3 }
 0x1ed   : > { %v1119_v52 = vsel %vm1113_vm12, %v1054_v45, %v1070_v47  ;;  %v1116_v54 = vsel %vm1113_vm12, %v1051_v46, %v1067_v49 }
 0x1ee   : > { %v1128_v56 = vsel %vm1122_vm13, %v1119_v52, %v1086_v48  ;;  %v1125_v58 = vsel %vm1122_vm13, %v1116_v54, %v1083_v50  ;;  %v1362_v54 = vld [vmem:[%s6786_s3 + $0x38] sm:$0xff] }
 0x1ef   : > { %v1153_v59 = vld [vmem:[#allocation3 + $0x28] sm:$0xf]  ;;  %v1137_v60 = vsel %vm1131_vm14, %v1128_v56, %v1102_v51  ;;  %v1134_v55 = vsel %vm1131_vm14, %v1125_v58, %v1099_v53  ;;  %v1363_v53 = vld [vmem:[%s6786_s3 + $0x40] sm:$0xff]  ;;  %v1360_v58 = vld [vmem:[%s6786_s3 + $0x28] sm:$0xff] }
 0x1f0   : > { %1184 = vst [vmem:[#allocation1 + $0x10] ss:$2 sm:$0xff] %v1153_v59  ;;  %v1157_v13 = vld [vmem:[#allocation3 + $0x29] sm:$0xf]  ;;  %1382 = vmatpush.msra.mxu1 %v1363_v53  ;;  %v1359_v59 = vld [vmem:[%s6786_s3 + $0x20] sm:$0xff] }
 0x1f1   : > { %1147 = vst.msk [vmem:[#allocation3 + $0x39] sm:$0xf] %vm1141_vm15, %v1137_v60  ;;  %v1034_v57 = vpop.permute.xlu2 %1033  ;;  %v1169_v26 = vld [vmem:[#allocation3 + $0x28] sm:$0xf]  ;;  %v1358_v60 = vld [vmem:[%s6786_s3 + $0x18] sm:$0xff] }
 0x1f2   : > { %1144 = vst.msk [vmem:[#allocation3 + $0x21] sm:$0xf] %vm1141_vm15, %v1134_v55  ;;  %v1053_v61 = vsel %vm495_vm0, %v1005_v2, %v1034_v57  ;;  %v1173_v31 = vld [vmem:[#allocation3 + $0x29] sm:$0xf]  ;;  %1383 = vmatpush.msra.mxu1 %v1362_v54  ;;  %v1356_v57 = vld [vmem:[%s6786_s3 + $0x8] sm:$0xff] }
 0x1f3   : > { %v1069_v62 = vrot.slane %v1053_v61, 1  ;;  %v1085_v1 = vrot.slane %v1053_v61, 2  ;;  %v1101_v4 = vrot.slane %v1053_v61, 3  ;;  %v1361_v56 = vld [vmem:[%s6786_s3 + $0x30] sm:$0xff] }
 0x1f4   : > { %1384 = vmatpush.msra.mxu1 %v1361_v56  ;;  %v1357_v55 = vld [vmem:[%s6786_s3 + $0x10] sm:$0xff] }
 0x1f5   : > { %v1118_v3 = vsel %vm1113_vm12, %v1053_v61, %v1069_v62  ;;  %v1355_v61 = vld [vmem:[%s6786_s3] sm:$0xff] }
 0x1f6   : > { %v1127_v5 = vsel %vm1122_vm13, %v1118_v3, %v1085_v1  ;;  %1385 = vmatpush.msra.mxu1 %v1360_v58 }
 0x1f7   : > { %v1136_v9 = vsel %vm1131_vm14, %v1127_v5, %v1101_v4 }
 0x1f8   : > { %v1154_v8 = vld [vmem:[#allocation3 + $0x38] sm:$0xf]  ;;  %1146 = vst.msk [vmem:[#allocation3 + $0x31] sm:$0xf] %vm1141_vm15, %v1136_v9  ;;  %1386 = vmatpush.msra.mxu1 %v1359_v59 }
 0x1f9   : > { %1186 = vst [vmem:[#allocation1 + $0x11] ss:$2 sm:$0xff] %v1154_v8  ;;  %v1160_v12 = vld [vmem:[#allocation3 + $0x20] sm:$0xf]  ;;  %v1158_v14 = vld [vmem:[#allocation3 + $0x39] sm:$0xf] }
 0x1fa   : > { %1235 = vst [vmem:[#allocation1 + $0x1] ss:$2 sm:$0xff] %v1160_v12  ;;  %v1164_v16 = vld [vmem:[#allocation3 + $0x21] sm:$0xf]  ;;  %v1170_v45 = vld [vmem:[#allocation3 + $0x38] sm:$0xf]  ;;  %1387 = vmatpush.msra.mxu1 %v1358_v60 }
 0x1fb   : > { %v1174_v48 = vld [vmem:[#allocation3 + $0x39] sm:$0xf] }
 0x1fc   : > { %1388 = vmatpush.msra.mxu1 %v1357_v55 }
 0x1fe   : > { %1389 = vmatpush.msra.mxu1 %v1356_v57  ;;  %v1490_v57 = vld [vmem:[%s6788_s5 + $0x78] sm:$0xff] }
 0x1ff   : > { %v1161_v20 = vld [vmem:[#allocation3 + $0x30] sm:$0xf]  ;;  %1508 = vmatpush.msra.mxu2 %v1490_v57 }
 0x200   : > { %v1188_v63 = vld.sshfl [vmem:[#allocation1 + $0x10] sm:$0xff pattern:$0x75316420]  ;;  %v1165_v42 = vld [vmem:[#allocation3 + $0x31] sm:$0xf]  ;;  %1390 = vmatpush.msra.mxu1 %v1355_v61 }
 0x201   : > { %1203 = vst [vmem:[#allocation1 + $0x10] ss:$2 sm:$0xff] %v1157_v13  ;;  %v1240_v2 = vld.sshfl [vmem:[#allocation1] sm:$0xff pattern:$0x75316420]  ;;  %v1506_v61 = vld [vmem:[%s6788_s5 + $0xf8] sm:$0xff] }
 0x202   : > { %1205 = vst [vmem:[#allocation1 + $0x11] ss:$2 sm:$0xff] %v1158_v14  ;;  %1242 = vrot.lane.b32.xlu2 %v1240_v2, %s6819_s27  ;;  %1528 = vmatpush.msra.mxu3 %v1506_v61 }
 0x203   : > { %1252 = vst [vmem:[#allocation1] ss:$2 sm:$0xff] %v1163_v15 }
 0x204   : > { %1254 = vst [vmem:[#allocation1 + $0x1] ss:$2 sm:$0xff] %v1164_v16 }
 0x209   : > { %v1207_v0 = vld.sshfl [vmem:[#allocation1 + $0x10] sm:$0xff pattern:$0x75316420] }
 0x20a   : > { %1218 = vst [vmem:[#allocation1 + $0x10] ss:$2 sm:$0xff] %v1157_v13  ;;  %1191 = vrot.lane.b32.xlu2 %v1188_v63, %s4741_s28 }
 0x20b   : > { %1220 = vst [vmem:[#allocation1 + $0x11] ss:$2 sm:$0xff] %v1158_v14  ;;  %v1259_v17 = vld.sshfl [vmem:[#allocation1] sm:$0xff pattern:$0x75316420] }
 0x20c   : > { %1267 = vst [vmem:[#allocation1] ss:$2 sm:$0xff] %v1163_v15  ;;  %1261 = vrot.lane.b32.xlu0 %v1259_v17, %s6805_s29 }
 0x20d   : > { %1269 = vst [vmem:[#allocation1 + $0x1] ss:$2 sm:$0xff] %v1164_v16 }
 0x211   : > { %v1038_v18 = vpop.permute.xlu0 %1037 }
 0x212   : > { %v1222_v19 = vld.sshfl [vmem:[#allocation1 + $0x10] sm:$0xff pattern:$0x75316420]  ;;  %v1055_v21 = vsel %vm495_vm0, %v1007_v7, %v1038_v18  ;;  %v1172_v7 = vld [vmem:[#allocation3 + $0x19] sm:$0xf] }
 0x213   : > { %1237 = vst [vmem:[#allocation1 + $0x10] ss:$2 sm:$0xff] %v1161_v20  ;;  %v1071_v22 = vrot.slane %v1055_v21, 1  ;;  %v1087_v23 = vrot.slane %v1055_v21, 2  ;;  %v1103_v27 = vrot.slane %v1055_v21, 3 }
 0x214   : > { %v1274_v25 = vld.sshfl [vmem:[#allocation1] sm:$0xff pattern:$0x75316420]  ;;  %1210 = vrot.lane.b32.xlu0 %v1207_v0, %s6801_s25 }
 0x215   : > { %1286 = vst [vmem:[#allocation1] ss:$2 sm:$0xff] %v1168_v24  ;;  %1276 = vrot.lane.b32.xlu1 %v1274_v25, %s6805_s29  ;;  %v1120_v28 = vsel %vm1113_vm12, %v1055_v21, %v1071_v22 }
 0x216   : > { %1288 = vst [vmem:[#allocation1 + $0x1] ss:$2 sm:$0xff] %v1169_v26  ;;  %v1129_v29 = vsel %vm1122_vm13, %v1120_v28, %v1087_v23 }
 0x217   : > { %v1138_v6 = vsel %vm1131_vm14, %v1129_v29, %v1103_v27 }
 0x218   : > { %1148 = vst.msk [vmem:[#allocation3 + $0x41] sm:$0xf] %vm1141_vm15, %v1138_v6 }
 0x21d   : > { %v1293_v30 = vld.sshfl [vmem:[#allocation1] sm:$0xff pattern:$0x75316420]  ;;  %1225 = vrot.lane.b32.xlu1 %v1222_v19, %s6801_s25 }
 0x21e   : > { %1305 = vst [vmem:[#allocation1] ss:$2 sm:$0xff] %v1172_v7  ;;  %1295 = vrot.lane.b32.xlu2 %v1293_v30, %s4743_s17 }
 0x21f   : > { %1307 = vst [vmem:[#allocation1 + $0x1] ss:$2 sm:$0xff] %v1173_v31  ;;  %v1162_v32 = vld [vmem:[#allocation3 + $0x40] sm:$0xf] }
 0x220   : > { %1239 = vst [vmem:[#allocation1 + $0x11] ss:$2 sm:$0xff] %v1162_v32  ;;  %v1166_v10 = vld [vmem:[#allocation3 + $0x41] sm:$0xf] }
 0x221   : > { %v1040_v33 = vpop.permute.xlu1 %1039 }
 0x222   : > { %v1056_v34 = vsel %vm495_vm0, %v1008_v11, %v1040_v33 }
 0x223   : > { %v1072_v35 = vrot.slane %v1056_v34, 1  ;;  %v1088_v36 = vrot.slane %v1056_v34, 2  ;;  %v1104_v39 = vrot.slane %v1056_v34, 3 }
 0x225   : > { %v1121_v37 = vsel %vm1113_vm12, %v1056_v34, %v1072_v35  ;;  %v4722_v34 = vld [vmem:[%s6787_s4] ss:$0 sm:$0xff] }
 0x226   : > { %v1312_v38 = vld.sshfl [vmem:[#allocation1] sm:$0xff pattern:$0x75316420]  ;;  %v1130_v40 = vsel %vm1122_vm13, %v1121_v37, %v1088_v36 }
 0x227   : > { %1320 = vst [vmem:[#allocation1] ss:$2 sm:$0xff] %v1172_v7  ;;  %v1241_v41 = vld.sshfl [vmem:[#allocation1 + $0x10] sm:$0xff pattern:$0x75316420]  ;;  %1314 = vrot.lane.b32.xlu0 %v1312_v38, %s4744_s21  ;;  %v1139_v43 = vsel %vm1131_vm14, %v1130_v40, %v1104_v39 }
 0x228   : > { %1322 = vst [vmem:[#allocation1 + $0x1] ss:$2 sm:$0xff] %v1173_v31  ;;  %1244 = vrot.lane.b32.xlu2 %v1241_v41, %s6819_s27 }
 0x229   : > { %1256 = vst [vmem:[#allocation1 + $0x10] ss:$2 sm:$0xff] %v1165_v42 }
 0x22a   : > { %1258 = vst [vmem:[#allocation1 + $0x11] ss:$2 sm:$0xff] %v1166_v10 }
 0x22b   : > { %1149 = vst.msk [vmem:[#allocation3 + $0x49] sm:$0xf] %vm1141_vm15, %v1139_v43 }
 0x22f   : > { %v1327_v11 = vld.sshfl [vmem:[#allocation1] sm:$0xff pattern:$0x75316420] }
 0x230   : > { %1329 = vrot.lane.b32.xlu1 %v1327_v11, %s4744_s21 }
 0x231   : > { %v1260_v44 = vld.sshfl [vmem:[#allocation1 + $0x10] sm:$0xff pattern:$0x75316420] }
 0x232   : > { %1271 = vst [vmem:[#allocation1 + $0x10] ss:$2 sm:$0xff] %v1165_v42  ;;  %1263 = vrot.lane.b32.xlu0 %v1260_v44, %s6805_s29  ;;  %v1171_v47 = vld [vmem:[#allocation3 + $0x48] sm:$0xf]  ;;  %v1190_v1 = vpop.permute.xlu2 %1189 }
 0x233   : > { %1273 = vst [vmem:[#allocation1 + $0x11] ss:$2 sm:$0xff] %v1166_v10  ;;  %v1175_v50 = vld [vmem:[#allocation3 + $0x49] sm:$0xf] }
 0x23a   : > { %v1275_v46 = vld.sshfl [vmem:[#allocation1 + $0x10] sm:$0xff pattern:$0x75316420] }
 0x23b   : > { %1290 = vst [vmem:[#allocation1 + $0x10] ss:$2 sm:$0xff] %v1170_v45  ;;  %1278 = vrot.lane.b32.xlu1 %v1275_v46, %s6805_s29 }
 0x23c   : > { %1292 = vst [vmem:[#allocation1 + $0x11] ss:$2 sm:$0xff] %v1171_v47 }
 0x243   : > { %v1294_v49 = vld.sshfl [vmem:[#allocation1 + $0x10] sm:$0xff pattern:$0x75316420] }
 0x244   : > { %1309 = vst [vmem:[#allocation1 + $0x10] ss:$2 sm:$0xff] %v1174_v48  ;;  %1297 = vrot.lane.b32.xlu2 %v1294_v49, %s4743_s17 }
 0x245   : > { %1311 = vst [vmem:[#allocation1 + $0x11] ss:$2 sm:$0xff] %v1175_v50 }
 0x24c   : > { %v1313_v51 = vld.sshfl [vmem:[#allocation1 + $0x10] sm:$0xff pattern:$0x75316420] }
 0x24d   : > { %1324 = vst [vmem:[#allocation1 + $0x10] ss:$2 sm:$0xff] %v1174_v48  ;;  %1316 = vrot.lane.b32.xlu0 %v1313_v51, %s4744_s21 }
 0x24e   : > { %1326 = vst [vmem:[#allocation1 + $0x11] ss:$2 sm:$0xff] %v1175_v50 }
 0x253   : > { %v1209_v62 = vpop.permute.xlu0 %1208 }
 0x254   : > { %v1335_v12 = vsel %vm495_vm0, %v1190_v1, %v1209_v62  ;;  %v1489_v62 = vld [vmem:[%s6788_s5 + $0x70] sm:$0xff] }
 0x255   : > { %v1328_v52 = vld.sshfl [vmem:[#allocation1 + $0x10] sm:$0xff pattern:$0x75316420]  ;;  %1509 = vmatpush.msra.mxu2 %v1489_v62 }
 0x256   : > { %1331 = vrot.lane.b32.xlu1 %v1328_v52, %s4744_s21  ;;  %v1505_v1 = vld [vmem:[%s6788_s5 + $0xf0] sm:$0xff] }
 0x257   : > { %1529 = vmatpush.msra.mxu3 %v1505_v1 }
 0x25c   : > { %v1224_v3 = vpop.permute.xlu1 %1223  ;;  %v1243_v5 = vpop.permute.xlu2 %1242 }
 0x25d   : > { %v1337_v14 = vsel %vm877_vm5, %v1335_v12, %v1224_v3  ;;  %v1488_v3 = vld [vmem:[%s6788_s5 + $0x68] sm:$0xff]  ;;  %v1502_v12 = vld [vmem:[%s6788_s5 + $0xd8] sm:$0xff] }
 0x25e   : > { %v1339_v2 = vsel %vm895_vm7, %v1337_v14, %v1243_v5  ;;  %v1487_v5 = vld [vmem:[%s6788_s5 + $0x60] sm:$0xff]  ;;  %1510 = vmatpush.msra.mxu2 %v1488_v3  ;;  %v1501_v14 = vld [vmem:[%s6788_s5 + $0xd0] sm:$0xff] }
 0x260   : > { %1511 = vmatpush.msra.mxu2 %v1487_v5 }
 0x264   : > { %v1192_v13 = vpop.permute.xlu2 %1191 }
 0x278   : > { %v1296_v17 = vpop.permute.xlu2 %1295 }
 0x27e   : > { %v1262_v4 = vpop.permute.xlu0 %1261 }
 0x27f   : > { %v1341_v15 = vsel %vm913_vm9, %v1339_v2, %v1262_v4  ;;  %v1504_v4 = vld [vmem:[%s6788_s5 + $0xe8] sm:$0xff] }
 0x280   : > { %1530 = vmatpush.msra.mxu3 %v1504_v4  ;;  %v1500_v2 = vld [vmem:[%s6788_s5 + $0xc8] sm:$0xff] }
 0x282   : > { %v1245_v24 = vpop.permute.xlu2 %1244 }
 0x286   : > { %v1211_v9 = vpop.permute.xlu0 %1210 }
 0x287   : > { %v1277_v8 = vpop.permute.xlu1 %1276  ;;  %v1336_v23 = vsel %vm495_vm0, %v1192_v13, %v1211_v9  ;;  %v1486_v9 = vld [vmem:[%s6788_s5 + $0x58] sm:$0xff]  ;;  %v1485_v13 = vld [vmem:[%s6788_s5 + $0x50] sm:$0xff] }
 0x288   : > { %v1344_v16 = vsel %vm1343_vm1, %v1341_v15, %v1277_v8  ;;  %v1503_v8 = vld [vmem:[%s6788_s5 + $0xe0] sm:$0xff]  ;;  %1512 = vmatpush.msra.mxu2 %v1486_v9 }
 0x289   : > { %v1347_v18 = vsel %vm1346_vm2, %v1344_v16, %v1296_v17  ;;  %1531 = vmatpush.msra.mxu3 %v1503_v8  ;;  %v1483_v15 = vld [vmem:[%s6788_s5 + $0x40] sm:$0xff]  ;;  %v1498_v17 = vld [vmem:[%s6788_s5 + $0xb8] sm:$0xff] }
 0x28a   : > { %1513 = vmatpush.msra.mxu2 %v1485_v13  ;;  %v1499_v16 = vld [vmem:[%s6788_s5 + $0xc0] sm:$0xff] }
 0x28b   : > { %1532 = vmatpush.msra.mxu3 %v1502_v12 }
 0x28d   : > { %1533 = vmatpush.msra.mxu3 %v1501_v14 }
 0x28f   : > { %v1226_v63 = vpop.permute.xlu1 %1225  ;;  %1534 = vmatpush.msra.mxu3 %v1500_v2  ;;  %v1553_v2 = vld [vmem:[%s6790_s7 + $0x20] sm:$0xff] }
 0x290   : > { %v1338_v25 = vsel %vm877_vm5, %v1336_v23, %v1226_v63  ;;  %v1484_v63 = vld [vmem:[%s6788_s5 + $0x48] sm:$0xff]  ;;  %v1495_v23 = vld [vmem:[%s6788_s5 + $0xa0] sm:$0xff] }
 0x291   : > { %v1340_v27 = vsel %vm895_vm7, %v1338_v25, %v1245_v24  ;;  %1514 = vmatpush.msra.mxu2 %v1484_v63  ;;  %1535 = vmatpush.msra.mxu3 %v1499_v16  ;;  %v1478_v24 = vld [vmem:[%s6788_s5 + $0x18] sm:$0xff]  ;;  %v1551_v16 = vld [vmem:[%s6790_s7 + $0x10] sm:$0xff] }
 0x292   : > { %v1494_v25 = vld [vmem:[%s6788_s5 + $0x98] sm:$0xff] }
 0x293   : > { %1515 = vmatpush.msra.mxu2 %v1483_v15  ;;  %1536 = vmatpush.msra.mxu3 %v1498_v17  ;;  %v1556_v63 = vld [vmem:[%s6790_s7 + $0x38] sm:$0xff]  ;;  %v1554_v15 = vld [vmem:[%s6790_s7 + $0x28] sm:$0xff]  ;;  %v1549_v17 = vld [vmem:[%s6790_s7] sm:$0xff] }
 0x299   : > { %v1315_v0 = vpop.permute.xlu0 %1314 }
 0x29a   : > { %v1350_v19 = vsel %vm1349_vm4, %v1347_v18, %v1315_v0  ;;  %v1482_v0 = vld [vmem:[%s6788_s5 + $0x38] sm:$0xff]  ;;  %v1481_v18 = vld [vmem:[%s6788_s5 + $0x30] sm:$0xff] }
 0x29b   : > { %1516 = vmatpush.msra.mxu2 %v1482_v0  ;;  %v1552_v0 = vld [vmem:[%s6790_s7 + $0x18] sm:$0xff] }
 0x29d   : > { %1517 = vmatpush.msra.mxu2 %v1481_v18  ;;  %v1550_v18 = vld [vmem:[%s6790_s7 + $0x8] sm:$0xff] }
 0x29e   : > { %v1298_v7 = vpop.permute.xlu2 %1297 }
 0x2a2   : > { %v1330_v20 = vpop.permute.xlu1 %1329 }
 0x2a3   : > { %v1353_v21 = vsel %vm1352_vm6, %v1350_v19, %v1330_v20  ;;  %v1497_v19 = vld [vmem:[%s6788_s5 + $0xb0] sm:$0xff]  ;;  %v1480_v20 = vld [vmem:[%s6788_s5 + $0x28] sm:$0xff] }
 0x2a4   : > { %4569 = vmatmul.msk.f32.vlgmr.msra.gmra.mxu1 %vm1368_vm8, %v1353_v21  ;;  %v1264_v22 = vpop.permute.xlu0 %1263  ;;  %1537 = vmatpush.msra.mxu3 %v1497_v19  ;;  %v1496_v21 = vld [vmem:[%s6788_s5 + $0xa8] sm:$0xff]  ;;  %v1646_v19 = vld [vmem:[%s6792_s9 + $0xf0] sm:$0xff] }
 0x2a5   : > { %v1342_v28 = vsel %vm913_vm9, %v1340_v27, %v1264_v22  ;;  %v1479_v22 = vld [vmem:[%s6788_s5 + $0x20] sm:$0xff]  ;;  %1518 = vmatpush.msra.mxu2 %v1480_v20  ;;  %v1493_v27 = vld [vmem:[%s6788_s5 + $0x90] sm:$0xff]  ;;  %v1647_v20 = vld [vmem:[%s6792_s9 + $0xf8] sm:$0xff] }
 0x2a6   : > { %1538 = vmatpush.msra.mxu3 %v1496_v21  ;;  %v1644_v21 = vld [vmem:[%s6792_s9 + $0xe0] sm:$0xff]  ;;  %1726 = vmatpush.msrb.mxu0 %v1647_v20  ;;  %v1653_v20 = vld [vmem:[%s6792_s9 + $0x128] sm:$0xff] }
 0x2a7   : > { %1519 = vmatpush.msra.mxu2 %v1479_v22  ;;  %v1645_v22 = vld [vmem:[%s6792_s9 + $0xe8] sm:$0xff] }
 0x2a8   : > { %1539 = vmatpush.msra.mxu3 %v1495_v23  ;;  %v1642_v23 = vld [vmem:[%s6792_s9 + $0xd0] sm:$0xff]  ;;  %1727 = vmatpush.msrb.mxu0 %v1645_v22  ;;  %v1651_v22 = vld [vmem:[%s6792_s9 + $0x118] sm:$0xff] }
 0x2a9   : > { %1520 = vmatpush.msra.mxu2 %v1478_v24  ;;  %v1643_v24 = vld [vmem:[%s6792_s9 + $0xd8] sm:$0xff] }
 0x2aa   : > { %1540 = vmatpush.msra.mxu3 %v1494_v25  ;;  %v1678_v25 = vld [vmem:[%s6792_s9 + $0x1f0] sm:$0xff]  ;;  %1728 = vmatpush.msrb.mxu0 %v1643_v24  ;;  %v1649_v24 = vld [vmem:[%s6792_s9 + $0x108] sm:$0xff] }
 0x2ac   : > { %1541 = vmatpush.msra.mxu3 %v1493_v27  ;;  %v1676_v27 = vld [vmem:[%s6792_s9 + $0x1e0] sm:$0xff] }
 0x2ad   : > { %v1279_v26 = vpop.permute.xlu1 %1278 }
 0x2ae   : > { %v1345_v29 = vsel %vm1343_vm1, %v1342_v28, %v1279_v26  ;;  %v1477_v26 = vld [vmem:[%s6788_s5 + $0x10] sm:$0xff]  ;;  %v1476_v28 = vld [vmem:[%s6788_s5 + $0x8] sm:$0xff]  ;;  %vm1466_vm1 = vcmask 916480  }
 0x2af   : > { %v1348_v30 = vsel %vm1346_vm2, %v1345_v29, %v1298_v7  ;;  %v1492_v29 = vld [vmem:[%s6788_s5 + $0x88] sm:$0xff]  ;;  %1521 = vmatpush.msra.mxu2 %v1477_v26  ;;  %v1491_v7 = vld [vmem:[%s6788_s5 + $0x80] sm:$0xff]  ;;  %v1679_v26 = vld [vmem:[%s6792_s9 + $0x1f8] sm:$0xff] }
 0x2b0   : > { %1542 = vmatpush.msra.mxu3 %v1492_v29  ;;  %v1641_v29 = vld [vmem:[%s6792_s9 + $0xc8] sm:$0xff] }
 0x2b1   : > { %1522 = vmatpush.msra.mxu2 %v1476_v28  ;;  %v1640_v28 = vld [vmem:[%s6792_s9 + $0xc0] sm:$0xff]  ;;  %1729 = vmatpush.msrb.mxu0 %v1641_v29 }
 0x2b2   : > { %1543 = vmatpush.msra.mxu3 %v1491_v7  ;;  %v1674_v7 = vld [vmem:[%s6792_s9 + $0x1d0] sm:$0xff] }
 0x2b4   : > { %1686 = vmatpush.msrb.mxu3 %v1646_v19  ;;  %v1652_v19 = vld [vmem:[%s6792_s9 + $0x120] sm:$0xff] }
 0x2b6   : > { %1687 = vmatpush.msrb.mxu3 %v1644_v21  ;;  %v1650_v21 = vld [vmem:[%s6792_s9 + $0x110] sm:$0xff] }
 0x2b8   : > { %1688 = vmatpush.msrb.mxu3 %v1642_v23  ;;  %v1648_v23 = vld [vmem:[%s6792_s9 + $0x100] sm:$0xff] }
 0x2ba   : > { %1689 = vmatpush.msrb.mxu3 %v1640_v28 }
 0x2bf   : > { %v1317_v6 = vpop.permute.xlu0 %1316 }
 0x2c0   : > { %v1351_v31 = vsel %vm1349_vm4, %v1348_v30, %v1317_v6  ;;  %v1475_v6 = vld [vmem:[%s6788_s5] sm:$0xff]  ;;  %v1563_v30 = vld [vmem:[%s6790_s7 + $0x70] sm:$0xff] }
 0x2c1   : > { %1582 = vmatpush.msrb.mxu1 %v1563_v30  ;;  %1523 = vmatpush.msra.mxu2 %v1475_v6  ;;  %v1677_v6 = vld [vmem:[%s6792_s9 + $0x1e8] sm:$0xff]  ;;  %v1675_v30 = vld [vmem:[%s6792_s9 + $0x1d8] sm:$0xff] }
 0x2c8   : > { %v1332_v32 = vpop.permute.xlu1 %1331 }
 0x2c9   : > { %v1354_v33 = vsel %vm1352_vm6, %v1351_v31, %v1332_v32  ;;  %v1564_v31 = vld [vmem:[%s6790_s7 + $0x78] sm:$0xff]  ;;  %v1561_v32 = vld [vmem:[%s6790_s7 + $0x60] sm:$0xff] }
 0x2ca   : > { %4570 = vmatmul.msk.f32.gmra.mxu1 %vm1368_vm8, %v1354_v33  ;;  %v1562_v33 = vld [vmem:[%s6790_s7 + $0x68] sm:$0xff]  ;;  %1602 = vmatpush.msrb.mxu2 %v1564_v31  ;;  %v1638_v31 = vld [vmem:[%s6792_s9 + $0xb0] sm:$0xff] }
 0x2cb   : > { %1583 = vmatpush.msrb.mxu1 %v1561_v32  ;;  %v1639_v32 = vld [vmem:[%s6792_s9 + $0xb8] sm:$0xff]  ;;  %1690 = vmatpush.msrb.mxu3 %v1638_v31 }
 0x2cc   : > { %1603 = vmatpush.msrb.mxu2 %v1562_v33  ;;  %v1672_v33 = vld [vmem:[%s6792_s9 + $0x1c0] sm:$0xff]  ;;  %1730 = vmatpush.msrb.mxu0 %v1639_v32 }
 0x2cd   : > { %v1680_v32 = vld [vmem:[%s6793_s10] sm:$0x3] }
 0x321   : > { %v1392_v35 = vpop.f32.mrf.mxu1 }
 0x322   : > { %v1393_v36 = vadd.f32 %v4722_v34, %v1392_v35  ;;  %v1560_v35 = vld [vmem:[%s6790_s7 + $0x58] sm:$0xff] }
 0x323   : > { %1604 = vmatpush.msrb.mxu2 %v1560_v35  ;;  %v1636_v35 = vld [vmem:[%s6792_s9 + $0xa0] sm:$0xff] }
 0x324   : > { %v5322_v37 = vmax.f32 %v1393_v36, 0.0  ;;  %v1557_v36 = vld [vmem:[%s6790_s7 + $0x40] sm:$0xff]  ;;  %1691 = vmatpush.msrb.mxu3 %v1636_v35  ;;  %v1683_v35 = vperm.slane %v1680_v32, 1 }
 0x326   : > { %v1409_v41 = vrot.slane %v5322_v37, 3  ;;  %v1405_v42 = vrot.slane %v5322_v37, 2  ;;  %v1401_v11 = vrot.slane %v5322_v37, 1  ;;  %v1421_v51 = vrot.slane %v5322_v37, 6 }
 0x327   : > { %v1417_v52 = vrot.slane %v5322_v37, 5  ;;  %v1413_v53 = vrot.slane %v5322_v37, 4  ;;  %v1425_v60 = vrot.slane %v5322_v37, 7 }
 0x347   : > { %v1395_v38 = vpop.f32.mrf.mxu1 }
 0x348   : > { %v1396_v39 = vadd.f32 %v4722_v34, %v1395_v38  ;;  %v1559_v34 = vld [vmem:[%s6790_s7 + $0x50] sm:$0xff] }
 0x349   : > { %1584 = vmatpush.msrb.mxu1 %v1559_v34  ;;  %v1673_v34 = vld [vmem:[%s6792_s9 + $0x1c8] sm:$0xff] }
 0x34a   : > { %v5324_v40 = vmax.f32 %v1396_v39, 0.0  ;;  %v1558_v39 = vld [vmem:[%s6790_s7 + $0x48] sm:$0xff] }
 0x34b   : > { %1585 = vmatpush.msrb.mxu1 %v1557_v36  ;;  %1605 = vmatpush.msrb.mxu2 %v1558_v39  ;;  %v1637_v36 = vld [vmem:[%s6792_s9 + $0xa8] sm:$0xff]  ;;  %v1671_v39 = vld [vmem:[%s6792_s9 + $0x1b8] sm:$0xff] }
 0x34c   : > { %v1438_v43 = vrot.slane %v5324_v40, 3  ;;  %v1434_v10 = vrot.slane %v5324_v40, 2  ;;  %v1430_v44 = vrot.slane %v5324_v40, 1  ;;  %v1450_v48 = vrot.slane %v5324_v40, 6  ;;  %1731 = vmatpush.msrb.mxu0 %v1637_v36 }
 0x34d   : > { %v1446_v49 = vrot.slane %v5324_v40, 5  ;;  %v1442_v50 = vrot.slane %v5324_v40, 4  ;;  %v1454_v59 = vrot.slane %v5324_v40, 7  ;;  %1606 = vmatpush.msrb.mxu2 %v1556_v63  ;;  %v1656_v63 = vld [vmem:[%s6792_s9 + $0x140] sm:$0xff] }
 0x34e   : > { %v4696_v45 = vpack.i.bf16 %v1438_v43, %v1409_v41  ;;  %v4691_v46 = vpack.i.bf16 %v1434_v10, %v1405_v42  ;;  %v4686_v47 = vpack.i.bf16 %v1430_v44, %v1401_v11  ;;  %v4711_v54 = vpack.i.bf16 %v1450_v48, %v1421_v51  ;;  %v1555_v41 = vld [vmem:[%s6790_s7 + $0x30] sm:$0xff] }
 0x34f   : > { %v4706_v56 = vpack.i.bf16 %v1446_v49, %v1417_v52  ;;  %v4701_v58 = vpack.i.bf16 %v1442_v50, %v1413_v53  ;;  %v4716_v55 = vpack.i.bf16 %v1454_v59, %v1425_v60  ;;  %1586 = vmatpush.msrb.mxu1 %v1555_v41  ;;  %1607 = vmatpush.msrb.mxu2 %v1554_v15  ;;  %v1634_v41 = vld [vmem:[%s6792_s9 + $0x90] sm:$0xff]  ;;  %v1657_v15 = vld [vmem:[%s6792_s9 + $0x148] sm:$0xff] }
 0x350   : > { %4697 = vrot.lane.b32.xlu1 %v4696_v45, %s6803_s22  ;;  %4692 = vrot.lane.b32.xlu0 %v4691_v46, %s6805_s29  ;;  %s6824_s22 = smov 8  }
 0x351   : > { %4687 = vrot.lane.b32.xlu2 %v4686_v47, %s6819_s27  ;;  %1587 = vmatpush.msrb.mxu1 %v1553_v2  ;;  %v1619_v2 = vld [vmem:[%s6792_s9 + $0x18] sm:$0xff] }
 0x352   : > { %1608 = vmatpush.msrb.mxu2 %v1552_v0  ;;  %1692 = vmatpush.msrb.mxu3 %v1634_v41  ;;  %v1654_v0 = vld [vmem:[%s6792_s9 + $0x130] sm:$0xff] }
 0x353   : > { %1588 = vmatpush.msrb.mxu1 %v1551_v16  ;;  %v1616_v16 = vld [vmem:[%s6792_s9] sm:$0xff] }
 0x354   : > { %1609 = vmatpush.msrb.mxu2 %v1550_v18  ;;  %v1655_v18 = vld [vmem:[%s6792_s9 + $0x138] sm:$0xff] }
 0x355   : > { %1589 = vmatpush.msrb.mxu1 %v1549_v17  ;;  %v1617_v17 = vld [vmem:[%s6792_s9 + $0x8] sm:$0xff] }
 0x357   : > { %1706 = vmatpush.msra.mxu1 %v1678_v25  ;;  %v1565_v25 = vld [vmem:[%s6791_s8] sm:$0x3] }
 0x358   : > { %4712 = vrot.lane.b32.xlu1 %v4711_v54, %s4746_s23  ;;  %4707 = vrot.lane.b32.xlu0 %v4706_v56, %s4747_s24 }
 0x359   : > { %4702 = vrot.lane.b32.xlu2 %v4701_v58, %s6807_s30  ;;  %1707 = vmatpush.msra.mxu1 %v1676_v27 }
 0x35b   : > { %1708 = vmatpush.msra.mxu1 %v1674_v7 }
 0x35d   : > { %1709 = vmatpush.msra.mxu1 %v1672_v33  ;;  %v1682_v33 = vperm.slane %v1680_v32, 0 }
 0x361   : > { %4717 = vrot.lane.b32.xlu2 %v4716_v55, %s6809_s16 }
 0x3ab   : > { %v4688_v38 = vpop.permute.xlu2 %4687 }
 0x3ac   : > { %v4690_v43 = vunpack.i.h.bf16 %v4688_v38  ;;  %v4689_v10 = vunpack.i.l.bf16 %v4688_v38  ;;  %v1670_v38 = vld [vmem:[%s6792_s9 + $0x1b0] sm:$0xff] }
 0x3ad   : > { %1710 = vmatpush.msra.mxu1 %v1670_v38 }
 0x3ae   : > { %v1468_v47 = vsel %vm877_vm5, %v5324_v40, %v4690_v43  ;;  %v1458_v48 = vsel %vm877_vm5, %v5322_v37, %v4689_v10  ;;  %v1668_v43 = vld [vmem:[%s6792_s9 + $0x1a0] sm:$0xff]  ;;  %v1669_v10 = vld [vmem:[%s6792_s9 + $0x1a8] sm:$0xff] }
 0x3af   : > { %1711 = vmatpush.msra.mxu1 %v1668_v43 }
 0x3b3   : > { %v4703_v42 = vpop.permute.xlu2 %4702 }
 0x3b4   : > { %v4705_v58 = vunpack.i.h.bf16 %v4703_v42  ;;  %v4704_v59 = vunpack.i.l.bf16 %v4703_v42  ;;  %v1635_v42 = vld [vmem:[%s6792_s9 + $0x98] sm:$0xff] }
 0x3b5   : > { %1732 = vmatpush.msrb.mxu0 %v1635_v42 }
 0x3bb   : > { %v4718_v53 = vpop.permute.xlu2 %4717 }
 0x3bc   : > { %v4720_v3 = vunpack.i.h.bf16 %v4718_v53  ;;  %v4719_v4 = vunpack.i.l.bf16 %v4718_v53  ;;  %v1662_v53 = vld [vmem:[%s6792_s9 + $0x170] sm:$0xff] }
 0x3c2   : > { %v4698_v11 = vpop.permute.xlu1 %4697  ;;  %v4693_v44 = vpop.permute.xlu0 %4692 }
 0x3c3   : > { %v4695_v45 = vunpack.i.h.bf16 %v4693_v44  ;;  %v4694_v46 = vunpack.i.l.bf16 %v4693_v44  ;;  %v4700_v49 = vunpack.i.h.bf16 %v4698_v11  ;;  %v4699_v50 = vunpack.i.l.bf16 %v4698_v11  ;;  %v1632_v11 = vld [vmem:[%s6792_s9 + $0x80] sm:$0xff]  ;;  %v1633_v44 = vld [vmem:[%s6792_s9 + $0x88] sm:$0xff] }
 0x3c4   : > { %1693 = vmatpush.msrb.mxu3 %v1632_v11  ;;  %1733 = vmatpush.msrb.mxu0 %v1633_v44 }
 0x3c5   : > { %v1459_v51 = vsel %vm913_vm9, %v1458_v48, %v4694_v46  ;;  %v1469_v52 = vsel %vm913_vm9, %v1468_v47, %v4695_v45  ;;  %v1666_v45 = vld [vmem:[%s6792_s9 + $0x190] sm:$0xff]  ;;  %v1667_v46 = vld [vmem:[%s6792_s9 + $0x198] sm:$0xff] }
 0x3c6   : > { %v1460_v54 = vsel %vm1346_vm2, %v1459_v51, %v4699_v50  ;;  %v1470_v56 = vsel %vm1346_vm2, %v1469_v52, %v4700_v49  ;;  %v1630_v47 = vld [vmem:[%s6792_s9 + $0x70] sm:$0xff]  ;;  %v1631_v48 = vld [vmem:[%s6792_s9 + $0x78] sm:$0xff]  ;;  %v1664_v49 = vld [vmem:[%s6792_s9 + $0x180] sm:$0xff]  ;;  %1712 = vmatpush.msra.mxu1 %v1666_v45 }
 0x3c7   : > { %v1461_v62 = vsel %vm1352_vm6, %v1460_v54, %v4704_v59  ;;  %v1471_v1 = vsel %vm1352_vm6, %v1470_v56, %v4705_v58  ;;  %v1665_v50 = vld [vmem:[%s6792_s9 + $0x188] sm:$0xff]  ;;  %v1628_v51 = vld [vmem:[%s6792_s9 + $0x60] sm:$0xff]  ;;  %1694 = vmatpush.msrb.mxu3 %v1630_v47  ;;  %1734 = vmatpush.msrb.mxu0 %v1631_v48  ;;  %v1663_v54 = vld [vmem:[%s6792_s9 + $0x178] sm:$0xff] }
 0x3c8   : > { %v1629_v52 = vld [vmem:[%s6792_s9 + $0x68] sm:$0xff]  ;;  %v1626_v56 = vld [vmem:[%s6792_s9 + $0x50] sm:$0xff]  ;;  %1713 = vmatpush.msra.mxu1 %v1664_v49  ;;  %v1627_v58 = vld [vmem:[%s6792_s9 + $0x58] sm:$0xff] }
 0x3c9   : > { %1695 = vmatpush.msrb.mxu3 %v1628_v51  ;;  %1735 = vmatpush.msrb.mxu0 %v1629_v52  ;;  %v1660_v59 = vld [vmem:[%s6792_s9 + $0x160] sm:$0xff] }
 0x3ca   : > { %v4713_v60 = vpop.permute.xlu1 %4712  ;;  %v4708_v55 = vpop.permute.xlu0 %4707  ;;  %1714 = vmatpush.msra.mxu1 %v1662_v53 }
 0x3cb   : > { %v4715_v40 = vunpack.i.h.bf16 %v4713_v60  ;;  %v4714_v57 = vunpack.i.l.bf16 %v4713_v60  ;;  %v4710_v37 = vunpack.i.h.bf16 %v4708_v55  ;;  %v4709_v61 = vunpack.i.l.bf16 %v4708_v55  ;;  %v1661_v60 = vld [vmem:[%s6792_s9 + $0x168] sm:$0xff]  ;;  %v1624_v55 = vld [vmem:[%s6792_s9 + $0x40] sm:$0xff]  ;;  %1696 = vmatpush.msrb.mxu3 %v1626_v56  ;;  %1736 = vmatpush.msrb.mxu0 %v1627_v58 }
 0x3cc   : > { %1715 = vmatpush.msra.mxu1 %v1660_v59 }
 0x3cd   : > { %v1463_v5 = vsel %vm1462_vm10, %v1461_v62, %v4709_v61  ;;  %v1472_v8 = vsel %vm1462_vm10, %v1471_v1, %v4710_v37  ;;  %v1623_v37 = vld [vmem:[%s6792_s9 + $0x38] sm:$0xff]  ;;  %v1507_v61 = vld [vmem:[%s6789_s6] sm:$0x1]  ;;  %1697 = vmatpush.msrb.mxu3 %v1624_v55 }
 0x3ce   : > { %v1465_v9 = vsel %vm1464_vm11, %v1463_v5, %v4714_v57  ;;  %v1473_v12 = vsel %vm1464_vm11, %v1472_v8, %v4715_v40  ;;  %v1625_v40 = vld [vmem:[%s6792_s9 + $0x48] sm:$0xff]  ;;  %v1622_v57 = vld [vmem:[%s6792_s9 + $0x30] sm:$0xff]  ;;  %v1620_v8 = vld [vmem:[%s6792_s9 + $0x20] sm:$0xff] }
 0x3cf   : > { %v1467_v13 = vsel %vm1466_vm1, %v1465_v9, %v4719_v4  ;;  %v1474_v14 = vsel %vm1466_vm1, %v1473_v12, %v4720_v3  ;;  %1737 = vmatpush.msrb.mxu0 %v1625_v40  ;;  %1698 = vmatpush.msrb.mxu3 %v1622_v57  ;;  %v1658_v9 = vld [vmem:[%s6792_s9 + $0x150] sm:$0xff]  ;;  %v1621_v12 = vld [vmem:[%s6792_s9 + $0x28] sm:$0xff] }
 0x3d0   : > { %1524 = vmatmul.f32.vlgmr.msra.gmra.mxu2 %v1467_v13  ;;  %1544 = vmatmul.f32.vlgmr.msra.gmra.mxu3 %v1474_v14  ;;  %v1659_v13 = vld [vmem:[%s6792_s9 + $0x158] sm:$0xff]  ;;  %v1618_v14 = vld [vmem:[%s6792_s9 + $0x10] sm:$0xff] }
 0x3d1   : > { %1746 = vmatpush.msra.mxu2 %v1679_v26  ;;  %1738 = vmatpush.msrb.mxu0 %v1623_v37  ;;  %v1567_v26 = vperm.slane %v1565_v25, 0 }
 0x3d2   : > { %1699 = vmatpush.msrb.mxu3 %v1620_v8  ;;  %1716 = vmatpush.msra.mxu1 %v1658_v9  ;;  %v1821_v9 = vld [vmem:[#allocation4 + $0x1] sm:$0xf] }
 0x3d3   : > { %1747 = vmatpush.msra.mxu2 %v1677_v6  ;;  %1739 = vmatpush.msrb.mxu0 %v1621_v12  ;;  %v1568_v6 = vperm.slane %v1565_v25, 1 }
 0x3d4   : > { %1700 = vmatpush.msrb.mxu3 %v1618_v14  ;;  %1717 = vmatpush.msra.mxu1 %v1656_v63  ;;  %v1825_v14 = vld [vmem:[#allocation4] sm:$0xf] }
 0x3d5   : > { %1748 = vmatpush.msra.mxu2 %v1675_v30  ;;  %1740 = vmatpush.msrb.mxu0 %v1619_v2 }
 0x3d6   : > { %1701 = vmatpush.msrb.mxu3 %v1616_v16  ;;  %1718 = vmatpush.msra.mxu1 %v1654_v0 }
 0x3d7   : > { %1749 = vmatpush.msra.mxu2 %v1673_v34  ;;  %1741 = vmatpush.msrb.mxu0 %v1617_v17 }
 0x3d8   : > { %1719 = vmatpush.msra.mxu1 %v1652_v19 }
 0x3d9   : > { %1750 = vmatpush.msra.mxu2 %v1671_v39 }
 0x3da   : > { %1720 = vmatpush.msra.mxu1 %v1650_v21 }
 0x3db   : > { %1751 = vmatpush.msra.mxu2 %v1669_v10 }
 0x3dc   : > { %1721 = vmatpush.msra.mxu1 %v1648_v23 }
 0x3dd   : > { %1752 = vmatpush.msra.mxu2 %v1667_v46 }
 0x3df   : > { %1753 = vmatpush.msra.mxu2 %v1665_v50 }
 0x3e1   : > { %1754 = vmatpush.msra.mxu2 %v1663_v54 }
 0x3e3   : > { %1755 = vmatpush.msra.mxu2 %v1661_v60 }
 0x3e5   : > { %1756 = vmatpush.msra.mxu2 %v1659_v13 }
 0x3e7   : > { %1757 = vmatpush.msra.mxu2 %v1657_v15 }
 0x3e9   : > { %1758 = vmatpush.msra.mxu2 %v1655_v18  ;;  %v1954_v18 = vld [vmem:[#allocation4 + $0x2] sm:$0xf] }
 0x3eb   : > { %1759 = vmatpush.msra.mxu2 %v1653_v20 }
 0x3ed   : > { %1760 = vmatpush.msra.mxu2 %v1651_v22 }
 0x3ef   : > { %1761 = vmatpush.msra.mxu2 %v1649_v24 }
 0x453   : > { %v1525_v62 = vpop.f32.mrf.mxu2  ;;  %v1545_v3 = vpop.f32.mrf.mxu3 }
 0x454   : > { %v1526_v1 = vadd.f32 %v1525_v62, %v1507_v61 }
 0x456   : > { %v1546_v4 = vadd.f32 %v1545_v3, %v1526_v1 }
 0x458   : > { %v1548_v5 = vmax.f32 %v1546_v4, 0.0 }
 0x45a   : > { %4571 = vmatmul.msk.f32.vlgmr.msrb.gmra.mxu1 %vm1352_vm6, %v1548_v5  ;;  %4572 = vmatmul.msk.f32.vlgmr.msrb.gmra.mxu2 %vm1352_vm6, %v1548_v5 }
 0x4d7   : > { %v1591_v27 = vpop.f32.mrf.mxu1 }
 0x4d8   : > { %v1592_v28 = vadd.f32 %v1591_v27, %v1567_v26 }
 0x4da   : > { %v1614_v29 = vmax.f32 %v1592_v28, 0.0 }
 0x4dc   : > { %1702 = vmatmul.f32.vlgmr.msrb.gmra.mxu3 %v1614_v29  ;;  %1742 = vmatmul.f32.vlgmr.msrb.gmra.mxu0 %v1614_v29 }
 0x4dd   : > { %v1611_v7 = vpop.f32.mrf.mxu2 }
 0x4de   : > { %v1612_v30 = vadd.f32 %v1611_v7, %v1568_v6 }
 0x4e0   : > { %v1615_v31 = vmax.f32 %v1612_v30, 0.0 }
 0x4e2   : > { %1722 = vmatmul.f32.vlgmr.msra.gmra.mxu1 %v1615_v31  ;;  %1762 = vmatmul.f32.vlgmr.msra.gmra.mxu2 %v1615_v31 }
 0x559   : > { %v1743_v38 = vpop.f32.mrf.mxu0 }
 0x55a   : > { %v1744_v42 = vadd.f32 %v1743_v38, %v1683_v35  ;;  %v1912_v35 = vld [vmem:[%s6794_s11 + $0x28] sm:$0xff] }
 0x55f   : > { %v1703_v34 = vpop.f32.mrf.mxu3  ;;  %v1723_v39 = vpop.f32.mrf.mxu1 }
 0x560   : > { %v1704_v36 = vadd.f32 %v1703_v34, %v1682_v33  ;;  %v1914_v33 = vld [vmem:[%s6794_s11 + $0x38] sm:$0xff]  ;;  %v1913_v34 = vld [vmem:[%s6794_s11 + $0x30] sm:$0xff] }
 0x561   : > { %1933 = vmatpush.msra.mxu3 %v1914_v33  ;;  %v4596_v33 = vld [vmem:[%s6794_s11 + $0xc8] sm:$0xff] }
 0x562   : > { %v1724_v41 = vadd.f32 %v1723_v39, %v1704_v36  ;;  %v1911_v39 = vld [vmem:[%s6794_s11 + $0x20] sm:$0xff] }
 0x563   : > { %1934 = vmatpush.msra.mxu3 %v1913_v34  ;;  %v4589_v34 = vld [vmem:[%s6794_s11 + $0xa0] sm:$0xff] }
 0x564   : > { %v1766_v43 = vmax.f32 %v1724_v41, 0.0  ;;  %v1910_v41 = vld [vmem:[%s6794_s11 + $0x18] sm:$0xff] }
 0x565   : > { %v1763_v10 = vpop.f32.mrf.mxu2  ;;  %1935 = vmatpush.msra.mxu3 %v1912_v35  ;;  %v4595_v35 = vld [vmem:[%s6794_s11 + $0xc0] sm:$0xff] }
 0x566   : > { %v1764_v11 = vadd.f32 %v1763_v10, %v1744_v42  ;;  %v1777_v44 = vrot.slane %v1766_v43, 5  ;;  %v1773_v45 = vrot.slane %v1766_v43, 6  ;;  %v1769_v46 = vrot.slane %v1766_v43, 7  ;;  %v1909_v42 = vld [vmem:[%s6794_s11 + $0x10] sm:$0xff] }
 0x567   : > { %1936 = vmatpush.msra.mxu3 %v1911_v39  ;;  %v2190_v39 = vld [vmem:[#allocation4 + $0x2a] sm:$0xf] }
 0x568   : > { %1778 = vrot.lane.b32.xlu2 %v1777_v44, %s4747_s24  ;;  %1774 = vrot.lane.b32.xlu1 %v1773_v45, %s4746_s23  ;;  %v1767_v47 = vmax.f32 %v1764_v11, 0.0  ;;  %v1907_v44 = vld [vmem:[%s6794_s11] sm:$0xff] }
 0x569   : > { %1770 = vrot.lane.b32.xlu0 %v1769_v46, %s6820_s20  ;;  %1937 = vmatpush.msra.mxu3 %v1910_v41  ;;  %v4587_v41 = vld [vmem:[%s6794_s11 + $0x90] sm:$0xff] }
 0x56a   : > { %v1789_v48 = vrot.slane %v1767_v47, 6  ;;  %v1785_v49 = vrot.slane %v1767_v47, 7  ;;  %v1793_v58 = vrot.slane %v1767_v47, 5 }
 0x56b   : > { %1938 = vmatpush.msra.mxu3 %v1909_v42 }
 0x570   : > { %1790 = vrot.lane.b32.xlu2 %v1789_v48, %s4746_s23  ;;  %1786 = vrot.lane.b32.xlu1 %v1785_v49, %s6820_s20  ;;  %s6822_s23 = smov 32  }
 0x5c2   : > { %v1779_v53 = vpop.permute.xlu2 %1778 }
 0x5ca   : > { %v1791_v57 = vpop.permute.xlu2 %1790 }
 0x5da   : > { %v1775_v50 = vpop.permute.xlu1 %1774 }
 0x5db   : > { %v1771_v51 = vpop.permute.xlu0 %1770 }
 0x5dc   : > { %v1781_v52 = vsel %vm1113_vm12, %v1766_v43, %v1771_v51  ;;  %v1908_v43 = vld [vmem:[%s6794_s11 + $0x8] sm:$0xff] }
 0x5dd   : > { %v1782_v54 = vsel %vm1122_vm13, %v1781_v52, %v1775_v50  ;;  %1939 = vmatpush.msra.mxu3 %v1908_v43 }
 0x5de   : > { %v1783_v56 = vsel %vm1131_vm14, %v1782_v54, %v1779_v53 }
 0x5df   : > { %1801 = vrot.lane.b32.xlu0 %v1783_v56, %s6821_s26  ;;  %1809 = vst.msk [vmem:[#allocation4 + $0x9] sm:$0xf] %vm1141_vm15, %v1783_v56  ;;  %1940 = vmatpush.msra.mxu3 %v1907_v44  ;;  %v4585_v44 = vld [vmem:[%s6794_s11 + $0x80] sm:$0xff] }
 0x5e2   : > { %v1787_v55 = vpop.permute.xlu1 %1786 }
 0x5e3   : > { %v1797_v40 = vsel %vm1113_vm12, %v1767_v47, %v1787_v55 }
 0x5e4   : > { %v1798_v62 = vsel %vm1122_vm13, %v1797_v40, %v1791_v57 }
 0x5e6   : > { %v5714_v59 = vld [vmem:[#allocation4 + $0x9] sm:$0xf] }
 0x5e7   : > { %1833 = vst [vmem:[#allocation1] ss:$2 sm:$0xff] %v5714_v59  ;;  %1794 = vrot.lane.b32.xlu0 %v1793_v58, %s4747_s24  ;;  %v1817_v3 = vld [vmem:[#allocation4 + $0x8] sm:$0xf]  ;;  %s6823_s24 = smov 48  }
 0x5e8   : > { %v1822_v13 = vld [vmem:[#allocation4 + $0x9] sm:$0xf] }
 0x5e9   : > { %v1826_v2 = vld [vmem:[#allocation4 + $0x8] sm:$0xf] }
 0x5ea   : > { %v1950_v15 = vld [vmem:[#allocation4 + $0xa] sm:$0xf] }
 0x5eb   : > { %v1955_v20 = vld [vmem:[#allocation4 + $0xa] sm:$0xf] }
 0x651   : > { %v1802_v60 = vpop.permute.xlu0 %1801 }
 0x652   : > { %1810 = vst.msk [vmem:[#allocation4 + $0x11] sm:$0xf] %vm1141_vm15, %v1802_v60 }
 0x659   : > { %v5720_v37 = vld [vmem:[#allocation4 + $0x11] sm:$0xf]  ;;  %v1795_v61 = vpop.permute.xlu0 %1794 }
 0x65a   : > { %1835 = vst [vmem:[#allocation1 + $0x1] ss:$2 sm:$0xff] %v5720_v37  ;;  %v1799_v1 = vsel %vm1131_vm14, %v1798_v62, %v1795_v61  ;;  %v1818_v5 = vld [vmem:[#allocation4 + $0x10] sm:$0xf] }
 0x65b   : > { %1805 = vrot.lane.b32.xlu1 %v1799_v1, %s6821_s26  ;;  %1811 = vst.msk [vmem:[#allocation4 + $0x19] sm:$0xf] %vm1141_vm15, %v1799_v1  ;;  %v1951_v0 = vld [vmem:[#allocation4 + $0x12] sm:$0xf] }
 0x65c   : > { %v2069_v23 = vld [vmem:[#allocation4 + $0x11] sm:$0xf] }
 0x65d   : > { %v2073_v25 = vld [vmem:[#allocation4 + $0x10] sm:$0xf] }
 0x65e   : > { %v2187_v6 = vld [vmem:[#allocation4 + $0x12] sm:$0xf] }
 0x65f   : > { %v1823_v48 = vld [vmem:[#allocation4 + $0x11] sm:$0xf] }
 0x660   : > { %v1956_v62 = vld [vmem:[#allocation4 + $0x12] sm:$0xf] }
 0x661   : > { %v5727_v4 = vld.sshfl [vmem:[#allocation1] sm:$0xff pattern:$0x75316420] }
 0x662   : > { %1848 = vst [vmem:[#allocation1] ss:$2 sm:$0xff] %v1817_v3  ;;  %v5729_v8 = vld [vmem:[#allocation4 + $0x19] sm:$0xf] }
 0x663   : > { %1850 = vst [vmem:[#allocation1 + $0x1] ss:$2 sm:$0xff] %v1818_v5  ;;  %v2070_v24 = vld [vmem:[#allocation4 + $0x19] sm:$0xf] }
 0x664   : > { %1837 = vst [vmem:[#allocation1 + $0x10] ss:$2 sm:$0xff] %v5729_v8  ;;  %v2074_v27 = vld [vmem:[#allocation4 + $0x18] sm:$0xf] }
 0x665   : > { %v2188_v30 = vld [vmem:[#allocation4 + $0x1a] sm:$0xf] }
 0x666   : > { %v5781_v45 = vld [vmem:[#allocation4 + $0x18] sm:$0xf] }
 0x667   : > { %v1824_v50 = vld [vmem:[#allocation4 + $0x19] sm:$0xf] }
 0x668   : > { %v1828_v55 = vld [vmem:[#allocation4 + $0x18] sm:$0xf] }
 0x669   : > { %v5799_v40 = vld [vmem:[#allocation4 + $0x1a] sm:$0xf] }
 0x66a   : > { %v1855_v12 = vld.sshfl [vmem:[#allocation1] sm:$0xff pattern:$0x75316420] }
 0x66b   : > { %1867 = vst [vmem:[#allocation1] ss:$2 sm:$0xff] %v1821_v9  ;;  %1857 = vrot.lane.b32.xlu2 %v1855_v12, %s6819_s27 }
 0x66c   : > { %1869 = vst [vmem:[#allocation1 + $0x1] ss:$2 sm:$0xff] %v1822_v13 }
 0x673   : > { %v1874_v63 = vld.sshfl [vmem:[#allocation1] sm:$0xff pattern:$0x75316420] }
 0x674   : > { %1886 = vst [vmem:[#allocation1] ss:$2 sm:$0xff] %v1825_v14  ;;  %1876 = vrot.lane.b32.xlu0 %v1874_v63, %s6822_s23 }
 0x675   : > { %1888 = vst [vmem:[#allocation1 + $0x1] ss:$2 sm:$0xff] %v1826_v2  ;;  %v4582_v2 = vld [vmem:[%s6794_s11 + $0x78] sm:$0xff] }
 0x676   : > { %2051 = vmatpush.msrb.mxu1 %v4582_v2 }
 0x67c   : > { %v1893_v16 = vld.sshfl [vmem:[#allocation1] sm:$0xff pattern:$0x75316420] }
 0x67d   : > { %1962 = vst [vmem:[#allocation1] ss:$2 sm:$0xff] %v1950_v15  ;;  %1895 = vrot.lane.b32.xlu1 %v1893_v16, %s6823_s24  ;;  %v4580_v16 = vld [vmem:[%s6794_s11 + $0x68] sm:$0xff] }
 0x67e   : > { %1964 = vst [vmem:[#allocation1 + $0x1] ss:$2 sm:$0xff] %v1951_v0 }
 0x685   : > { %v5735_v17 = vld.sshfl [vmem:[#allocation1] sm:$0xff pattern:$0x75316420] }
 0x686   : > { %1973 = vst [vmem:[#allocation1] ss:$2 sm:$0xff] %v5714_v59 }
 0x687   : > { %1975 = vst [vmem:[#allocation1 + $0x1] ss:$2 sm:$0xff] %v5720_v37 }
 0x68e   : > { %v1980_v19 = vld.sshfl [vmem:[#allocation1] sm:$0xff pattern:$0x75316420] }
 0x68f   : > { %1992 = vst [vmem:[#allocation1] ss:$2 sm:$0xff] %v1954_v18  ;;  %1982 = vrot.lane.b32.xlu2 %v1980_v19, %s6819_s27  ;;  %v4578_v18 = vld [vmem:[%s6794_s11 + $0x58] sm:$0xff] }
 0x690   : > { %1994 = vst [vmem:[#allocation1 + $0x1] ss:$2 sm:$0xff] %v1955_v20  ;;  %v4602_v19 = vld [vmem:[%s6794_s11 + $0xf8] sm:$0xff] }
 0x691   : > { %2280 = vmatpush.msrb.mxu2 %v4602_v19  ;;  %4653 = vmatpush.msrb.mxu3 %v4602_v19 }
 0x697   : > { %v1999_v21 = vld.sshfl [vmem:[#allocation1] sm:$0xff pattern:$0x75316420] }
 0x698   : > { %2007 = vst [vmem:[#allocation1] ss:$2 sm:$0xff] %v1821_v9  ;;  %2001 = vrot.lane.b32.xlu1 %v1999_v21, %s6822_s23  ;;  %v4577_v21 = vld [vmem:[%s6794_s11 + $0x50] sm:$0xff] }
 0x699   : > { %2009 = vst [vmem:[#allocation1 + $0x1] ss:$2 sm:$0xff] %v1822_v13  ;;  %v2076_v13 = vld [vmem:[#allocation4 + $0x28] sm:$0xf] }
 0x6a0   : > { %v2014_v22 = vld.sshfl [vmem:[#allocation1] sm:$0xff pattern:$0x75316420] }
 0x6a1   : > { %2081 = vst [vmem:[#allocation1] ss:$2 sm:$0xff] %v2069_v23 }
 0x6a2   : > { %2083 = vst [vmem:[#allocation1 + $0x1] ss:$2 sm:$0xff] %v2070_v24 }
 0x6a9   : > { %v5741_v26 = vld.sshfl [vmem:[#allocation1] sm:$0xff pattern:$0x75316420] }
 0x6aa   : > { %2096 = vst [vmem:[#allocation1] ss:$2 sm:$0xff] %v2073_v25  ;;  %v4575_v25 = vld [vmem:[%s6794_s11 + $0x40] sm:$0xff] }
 0x6ab   : > { %2098 = vst [vmem:[#allocation1 + $0x1] ss:$2 sm:$0xff] %v2074_v27  ;;  %v4599_v27 = vld [vmem:[%s6794_s11 + $0xe0] sm:$0xff] }
 0x6b2   : > { %v2103_v28 = vld.sshfl [vmem:[#allocation1] sm:$0xff pattern:$0x75316420] }
 0x6b3   : > { %2111 = vst [vmem:[#allocation1] ss:$2 sm:$0xff] %v5714_v59 }
 0x6b4   : > { %2113 = vst [vmem:[#allocation1 + $0x1] ss:$2 sm:$0xff] %v5720_v37 }
 0x6bb   : > { %v2118_v29 = vld.sshfl [vmem:[#allocation1] sm:$0xff pattern:$0x75316420] }
 0x6bc   : > { %2126 = vst [vmem:[#allocation1] ss:$2 sm:$0xff] %v1817_v3  ;;  %v1957_v3 = vld [vmem:[#allocation4 + $0x1a] sm:$0xf] }
 0x6bd   : > { %2128 = vst [vmem:[#allocation1 + $0x1] ss:$2 sm:$0xff] %v1818_v5  ;;  %v5812_v5 = vld [vmem:[#allocation4 + $0x29] sm:$0xf] }
 0x6c4   : > { %v2133_v7 = vld.sshfl [vmem:[#allocation1] sm:$0xff pattern:$0x75316420] }
 0x6c5   : > { %2195 = vst [vmem:[#allocation1] ss:$2 sm:$0xff] %v2187_v6  ;;  %v1858_v51 = vpop.permute.xlu2 %1857 }
 0x6c6   : > { %2197 = vst [vmem:[#allocation1 + $0x1] ss:$2 sm:$0xff] %v2188_v30  ;;  %v1901_v53 = vsel %vm877_vm5, %v5727_v4, %v1858_v51  ;;  %v4597_v30 = vld [vmem:[%s6794_s11 + $0xd0] sm:$0xff] }
 0x6cd   : > { %v5745_v31 = vld.sshfl [vmem:[#allocation1] sm:$0xff pattern:$0x75316420]  ;;  %v1806_v32 = vpop.permute.xlu1 %1805 }
 0x6ce   : > { %2206 = vst [vmem:[#allocation1] ss:$2 sm:$0xff] %v2069_v23  ;;  %v4576_v23 = vld [vmem:[%s6794_s11 + $0x48] sm:$0xff] }
 0x6cf   : > { %2208 = vst [vmem:[#allocation1 + $0x1] ss:$2 sm:$0xff] %v2070_v24  ;;  %v4600_v24 = vld [vmem:[%s6794_s11 + $0xe8] sm:$0xff] }
 0x6d0   : > { %1812 = vst.msk [vmem:[#allocation4 + $0x21] sm:$0xf] %vm1141_vm15, %v1806_v32  ;;  %v4590_v32 = vld [vmem:[%s6794_s11 + $0xa8] sm:$0xff] }
 0x6d6   : > { %v2213_v36 = vld.sshfl [vmem:[#allocation1] sm:$0xff pattern:$0x75316420] }
 0x6d7   : > { %2221 = vst [vmem:[#allocation1] ss:$2 sm:$0xff] %v1950_v15  ;;  %2215 = vrot.lane.b32.xlu0 %v2213_v36, %s6819_s27  ;;  %v5758_v38 = vld [vmem:[#allocation4 + $0x21] sm:$0xf]  ;;  %v4581_v15 = vld [vmem:[%s6794_s11 + $0x70] sm:$0xff]  ;;  %v4588_v36 = vld [vmem:[%s6794_s11 + $0x98] sm:$0xff] }
 0x6d8   : > { %2223 = vst [vmem:[#allocation1 + $0x1] ss:$2 sm:$0xff] %v1951_v0  ;;  %v5784_v46 = vld [vmem:[#allocation4 + $0x20] sm:$0xf]  ;;  %2052 = vmatpush.msrb.mxu1 %v4581_v15  ;;  %v4579_v0 = vld [vmem:[%s6794_s11 + $0x60] sm:$0xff] }
 0x6d9   : > { %1839 = vst [vmem:[#allocation1 + $0x11] ss:$2 sm:$0xff] %v5758_v38  ;;  %v5814_v12 = vld [vmem:[#allocation4 + $0x21] sm:$0xf] }
 0x6da   : > { %v2075_v14 = vld [vmem:[#allocation4 + $0x20] sm:$0xf]  ;;  %2053 = vmatpush.msrb.mxu1 %v4580_v16  ;;  %v2605_v16 = vld [vmem:[#allocation5] sm:$0xff] }
 0x6db   : > { %v2189_v43 = vld [vmem:[#allocation4 + $0x22] sm:$0xf] }
 0x6dc   : > { %2054 = vmatpush.msrb.mxu1 %v4579_v0  ;;  %v2814_v0 = vld [vmem:[#allocation5 + $0x2] sm:$0xff] }
 0x6de   : > { %2055 = vmatpush.msrb.mxu1 %v4578_v18 }
 0x6df   : > { %v2228_v10 = vld.sshfl [vmem:[#allocation1] sm:$0xff pattern:$0x75316420]  ;;  %2016 = vrot.lane.b32.xlu0 %v2014_v22, %s6823_s24  ;;  %v4601_v22 = vld [vmem:[%s6794_s11 + $0xf0] sm:$0xff] }
 0x6e0   : > { %2236 = vst [vmem:[#allocation1] ss:$2 sm:$0xff] %v5714_v59  ;;  %v5775_v11 = vld.sshfl [vmem:[#allocation1 + $0x10] sm:$0xff pattern:$0x75316420]  ;;  %2230 = vrot.lane.b32.xlu2 %v2228_v10, %s6822_s23  ;;  %2056 = vmatpush.msrb.mxu1 %v4577_v21  ;;  %v4586_v10 = vld [vmem:[%s6794_s11 + $0x88] sm:$0xff] }
 0x6e1   : > { %2238 = vst [vmem:[#allocation1 + $0x1] ss:$2 sm:$0xff] %v5720_v37  ;;  %v1827_v59 = vld [vmem:[#allocation4 + $0x10] sm:$0xf]  ;;  %v5801_v37 = vld [vmem:[#allocation4 + $0x22] sm:$0xf]  ;;  %2281 = vmatpush.msrb.mxu2 %v4601_v22  ;;  %4654 = vmatpush.msrb.mxu3 %v4601_v22 }
 0x6e2   : > { %1852 = vst [vmem:[#allocation1 + $0x10] ss:$2 sm:$0xff] %v5781_v45  ;;  %2057 = vmatpush.msrb.mxu1 %v4576_v23 }
 0x6e3   : > { %1854 = vst [vmem:[#allocation1 + $0x11] ss:$2 sm:$0xff] %v5784_v46  ;;  %2282 = vmatpush.msrb.mxu2 %v4600_v24  ;;  %4655 = vmatpush.msrb.mxu3 %v4600_v24 }
 0x6e4   : > { %2058 = vmatpush.msrb.mxu1 %v4575_v25 }
 0x6e5   : > { %2283 = vmatpush.msrb.mxu2 %v4599_v27  ;;  %4656 = vmatpush.msrb.mxu3 %v4599_v27 }
 0x6e6   : > { %v1877_v52 = vpop.permute.xlu0 %1876 }
 0x6e7   : > { %2120 = vrot.lane.b32.xlu0 %v2118_v29, %s6822_s23  ;;  %v1903_v54 = vsel %vm913_vm9, %v1901_v53, %v1877_v52  ;;  %v4598_v29 = vld [vmem:[%s6794_s11 + $0xd8] sm:$0xff] }
 0x6e8   : > { %v2243_v47 = vld.sshfl [vmem:[#allocation1] sm:$0xff pattern:$0x75316420]  ;;  %2105 = vrot.lane.b32.xlu2 %v2103_v28, %s6819_s27  ;;  %v4592_v28 = vld [vmem:[%s6794_s11 + $0xb8] sm:$0xff]  ;;  %2284 = vmatpush.msrb.mxu2 %v4598_v29 }
 0x6e9   : > { %2245 = vrot.lane.b32.xlu1 %v2243_v47, %s6823_s24  ;;  %2170 = vmatpush.msra.mxu0 %v4592_v28  ;;  %v1983_v47 = vpop.permute.xlu2 %1982 }
 0x6ea   : > { %v1856_v49 = vld.sshfl [vmem:[#allocation1 + $0x10] sm:$0xff pattern:$0x75316420]  ;;  %4657 = vmatpush.msrb.mxu3 %v4598_v29  ;;  %2285 = vmatpush.msrb.mxu2 %v4597_v30 }
 0x6eb   : > { %1871 = vst [vmem:[#allocation1 + $0x10] ss:$2 sm:$0xff] %v1823_v48 }
 0x6ec   : > { %1873 = vst [vmem:[#allocation1 + $0x11] ss:$2 sm:$0xff] %v1824_v50  ;;  %4658 = vmatpush.msrb.mxu3 %v4597_v30  ;;  %2286 = vmatpush.msrb.mxu2 %v4596_v33 }
 0x6ee   : > { %4659 = vmatpush.msrb.mxu3 %v4596_v33  ;;  %2287 = vmatpush.msrb.mxu2 %v4595_v35 }
 0x6ef   : > { %v1896_v56 = vpop.permute.xlu1 %1895 }
 0x6f0   : > { %1859 = vrot.lane.b32.xlu2 %v1856_v49, %s6819_s27  ;;  %v1905_v58 = vsel %vm1346_vm2, %v1903_v54, %v1896_v56  ;;  %4660 = vmatpush.msrb.mxu3 %v4595_v35  ;;  %v2022_v49 = vsel %vm877_vm5, %v5735_v17, %v1983_v47 }
 0x6f1   : > { %2135 = vrot.lane.b32.xlu1 %v2133_v7, %s6823_s24  ;;  %4573 = vmatmul.msk.f32.vlgmr.msra.gmra.mxu3 %vm1352_vm6, %v1905_v58  ;;  %v4591_v7 = vld [vmem:[%s6794_s11 + $0xb0] sm:$0xff] }
 0x6f2   : > { %2171 = vmatpush.msra.mxu0 %v4591_v7 }
 0x6f3   : > { %v1875_v60 = vld.sshfl [vmem:[#allocation1 + $0x10] sm:$0xff pattern:$0x75316420] }
 0x6f4   : > { %1890 = vst [vmem:[#allocation1 + $0x10] ss:$2 sm:$0xff] %v1827_v59  ;;  %1878 = vrot.lane.b32.xlu0 %v1875_v60, %s6822_s23  ;;  %2172 = vmatpush.msra.mxu0 %v4590_v32 }
 0x6f5   : > { %1892 = vst [vmem:[#allocation1 + $0x11] ss:$2 sm:$0xff] %v1828_v55 }
 0x6f6   : > { %2173 = vmatpush.msra.mxu0 %v4589_v34 }
 0x6f8   : > { %2174 = vmatpush.msra.mxu0 %v4588_v36 }
 0x6fa   : > { %2175 = vmatpush.msra.mxu0 %v4587_v41 }
 0x6fc   : > { %v1894_v57 = vld.sshfl [vmem:[#allocation1 + $0x10] sm:$0xff pattern:$0x75316420]  ;;  %2176 = vmatpush.msra.mxu0 %v4586_v10 }
 0x6fd   : > { %1966 = vst [vmem:[#allocation1 + $0x10] ss:$2 sm:$0xff] %v5799_v40  ;;  %1897 = vrot.lane.b32.xlu1 %v1894_v57, %s6823_s24 }
 0x6fe   : > { %1968 = vst [vmem:[#allocation1 + $0x11] ss:$2 sm:$0xff] %v5801_v37  ;;  %2177 = vmatpush.msra.mxu0 %v4585_v44 }
 0x705   : > { %v5806_v61 = vld.sshfl [vmem:[#allocation1 + $0x10] sm:$0xff pattern:$0x75316420] }
 0x706   : > { %1977 = vst [vmem:[#allocation1 + $0x10] ss:$2 sm:$0xff] %v5729_v8 }
 0x707   : > { %1979 = vst [vmem:[#allocation1 + $0x11] ss:$2 sm:$0xff] %v5758_v38 }
 0x70e   : > { %v1981_v1 = vld.sshfl [vmem:[#allocation1 + $0x10] sm:$0xff pattern:$0x75316420] }
 0x70f   : > { %1996 = vst [vmem:[#allocation1 + $0x10] ss:$2 sm:$0xff] %v1956_v62  ;;  %1984 = vrot.lane.b32.xlu2 %v1981_v1, %s6819_s27 }
 0x710   : > { %1998 = vst [vmem:[#allocation1 + $0x11] ss:$2 sm:$0xff] %v1957_v3 }
 0x717   : > { %v2000_v4 = vld.sshfl [vmem:[#allocation1 + $0x10] sm:$0xff pattern:$0x75316420] }
 0x718   : > { %2011 = vst [vmem:[#allocation1 + $0x10] ss:$2 sm:$0xff] %v1823_v48  ;;  %2003 = vrot.lane.b32.xlu0 %v2000_v4, %s6822_s23  ;;  %v2002_v48 = vpop.permute.xlu1 %2001 }
 0x719   : > { %2013 = vst [vmem:[#allocation1 + $0x11] ss:$2 sm:$0xff] %v1824_v50  ;;  %v2024_v50 = vsel %vm913_vm9, %v2022_v49, %v2002_v48 }
 0x720   : > { %v2015_v9 = vld.sshfl [vmem:[#allocation1 + $0x10] sm:$0xff pattern:$0x75316420] }
 0x721   : > { %2085 = vst [vmem:[#allocation1 + $0x10] ss:$2 sm:$0xff] %v5814_v12  ;;  %2018 = vrot.lane.b32.xlu1 %v2015_v9, %s6823_s24 }
 0x722   : > { %2087 = vst [vmem:[#allocation1 + $0x11] ss:$2 sm:$0xff] %v5812_v5 }
 0x729   : > { %v5819_v63 = vld.sshfl [vmem:[#allocation1 + $0x10] sm:$0xff pattern:$0x75316420] }
 0x72a   : > { %2100 = vst [vmem:[#allocation1 + $0x10] ss:$2 sm:$0xff] %v2075_v14 }
 0x72b   : > { %2102 = vst [vmem:[#allocation1 + $0x11] ss:$2 sm:$0xff] %v2076_v13 }
 0x732   : > { %v5839_v20 = vld.sshfl [vmem:[#allocation1 + $0x10] sm:$0xff pattern:$0x75316420] }
 0x733   : > { %2115 = vst [vmem:[#allocation1 + $0x10] ss:$2 sm:$0xff] %v5729_v8 }
 0x734   : > { %2117 = vst [vmem:[#allocation1 + $0x11] ss:$2 sm:$0xff] %v5758_v38 }
 0x73a   : > { %v2231_v53 = vpop.permute.xlu2 %2230 }
 0x73b   : > { %v5867_v6 = vld.sshfl [vmem:[#allocation1 + $0x10] sm:$0xff pattern:$0x75316420] }
 0x73c   : > { %2130 = vst [vmem:[#allocation1 + $0x10] ss:$2 sm:$0xff] %v5781_v45 }
 0x73d   : > { %2132 = vst [vmem:[#allocation1 + $0x11] ss:$2 sm:$0xff] %v5784_v46 }
 0x742   : > { %v2106_v55 = vpop.permute.xlu2 %2105 }
 0x744   : > { %v2134_v42 = vld.sshfl [vmem:[#allocation1 + $0x10] sm:$0xff pattern:$0x75316420] }
 0x745   : > { %2199 = vst [vmem:[#allocation1 + $0x10] ss:$2 sm:$0xff] %v2189_v43  ;;  %2137 = vrot.lane.b32.xlu1 %v2134_v42, %s6823_s24 }
 0x746   : > { %2201 = vst [vmem:[#allocation1 + $0x11] ss:$2 sm:$0xff] %v2190_v39 }
 0x749   : > { %v2216_v45 = vpop.permute.xlu0 %2215 }
 0x74a   : > { %v2251_v56 = vsel %vm877_vm5, %v5745_v31, %v2216_v45  ;;  %v2141_v31 = vsel %vm877_vm5, %v5741_v26, %v2106_v55 }
 0x74b   : > { %v2253_v17 = vsel %vm913_vm9, %v2251_v56, %v2231_v53 }
 0x74d   : > { %v5902_v46 = vld.sshfl [vmem:[#allocation1 + $0x10] sm:$0xff pattern:$0x75316420] }
 0x74e   : > { %2210 = vst [vmem:[#allocation1 + $0x10] ss:$2 sm:$0xff] %v5814_v12 }
 0x74f   : > { %2212 = vst [vmem:[#allocation1 + $0x11] ss:$2 sm:$0xff] %v5812_v5 }
 0x751   : > { %v2017_v51 = vpop.permute.xlu0 %2016 }
 0x752   : > { %v2026_v52 = vsel %vm1346_vm2, %v2024_v50, %v2017_v51 }
 0x753   : > { %4583 = vmatmul.msk.f32.vlgmr.msrb.gmra.mxu1 %vm1352_vm6, %v2026_v52 }
 0x756   : > { %v2214_v54 = vld.sshfl [vmem:[#allocation1 + $0x10] sm:$0xff pattern:$0x75316420] }
 0x757   : > { %2225 = vst [vmem:[#allocation1 + $0x10] ss:$2 sm:$0xff] %v5799_v40  ;;  %2217 = vrot.lane.b32.xlu2 %v2214_v54, %s6819_s27 }
 0x758   : > { %2227 = vst [vmem:[#allocation1 + $0x11] ss:$2 sm:$0xff] %v5801_v37 }
 0x759   : > { %v2121_v40 = vpop.permute.xlu0 %2120 }
 0x75a   : > { %v2143_v57 = vsel %vm913_vm9, %v2141_v31, %v2121_v40 }
 0x75b   : > { %v2246_v58 = vpop.permute.xlu1 %2245 }
 0x75c   : > { %v2255_v59 = vsel %vm1346_vm2, %v2253_v17, %v2246_v58 }
 0x75d   : > { %4603 = vmatmul.msk.f32.vlgmr.msrb.gmra.mxu2 %vm1352_vm6, %v2255_v59 }
 0x75f   : > { %v2229_v60 = vld.sshfl [vmem:[#allocation1 + $0x10] sm:$0xff pattern:$0x75316420]  ;;  %2107 = vrot.lane.b32.xlu2 %v5839_v20, %s6819_s27 }
 0x760   : > { %2240 = vst [vmem:[#allocation1 + $0x10] ss:$2 sm:$0xff] %v5729_v8  ;;  %2232 = vrot.lane.b32.xlu0 %v2229_v60, %s6822_s23  ;;  %v1860_v8 = vpop.permute.xlu2 %1859 }
 0x761   : > { %2242 = vst [vmem:[#allocation1 + $0x11] ss:$2 sm:$0xff] %v5758_v38  ;;  %v1902_v38 = vsel %vm877_vm5, %v5775_v11, %v1860_v8  ;;  %v2597_v11 = vld [vmem:[#allocation5 + $0x1] sm:$0xff] }
 0x763   : > { %v2136_v37 = vpop.permute.xlu1 %2135 }
 0x764   : > { %v2145_v62 = vsel %vm1346_vm2, %v2143_v57, %v2136_v37 }
 0x765   : > { %4593 = vmatmul.msk.f32.vlgmr.msra.gmra.mxu0 %vm1352_vm6, %v2145_v62 }
 0x766   : > { %v1879_v3 = vpop.permute.xlu0 %1878 }
 0x767   : > { %v1904_v26 = vsel %vm913_vm9, %v1902_v38, %v1879_v3 }
 0x768   : > { %v2244_v1 = vld.sshfl [vmem:[#allocation1 + $0x10] sm:$0xff pattern:$0x75316420]  ;;  %2122 = vrot.lane.b32.xlu0 %v5867_v6, %s6822_s23  ;;  %s4750_s23 = smov 24  }
 0x769   : > { %2247 = vrot.lane.b32.xlu1 %v2244_v1, %s6823_s24  ;;  %v1985_v9 = vpop.permute.xlu2 %1984 }
 0x76a   : > { %v2023_v13 = vsel %vm877_vm5, %v5806_v61, %v1985_v9  ;;  %v5949_v61 = vld [vmem:[%s6795_s12] ss:$0 sm:$0xff] }
 0x76f   : > { %v1898_v4 = vpop.permute.xlu1 %1897 }
 0x770   : > { %v1906_v5 = vsel %vm1346_vm2, %v1904_v26, %v1898_v4  ;;  %2653 = vrot.lane.b32.xlu0 %v2597_v11, %s6819_s27 }
 0x771   : > { %4574 = vmatmul.msk.f32.gmra.mxu3 %vm1352_vm6, %v1906_v5  ;;  %2685 = vrot.lane.b32.xlu1 %v2605_v16, %s4750_s23 }
 0x774   : > { %v1942_v18 = vpop.f32.mrf.mxu3 }
 0x775   : > { %v1943_v20 = vadd.f32 %v5949_v61, %v1942_v18 }
 0x777   : > { %v1948_v23 = vmax.f32 %v1943_v20, 0.0 }
 0x778   : > { %2862 = vrot.lane.b32.xlu0 %v2814_v0, %s6819_s27 }
 0x779   : > { %2886 = vrot.lane.b32.xlu1 %v2597_v11, %s4750_s23  ;;  %v2299_v7 = vrot.slane %v1948_v23, 1  ;;  %v2300_v30 = vrot.slane %v1948_v23, 2  ;;  %v2301_v33 = vrot.slane %v1948_v23, 3  ;;  %v2302_v59 = vrot.slane %v1948_v23, 4 }
 0x77a   : > { %v2303_v40 = vrot.slane %v1948_v23, 5  ;;  %v2304_v37 = vrot.slane %v1948_v23, 6  ;;  %v2305_v3 = vrot.slane %v1948_v23, 7 }
 0x78a   : > { %v2004_v12 = vpop.permute.xlu0 %2003 }
 0x78b   : > { %v2025_v14 = vsel %vm913_vm9, %v2023_v13, %v2004_v12 }
 0x793   : > { %v2019_v2 = vpop.permute.xlu1 %2018 }
 0x794   : > { %v2027_v15 = vsel %vm1346_vm2, %v2025_v14, %v2019_v2 }
 0x795   : > { %4584 = vmatmul.msk.f32.gmra.mxu1 %vm1352_vm6, %v2027_v15 }
 0x7b1   : > { %v2218_v19 = vpop.permute.xlu2 %2217 }
 0x7b2   : > { %v2252_v44 = vsel %vm877_vm5, %v5902_v46, %v2218_v19 }
 0x7b7   : > { %v2138_v25 = vpop.permute.xlu1 %2137 }
 0x7b9   : > { %v2108_v34 = vpop.permute.xlu2 %2107 }
 0x7ba   : > { %v2142_v45 = vsel %vm877_vm5, %v5819_v63, %v2108_v34 }
 0x7d0   : > { %v2060_v21 = vpop.f32.mrf.mxu1 }
 0x7d1   : > { %v2061_v22 = vadd.f32 %v5949_v61, %v2060_v21 }
 0x7d2   : > { %v2233_v24 = vpop.permute.xlu0 %2232 }
 0x7d3   : > { %v2066_v27 = vmax.f32 %v2061_v22, 0.0  ;;  %v2254_v48 = vsel %vm913_vm9, %v2252_v44, %v2233_v24 }
 0x7d5   : > { %v2329_v28 = vrot.slane %v2066_v27, 1  ;;  %v2330_v29 = vrot.slane %v2066_v27, 2  ;;  %v2331_v6 = vrot.slane %v2066_v27, 3  ;;  %v2343_v32 = vperm.slane %v2066_v27, 0 }
 0x7d6   : > { %v2332_v49 = vrot.slane %v2066_v27, 4  ;;  %v2333_v52 = vrot.slane %v2066_v27, 5  ;;  %v2334_v56 = vrot.slane %v2066_v27, 6  ;;  %v2335_v63 = vrot.slane %v2066_v27, 7 }
 0x7d7   : > { %v2344_v35 = vperm.slane %v2329_v28, 0  ;;  %v2345_v36 = vperm.slane %v2330_v29, 0  ;;  %v2346_v39 = vperm.slane %v2331_v6, 0  ;;  %v2375_v41 = vsel %vm1113_vm12, %v1948_v23, %v2343_v32 }
 0x7d8   : > { %2517 = vst [vmem:[#allocation1] ss:$4 sm:$0xff] %v2375_v41  ;;  %v2347_v46 = vperm.slane %v2332_v49, 0  ;;  %v2348_v17 = vperm.slane %v2333_v52, 0  ;;  %v2349_v60 = vperm.slane %v2334_v56, 0  ;;  %v2350_v31 = vperm.slane %v2335_v63, 0 }
 0x7d9   : > { %v2376_v42 = vsel %vm1113_vm12, %v2299_v7, %v2344_v35  ;;  %v2377_v43 = vsel %vm1113_vm12, %v2300_v30, %v2345_v36  ;;  %v2378_v10 = vsel %vm1113_vm12, %v2301_v33, %v2346_v39 }
 0x7da   : > { %2519 = vst [vmem:[#allocation1 + $0x1] ss:$4 sm:$0xff] %v2376_v42  ;;  %v2123_v47 = vpop.permute.xlu0 %2122  ;;  %v2379_v62 = vsel %vm1113_vm12, %v2302_v59, %v2347_v46  ;;  %v2380_v38 = vsel %vm1113_vm12, %v2303_v40, %v2348_v17  ;;  %v2381_v4 = vsel %vm1113_vm12, %v2304_v37, %v2349_v60  ;;  %v2382_v13 = vsel %vm1113_vm12, %v2305_v3, %v2350_v31 }
 0x7db   : > { %2521 = vst [vmem:[#allocation1 + $0x2] ss:$4 sm:$0xff] %v2377_v43  ;;  %v2144_v50 = vsel %vm913_vm9, %v2142_v45, %v2123_v47  ;;  %v2248_v51 = vpop.permute.xlu1 %2247 }
 0x7dc   : > { %2523 = vst [vmem:[#allocation1 + $0x3] ss:$4 sm:$0xff] %v2378_v10  ;;  %v2256_v53 = vsel %vm1346_vm2, %v2254_v48, %v2248_v51  ;;  %v2146_v54 = vsel %vm1346_vm2, %v2144_v50, %v2138_v25 }
 0x7dd   : > { %4604 = vmatmul.msk.f32.vlgmr.msrb.gmra.mxu3 %vm1352_vm6, %v2256_v53  ;;  %4594 = vmatmul.msk.f32.gmra.mxu0 %vm1352_vm6, %v2146_v54 }
 0x7e0   : > { %v2289_v58 = vpop.f32.mrf.mxu2 }
 0x7e1   : > { %v2290_v55 = vadd.f32 %v5949_v61, %v2289_v58 }
 0x7e2   : > { %v2179_v57 = vpop.f32.mrf.mxu0 }
 0x7e3   : > { %v2524_v1 = vld.sshfl [vmem:[#allocation1] sm:$0xff pattern:$0x73625140]  ;;  %v2295_v8 = vmax.f32 %v2290_v55, 0.0  ;;  %v2180_v26 = vadd.f32 %v5949_v61, %v2179_v57 }
 0x7e4   : > { %2534 = vst [vmem:[#allocation1] ss:$4 sm:$0xff] %v2379_v62 }
 0x7e5   : > { %2535 = vst [vmem:[#allocation1 + $0x1] ss:$4 sm:$0xff] %v2380_v38  ;;  %v2423_v5 = vrot.slane %v2295_v8, 1  ;;  %v2424_v9 = vrot.slane %v2295_v8, 2  ;;  %v2425_v12 = vrot.slane %v2295_v8, 3  ;;  %v2437_v14 = vperm.slane %v2295_v8, 0 }
 0x7e6   : > { %2536 = vst [vmem:[#allocation1 + $0x2] ss:$4 sm:$0xff] %v2381_v4  ;;  %v2185_v11 = vmax.f32 %v2180_v26, 0.0  ;;  %v2426_v25 = vrot.slane %v2295_v8, 4  ;;  %v2427_v6 = vrot.slane %v2295_v8, 5  ;;  %v2428_v7 = vrot.slane %v2295_v8, 6 }
 0x7e7   : > { %2537 = vst [vmem:[#allocation1 + $0x3] ss:$4 sm:$0xff] %v2382_v13  ;;  %v2438_v2 = vperm.slane %v2423_v5, 0  ;;  %v2439_v15 = vperm.slane %v2424_v9, 0  ;;  %v2440_v16 = vperm.slane %v2425_v12, 0  ;;  %v2429_v30 = vrot.slane %v2295_v8, 7 }
 0x7e8   : > { %2573 = vst.msk [vmem:[#allocation5 + $0x11] sm:$0xff] %vm495_vm0, %v2524_v1  ;;  %v2393_v0 = vrot.slane %v2185_v11, 1  ;;  %v2394_v18 = vrot.slane %v2185_v11, 2  ;;  %v2395_v19 = vrot.slane %v2185_v11, 3  ;;  %v2469_v20 = vsel %vm1113_vm12, %v2185_v11, %v2437_v14 }
 0x7e9   : > { %2526 = vst [vmem:[#allocation1 + $0x20] ss:$4 sm:$0xff] %v2469_v20  ;;  %v2441_v32 = vperm.slane %v2426_v25, 0  ;;  %v2396_v33 = vrot.slane %v2185_v11, 4  ;;  %v2442_v34 = vperm.slane %v2427_v6, 0  ;;  %v2397_v35 = vrot.slane %v2185_v11, 5 }
 0x7ea   : > { %v2470_v21 = vsel %vm1113_vm12, %v2393_v0, %v2438_v2  ;;  %v2471_v22 = vsel %vm1113_vm12, %v2394_v18, %v2439_v15  ;;  %v2472_v23 = vsel %vm1113_vm12, %v2395_v19, %v2440_v16  ;;  %v2443_v36 = vperm.slane %v2428_v7, 0  ;;  %v2736_v15 = vld [vmem:[%s6796_s13 + $0x18] sm:$0xff]  ;;  %v2734_v25 = vld [vmem:[%s6796_s13 + $0x8] sm:$0xff]  ;;  %v4615_v7 = vld [vmem:[%s6796_s13 + $0x30] sm:$0xff] }
 0x7eb   : > { %2528 = vst [vmem:[#allocation1 + $0x21] ss:$4 sm:$0xff] %v2470_v21  ;;  %v2398_v39 = vrot.slane %v2185_v11, 6  ;;  %v2444_v41 = vperm.slane %v2429_v30, 0  ;;  %v2399_v42 = vrot.slane %v2185_v11, 7  ;;  %v2473_v43 = vsel %vm1113_vm12, %v2396_v33, %v2441_v32  ;;  %v2735_v11 = vld [vmem:[%s6796_s13 + $0x10] sm:$0xff]  ;;  %2777 = vmatpush.msra.mxu3 %v2736_v15 }
 0x7ec   : > { %2530 = vst [vmem:[#allocation1 + $0x22] ss:$4 sm:$0xff] %v2471_v22  ;;  %v2474_v44 = vsel %vm1113_vm12, %v2397_v35, %v2442_v34  ;;  %v4616_v6 = vld [vmem:[%s6796_s13 + $0x38] sm:$0xff]  ;;  %v4614_v35 = vld [vmem:[%s6796_s13 + $0x28] sm:$0xff] }
 0x7ed   : > { %2532 = vst [vmem:[#allocation1 + $0x23] ss:$4 sm:$0xff] %v2472_v23  ;;  %v2475_v45 = vsel %vm1113_vm12, %v2398_v39, %v2443_v36  ;;  %v2476_v47 = vsel %vm1113_vm12, %v2399_v42, %v2444_v41  ;;  %2778 = vmatpush.msra.mxu3 %v2735_v11  ;;  %2975 = vmatpush.msra.mxu1 %v4616_v6  ;;  %v4613_v36 = vld [vmem:[%s6796_s13 + $0x20] sm:$0xff]  ;;  %v2654_v39 = vpop.permute.xlu0 %2653  ;;  %v2686_v41 = vpop.permute.xlu1 %2685 }
 0x7ee   : > { %v2538_v24 = vld.sshfl [vmem:[#allocation1] sm:$0xff pattern:$0x73625140] }
 0x7ef   : > { %2575 = vst.msk [vmem:[#allocation5 + $0x31] sm:$0xff] %vm495_vm0, %v2538_v24  ;;  %v5979_v27 = vld [vmem:[#allocation5 + $0x12] sm:$0xff]  ;;  %2779 = vmatpush.msra.mxu3 %v2734_v25  ;;  %2976 = vmatpush.msra.mxu1 %v4615_v7 }
 0x7f0   : > { %v2589_v28 = vld [vmem:[#allocation5 + $0x10] sm:$0xff]  ;;  %3243 = vrot.lane.b32.xlu0 %v5979_v27, %s6819_s27 }
 0x7f1   : > { %v5981_v29 = vld [vmem:[#allocation5 + $0x11] sm:$0xff]  ;;  %2621 = vrot.lane.b32.xlu2 %v2589_v28, %s6824_s22  ;;  %2977 = vmatpush.msra.mxu1 %v4614_v35 }
 0x7f2   : > { %3267 = vrot.lane.b32.xlu1 %v5981_v29, %s4750_s23 }
 0x7f3   : > { %2978 = vmatpush.msra.mxu1 %v4613_v36 }
 0x7f4   : > { %v2533_v10 = vld.sshfl [vmem:[#allocation1 + $0x20] sm:$0xff pattern:$0x73625140]  ;;  %v1945_v51 = vpop.f32.mrf.mxu3 }
 0x7f5   : > { %2539 = vst [vmem:[#allocation1 + $0x20] ss:$4 sm:$0xff] %v2473_v43  ;;  %v1946_v53 = vadd.f32 %v5949_v61, %v1945_v51  ;;  %v2887_v51 = vpop.permute.xlu1 %2886 }
 0x7f6   : > { %2540 = vst [vmem:[#allocation1 + $0x21] ss:$4 sm:$0xff] %v2474_v44  ;;  %v6004_v49 = vld [vmem:[#allocation5 + $0x31] sm:$0xff] }
 0x7f7   : > { %2541 = vst [vmem:[#allocation1 + $0x22] ss:$4 sm:$0xff] %v2475_v45  ;;  %v2591_v50 = vld [vmem:[#allocation5 + $0x30] sm:$0xff]  ;;  %v1949_v63 = vmax.f32 %v1946_v53, 0.0  ;;  %v2863_v45 = vpop.permute.xlu0 %2862 }
 0x7f8   : > { %3053 = vrot.lane.b32.xlu0 %v5981_v29, %s6819_s27  ;;  %2542 = vst [vmem:[#allocation1 + $0x23] ss:$4 sm:$0xff] %v2476_v47  ;;  %v6011_v52 = vld [vmem:[#allocation5 + $0x32] sm:$0xff] }
 0x7f9   : > { %2830 = vrot.lane.b32.xlu2 %v5981_v29, %s6824_s22  ;;  %2574 = vst.msk [vmem:[#allocation5 + $0x21] sm:$0xff] %vm495_vm0, %v2533_v10  ;;  %v2306_v60 = vrot.slane %v1949_v63, 1  ;;  %v2307_v55 = vrot.slane %v1949_v63, 2  ;;  %v2308_v31 = vrot.slane %v1949_v63, 3  ;;  %v2309_v14 = vrot.slane %v1949_v63, 4 }
 0x7fa   : > { %2687 = vrot.lane.b32.xlu1 %v2589_v28, %s4750_s23  ;;  %v2310_v16 = vrot.slane %v1949_v63, 5  ;;  %v2311_v18 = vrot.slane %v1949_v63, 6  ;;  %v2312_v21 = vrot.slane %v1949_v63, 7 }
 0x7ff   : > { %v2543_v48 = vld.sshfl [vmem:[#allocation1 + $0x20] sm:$0xff pattern:$0x73625140] }
 0x800   : > { %2655 = vrot.lane.b32.xlu0 %v5981_v29, %s6819_s27  ;;  %2576 = vst.msk [vmem:[#allocation5 + $0x41] sm:$0xff] %vm495_vm0, %v2543_v48  ;;  %v6142_v15 = vld [vmem:[#allocation5 + $0x21] sm:$0xff] }
 0x801   : > { %3077 = vrot.lane.b32.xlu2 %v2589_v28, %s4750_s23  ;;  %v2733_v28 = vld [vmem:[%s6796_s13] sm:$0xff] }
 0x802   : > { %2888 = vrot.lane.b32.xlu1 %v5981_v29, %s4750_s23  ;;  %2780 = vmatpush.msra.mxu3 %v2733_v28 }
 0x808   : > { %2864 = vrot.lane.b32.xlu0 %v5979_v27, %s6819_s27 }
 0x809   : > { %3213 = vrot.lane.b32.xlu2 %v6004_v49, %s6824_s22 }
 0x80a   : > { %2625 = vrot.lane.b32.xlu1 %v2591_v50, %s6824_s22 }
 0x810   : > { %3247 = vrot.lane.b32.xlu0 %v6011_v52, %s6819_s27 }
 0x811   : > { %3031 = vrot.lane.b32.xlu2 %v2591_v50, %s6824_s22 }
 0x812   : > { %3271 = vrot.lane.b32.xlu1 %v6004_v49, %s4750_s23  ;;  %v2063_v54 = vpop.f32.mrf.mxu1 }
 0x813   : > { %v2064_v56 = vadd.f32 %v5949_v61, %v2063_v54 }
 0x815   : > { %v2067_v46 = vmax.f32 %v2064_v56, 0.0 }
 0x817   : > { %v2336_v17 = vrot.slane %v2067_v46, 1  ;;  %v2337_v58 = vrot.slane %v2067_v46, 2  ;;  %v2338_v59 = vrot.slane %v2067_v46, 3  ;;  %v2351_v40 = vperm.slane %v2067_v46, 0 }
 0x818   : > { %3057 = vrot.lane.b32.xlu0 %v6004_v49, %s6819_s27  ;;  %v2339_v26 = vrot.slane %v2067_v46, 4  ;;  %v2340_v4 = vrot.slane %v2067_v46, 5  ;;  %v2341_v5 = vrot.slane %v2067_v46, 6  ;;  %v2342_v9 = vrot.slane %v2067_v46, 7 }
 0x819   : > { %2834 = vrot.lane.b32.xlu2 %v6004_v49, %s6824_s22  ;;  %v2352_v57 = vperm.slane %v2336_v17, 0  ;;  %v2353_v37 = vperm.slane %v2337_v58, 0  ;;  %v2354_v62 = vperm.slane %v2338_v59, 0  ;;  %v2383_v1 = vsel %vm1113_vm12, %v1949_v63, %v2351_v40  ;;  %v6122_v59 = vld [vmem:[#allocation5 + $0x22] sm:$0xff] }
 0x81a   : > { %2691 = vrot.lane.b32.xlu1 %v2591_v50, %s4750_s23  ;;  %2544 = vst [vmem:[#allocation1] ss:$4 sm:$0xff] %v2383_v1  ;;  %v2355_v12 = vperm.slane %v2339_v26, 0  ;;  %v2356_v13 = vperm.slane %v2340_v4, 0  ;;  %v2357_v2 = vperm.slane %v2341_v5, 0  ;;  %v2358_v0 = vperm.slane %v2342_v9, 0 }
 0x81b   : > { %v2384_v8 = vsel %vm1113_vm12, %v2306_v60, %v2352_v57  ;;  %v2385_v3 = vsel %vm1113_vm12, %v2307_v55, %v2353_v37  ;;  %v2386_v38 = vsel %vm1113_vm12, %v2308_v31, %v2354_v62  ;;  %v6128_v40 = vld [vmem:[#allocation5 + $0x20] sm:$0xff] }
 0x81c   : > { %2545 = vst [vmem:[#allocation1 + $0x1] ss:$4 sm:$0xff] %v2384_v8  ;;  %v2387_v19 = vsel %vm1113_vm12, %v2309_v14, %v2355_v12  ;;  %v2388_v22 = vsel %vm1113_vm12, %v2310_v16, %v2356_v13  ;;  %v2389_v23 = vsel %vm1113_vm12, %v2311_v18, %v2357_v2  ;;  %v2390_v24 = vsel %vm1113_vm12, %v2312_v21, %v2358_v0 }
 0x81d   : > { %2546 = vst [vmem:[#allocation1 + $0x2] ss:$4 sm:$0xff] %v2385_v3 }
 0x81e   : > { %2547 = vst [vmem:[#allocation1 + $0x3] ss:$4 sm:$0xff] %v2386_v38 }
 0x820   : > { %2659 = vrot.lane.b32.xlu0 %v6004_v49, %s6819_s27 }
 0x821   : > { %3081 = vrot.lane.b32.xlu2 %v2591_v50, %s4750_s23 }
 0x822   : > { %2892 = vrot.lane.b32.xlu1 %v6004_v49, %s4750_s23 }
 0x825   : > { %v2548_v20 = vld.sshfl [vmem:[#allocation1] sm:$0xff pattern:$0x73625140] }
 0x826   : > { %2554 = vst [vmem:[#allocation1] ss:$4 sm:$0xff] %v2387_v19 }
 0x827   : > { %2555 = vst [vmem:[#allocation1 + $0x1] ss:$4 sm:$0xff] %v2388_v22 }
 0x828   : > { %2556 = vst [vmem:[#allocation1 + $0x2] ss:$4 sm:$0xff] %v2389_v23  ;;  %2868 = vrot.lane.b32.xlu0 %v6011_v52, %s6819_s27 }
 0x829   : > { %2557 = vst [vmem:[#allocation1 + $0x3] ss:$4 sm:$0xff] %v2390_v24 }
 0x82a   : > { %2577 = vst.msk [vmem:[#allocation5 + $0x51] sm:$0xff] %vm495_vm0, %v2548_v20 }
 0x830   : > { %v2558_v30 = vld.sshfl [vmem:[#allocation1] sm:$0xff pattern:$0x73625140] }
 0x831   : > { %2579 = vst.msk [vmem:[#allocation5 + $0x71] sm:$0xff] %vm495_vm0, %v2558_v30  ;;  %v6060_v32 = vld [vmem:[#allocation5 + $0x51] sm:$0xff] }
 0x832   : > { %v6062_v33 = vld [vmem:[#allocation5 + $0x52] sm:$0xff]  ;;  %3217 = vrot.lane.b32.xlu2 %v6060_v32, %s6824_s22 }
 0x833   : > { %v2593_v34 = vld [vmem:[#allocation5 + $0x50] sm:$0xff]  ;;  %3251 = vrot.lane.b32.xlu0 %v6062_v33, %s6819_s27 }
 0x834   : > { %2629 = vrot.lane.b32.xlu1 %v2593_v34, %s6824_s22 }
 0x838   : > { %v6095_v47 = vld [vmem:[#allocation5 + $0x71] sm:$0xff] }
 0x839   : > { %6825 = vst [vmem:[#allocation6_spill] sm:$0xff] %v6095_v47  ;;  %v6097_v48 = vld [vmem:[#allocation5 + $0x72] sm:$0xff] }
 0x83a   : > { %3035 = vrot.lane.b32.xlu2 %v2593_v34, %s6824_s22  ;;  %6826 = vst [vmem:[#allocation7_spill] sm:$0xff] %v6097_v48 }
 0x83b   : > { %3061 = vrot.lane.b32.xlu0 %v6060_v32, %s6819_s27 }
 0x83c   : > { %3275 = vrot.lane.b32.xlu1 %v6060_v32, %s4750_s23 }
 0x842   : > { %2838 = vrot.lane.b32.xlu2 %v6060_v32, %s6824_s22 }
 0x843   : > { %2663 = vrot.lane.b32.xlu0 %v6060_v32, %s6819_s27 }
 0x844   : > { %2695 = vrot.lane.b32.xlu1 %v2593_v34, %s4750_s23 }
 0x84a   : > { %3085 = vrot.lane.b32.xlu2 %v2593_v34, %s4750_s23 }
 0x84b   : > { %v2622_v42 = vpop.permute.xlu2 %2621  ;;  %2872 = vrot.lane.b32.xlu0 %v6062_v33, %s6819_s27 }
 0x84c   : > { %v2709_v43 = vsel %vm495_vm0, %v5981_v29, %v2622_v42  ;;  %2896 = vrot.lane.b32.xlu1 %v6060_v32, %s4750_s23  ;;  %v6103_v29 = vld [vmem:[#allocation5 + $0x70] sm:$0xff] }
 0x84d   : > { %v2717_v10 = vsel %vm877_vm5, %v2709_v43, %v2654_v39 }
 0x84e   : > { %v2725_v44 = vsel %vm895_vm7, %v2717_v10, %v2686_v41 }
 0x84f   : > { %4605 = vmatmul.msk.f32.vlgmr.msra.gmra.mxu3 %vm913_vm9, %v2725_v44 }
 0x852   : > { %3221 = vrot.lane.b32.xlu2 %v6095_v47, %s6824_s22 }
 0x853   : > { %v2831_v50 = vpop.permute.xlu2 %2830  ;;  %3255 = vrot.lane.b32.xlu0 %v6097_v48, %s6819_s27 }
 0x854   : > { %v2910_v53 = vsel %vm495_vm0, %v5979_v27, %v2831_v50  ;;  %2633 = vrot.lane.b32.xlu1 %v6103_v29, %s6824_s22 }
 0x855   : > { %v2918_v54 = vsel %vm877_vm5, %v2910_v53, %v2863_v45 }
 0x856   : > { %v2926_v56 = vsel %vm895_vm7, %v2918_v54, %v2887_v51  ;;  %v6184_v51 = vld [vmem:[#allocation5 + $0x42] sm:$0xff] }
 0x857   : > { %4617 = vmatmul.msk.f32.vlgmr.msra.gmra.mxu1 %vm913_vm9, %v2926_v56  ;;  %v2592_v54 = vld [vmem:[#allocation5 + $0x40] sm:$0xff] }
 0x85a   : > { %3039 = vrot.lane.b32.xlu2 %v6103_v29, %s6824_s22  ;;  %v2182_v63 = vpop.f32.mrf.mxu0 }
 0x85b   : > { %3065 = vrot.lane.b32.xlu0 %v6095_v47, %s6819_s27  ;;  %v6118_v27 = vpop.permute.xlu2 %3077  ;;  %v2183_v46 = vadd.f32 %v5949_v61, %v2182_v63 }
 0x85c   : > { %3279 = vrot.lane.b32.xlu1 %v6095_v47, %s4750_s23 }
 0x85d   : > { %v2186_v60 = vmax.f32 %v2183_v46, 0.0  ;;  %v6197_v46 = vld [vmem:[#allocation5 + $0x41] sm:$0xff] }
 0x85f   : > { %v2400_v1 = vrot.slane %v2186_v60, 1  ;;  %v2401_v8 = vrot.slane %v2186_v60, 2  ;;  %v2402_v26 = vrot.slane %v2186_v60, 3  ;;  %v2403_v24 = vrot.slane %v2186_v60, 4 }
 0x860   : > { %v2292_v17 = vpop.f32.mrf.mxu3  ;;  %v2404_v28 = vrot.slane %v2186_v60, 5  ;;  %v2405_v30 = vrot.slane %v2186_v60, 6  ;;  %v2406_v36 = vrot.slane %v2186_v60, 7 }
 0x861   : > { %v2293_v58 = vadd.f32 %v5949_v61, %v2292_v17 }
 0x862   : > { %v6124_v55 = vpop.permute.xlu0 %3243  ;;  %2842 = vrot.lane.b32.xlu2 %v6095_v47, %s6824_s22 }
 0x863   : > { %3245 = vrot.lane.b32.xlu0 %v6122_v59, %s6819_s27  ;;  %v2296_v31 = vmax.f32 %v2293_v58, 0.0  ;;  %v6136_v38 = vpop.permute.xlu2 %3213 }
 0x864   : > { %v6132_v57 = vpop.permute.xlu1 %3267  ;;  %2623 = vrot.lane.b32.xlu1 %v6128_v40, %s6824_s22 }
 0x865   : > { %v2430_v61 = vrot.slane %v2296_v31, 1  ;;  %v2431_v37 = vrot.slane %v2296_v31, 2  ;;  %v2432_v62 = vrot.slane %v2296_v31, 3  ;;  %v2445_v3 = vperm.slane %v2296_v31, 0 }
 0x866   : > { %v2433_v16 = vrot.slane %v2296_v31, 4  ;;  %v2434_v18 = vrot.slane %v2296_v31, 5  ;;  %v2435_v19 = vrot.slane %v2296_v31, 6  ;;  %v2436_v20 = vrot.slane %v2296_v31, 7 }
 0x867   : > { %v2446_v4 = vperm.slane %v2430_v61, 0  ;;  %v2447_v5 = vperm.slane %v2431_v37, 0  ;;  %v2448_v9 = vperm.slane %v2432_v62, 0  ;;  %v2477_v12 = vsel %vm1113_vm12, %v2186_v60, %v2445_v3 }
 0x868   : > { %2549 = vst [vmem:[#allocation1 + $0x20] ss:$4 sm:$0xff] %v2477_v12  ;;  %v2449_v21 = vperm.slane %v2433_v16, 0  ;;  %v2450_v22 = vperm.slane %v2434_v18, 0  ;;  %v2451_v25 = vperm.slane %v2435_v19, 0  ;;  %v2452_v6 = vperm.slane %v2436_v20, 0 }
 0x869   : > { %v2478_v13 = vsel %vm1113_vm12, %v2400_v1, %v2446_v4  ;;  %v2479_v14 = vsel %vm1113_vm12, %v2401_v8, %v2447_v5  ;;  %v2480_v2 = vsel %vm1113_vm12, %v2402_v26, %v2448_v9  ;;  %v4640_v5 = vld [vmem:[%s6796_s13 + $0x78] sm:$0xff]  ;;  %v4639_v12 = vld [vmem:[%s6796_s13 + $0x70] sm:$0xff]  ;;  %v4638_v16 = vld [vmem:[%s6796_s13 + $0x68] sm:$0xff] }
 0x86a   : > { %2550 = vst [vmem:[#allocation1 + $0x21] ss:$4 sm:$0xff] %v2478_v13  ;;  %v6144_v11 = vpop.permute.xlu0 %3053  ;;  %3089 = vrot.lane.b32.xlu2 %v6103_v29, %s4750_s23  ;;  %v2481_v34 = vsel %vm1113_vm12, %v2403_v24, %v2449_v21  ;;  %v2482_v39 = vsel %vm1113_vm12, %v2404_v28, %v2450_v22  ;;  %v2483_v41 = vsel %vm1113_vm12, %v2405_v30, %v2451_v25  ;;  %v4637_v21 = vld [vmem:[%s6796_s13 + $0x60] sm:$0xff]  ;;  %v4628_v22 = vld [vmem:[%s6796_s13 + $0x58] sm:$0xff]  ;;  %v4627_v24 = vld [vmem:[%s6796_s13 + $0x50] sm:$0xff] }
 0x86b   : > { %3055 = vrot.lane.b32.xlu0 %v6142_v15, %s6819_s27  ;;  %2551 = vst [vmem:[#allocation1 + $0x22] ss:$4 sm:$0xff] %v2479_v14  ;;  %v6154_v23 = vpop.permute.xlu2 %3031  ;;  %v2484_v43 = vsel %vm1113_vm12, %v2406_v36, %v2452_v6  ;;  %3356 = vmatpush.msra.mxu2 %v4640_v5  ;;  %v4626_v30 = vld [vmem:[%s6796_s13 + $0x48] sm:$0xff]  ;;  %v6331_v5 = vld [vmem:[%s6797_s14] ss:$0 sm:$0xff] }
 0x86c   : > { %v6150_v0 = vpop.permute.xlu1 %2687  ;;  %3269 = vrot.lane.b32.xlu1 %v6142_v15, %s4750_s23  ;;  %2552 = vst [vmem:[#allocation1 + $0x23] ss:$4 sm:$0xff] %v2480_v2  ;;  %3166 = vmatpush.msrb.mxu0 %v4628_v22 }
 0x86d   : > { %3357 = vmatpush.msra.mxu2 %v4639_v12  ;;  %6841 = vst [vmem:[#allocation22_spill] sm:$0xff] %v6331_v5 }
 0x86e   : > { %3167 = vmatpush.msrb.mxu0 %v4627_v24 }
 0x86f   : > { %3358 = vmatpush.msra.mxu2 %v4638_v16 }
 0x870   : > { %3168 = vmatpush.msrb.mxu0 %v4626_v30 }
 0x871   : > { %3359 = vmatpush.msra.mxu2 %v4637_v21 }
 0x872   : > { %v6156_v7 = vpop.permute.xlu0 %2655  ;;  %3211 = vrot.lane.b32.xlu2 %v6142_v15, %s6824_s22 }
 0x873   : > { %2657 = vrot.lane.b32.xlu0 %v6142_v15, %s6819_s27  ;;  %v2553_v35 = vld.sshfl [vmem:[#allocation1 + $0x20] sm:$0xff pattern:$0x73625140]  ;;  %v6171_v10 = vpop.permute.xlu2 %2834 }
 0x874   : > { %2689 = vrot.lane.b32.xlu1 %v6128_v40, %s4750_s23  ;;  %2559 = vst [vmem:[#allocation1 + $0x20] ss:$4 sm:$0xff] %v2481_v34  ;;  %v6167_v42 = vpop.permute.xlu1 %2888 }
 0x875   : > { %2560 = vst [vmem:[#allocation1 + $0x21] ss:$4 sm:$0xff] %v2482_v39 }
 0x876   : > { %2561 = vst [vmem:[#allocation1 + $0x22] ss:$4 sm:$0xff] %v2483_v41 }
 0x877   : > { %2562 = vst [vmem:[#allocation1 + $0x23] ss:$4 sm:$0xff] %v2484_v43 }
 0x878   : > { %2578 = vst.msk [vmem:[#allocation5 + $0x61] sm:$0xff] %vm495_vm0, %v2553_v35 }
 0x87a   : > { %v6173_v44 = vpop.permute.xlu0 %2864  ;;  %3029 = vrot.lane.b32.xlu2 %v6128_v40, %s6824_s22 }
 0x87b   : > { %2866 = vrot.lane.b32.xlu0 %v6122_v59, %s6819_s27  ;;  %v6193_v56 = vpop.permute.xlu2 %3081 }
 0x87c   : > { %2890 = vrot.lane.b32.xlu1 %v6142_v15, %s4750_s23  ;;  %v6182_v50 = vpop.permute.xlu1 %2625 }
 0x87e   : > { %v2563_v45 = vld.sshfl [vmem:[#allocation1 + $0x20] sm:$0xff pattern:$0x73625140] }
 0x87f   : > { %2580 = vst.msk [vmem:[#allocation5 + $0x81] sm:$0xff] %vm495_vm0, %v2563_v45  ;;  %v6231_v1 = vld [vmem:[#allocation5 + $0x62] sm:$0xff] }
 0x880   : > { %v2594_v8 = vld [vmem:[#allocation5 + $0x60] sm:$0xff] }
 0x881   : > { %v6247_v9 = vld [vmem:[#allocation5 + $0x61] sm:$0xff] }
 0x882   : > { %v6186_v53 = vpop.permute.xlu0 %3247  ;;  %2832 = vrot.lane.b32.xlu2 %v6142_v15, %s6824_s22 }
 0x883   : > { %3249 = vrot.lane.b32.xlu0 %v6184_v51, %s6819_s27 }
 0x884   : > { %2627 = vrot.lane.b32.xlu1 %v2592_v54, %s6824_s22  ;;  %v6195_v63 = vpop.permute.xlu1 %3271 }
 0x886   : > { %v6336_v16 = vld [vmem:[#allocation5 + $0x82] sm:$0xff] }
 0x887   : > { %6842 = vst [vmem:[#allocation23_spill] sm:$0xff] %v6336_v16  ;;  %v6338_v21 = vld [vmem:[#allocation5 + $0x81] sm:$0xff] }
 0x88a   : > { %v6199_v17 = vpop.permute.xlu0 %3057  ;;  %3079 = vrot.lane.b32.xlu2 %v6128_v40, %s4750_s23 }
 0x88b   : > { %3059 = vrot.lane.b32.xlu0 %v6197_v46, %s6819_s27 }
 0x88c   : > { %3273 = vrot.lane.b32.xlu1 %v6197_v46, %s4750_s23  ;;  %v6207_v58 = vpop.permute.xlu2 %3217  ;;  %v6215_v31 = vpop.permute.xlu1 %2691 }
 0x892   : > { %v6209_v60 = vpop.permute.xlu0 %2659  ;;  %3215 = vrot.lane.b32.xlu2 %v6197_v46, %s6824_s22 }
 0x893   : > { %2661 = vrot.lane.b32.xlu0 %v6197_v46, %s6819_s27 }
 0x894   : > { %2693 = vrot.lane.b32.xlu1 %v2592_v54, %s4750_s23  ;;  %v6218_v61 = vpop.permute.xlu2 %3035  ;;  %v6229_v62 = vpop.permute.xlu1 %2892 }
 0x89a   : > { %3033 = vrot.lane.b32.xlu2 %v2592_v54, %s6824_s22  ;;  %v6225_v40 = vpop.permute.xlu0 %2868 }
 0x89b   : > { %2870 = vrot.lane.b32.xlu0 %v6184_v51, %s6819_s27 }
 0x89c   : > { %2894 = vrot.lane.b32.xlu1 %v6197_v46, %s4750_s23  ;;  %v6227_v37 = vpop.permute.xlu2 %2838 }
 0x8a2   : > { %2836 = vrot.lane.b32.xlu2 %v6197_v46, %s6824_s22 }
 0x8a3   : > { %3253 = vrot.lane.b32.xlu0 %v6231_v1, %s6819_s27 }
 0x8a4   : > { %2631 = vrot.lane.b32.xlu1 %v2594_v8, %s6824_s22  ;;  %v6240_v26 = vpop.permute.xlu2 %3085 }
 0x8a5   : > { %v6238_v3 = vpop.permute.xlu0 %3251  ;;  %6827 = vst [vmem:[#allocation8_spill] sm:$0xff] %v6240_v26 }
 0x8a6   : > { %v6242_v4 = vpop.permute.xlu1 %2629 }
 0x8aa   : > { %3083 = vrot.lane.b32.xlu2 %v2592_v54, %s4750_s23 }
 0x8ab   : > { %3063 = vrot.lane.b32.xlu0 %v6247_v9, %s6819_s27 }
 0x8ac   : > { %3277 = vrot.lane.b32.xlu1 %v6247_v9, %s4750_s23  ;;  %v6259_v14 = vpop.permute.xlu2 %3221 }
 0x8ad   : > { %v6257_v13 = vpop.permute.xlu0 %3061  ;;  %6829 = vst [vmem:[#allocation10_spill] sm:$0xff] %v6259_v14 }
 0x8ae   : > { %6828 = vst [vmem:[#allocation9_spill] sm:$0xff] %v6257_v13  ;;  %v6261_v2 = vpop.permute.xlu1 %3275 }
 0x8b2   : > { %3219 = vrot.lane.b32.xlu2 %v6247_v9, %s6824_s22 }
 0x8b3   : > { %2665 = vrot.lane.b32.xlu0 %v6247_v9, %s6819_s27 }
 0x8b4   : > { %2697 = vrot.lane.b32.xlu1 %v2594_v8, %s4750_s23  ;;  %v6273_v19 = vpop.permute.xlu2 %3039 }
 0x8b5   : > { %v6271_v18 = vpop.permute.xlu0 %2663  ;;  %6831 = vst [vmem:[#allocation12_spill] sm:$0xff] %v6273_v19 }
 0x8b6   : > { %6830 = vst [vmem:[#allocation11_spill] sm:$0xff] %v6271_v18  ;;  %v6275_v20 = vpop.permute.xlu1 %2695 }
 0x8b7   : > { %6832 = vst [vmem:[#allocation13_spill] sm:$0xff] %v6275_v20 }
 0x8ba   : > { %3037 = vrot.lane.b32.xlu2 %v2594_v8, %s6824_s22 }
 0x8bb   : > { %2874 = vrot.lane.b32.xlu0 %v6231_v1, %s6819_s27 }
 0x8bc   : > { %2699 = vrot.lane.b32.xlu1 %v6103_v29, %s4750_s23  ;;  %v6293_v28 = vpop.permute.xlu2 %2842  ;;  %v4625_v29 = vld [vmem:[%s6796_s13 + $0x40] sm:$0xff] }
 0x8bd   : > { %v6291_v25 = vpop.permute.xlu0 %2872  ;;  %6834 = vst [vmem:[#allocation15_spill] sm:$0xff] %v6293_v28  ;;  %3169 = vmatpush.msrb.mxu0 %v4625_v29 }
 0x8be   : > { %6833 = vst [vmem:[#allocation14_spill] sm:$0xff] %v6291_v25  ;;  %v6295_v6 = vpop.permute.xlu1 %2896 }
 0x8bf   : > { %6835 = vst [vmem:[#allocation16_spill] sm:$0xff] %v6295_v6 }
 0x8c2   : > { %2840 = vrot.lane.b32.xlu2 %v6247_v9, %s6824_s22 }
 0x8c3   : > { %2667 = vrot.lane.b32.xlu0 %v6095_v47, %s6819_s27 }
 0x8c4   : > { %2898 = vrot.lane.b32.xlu1 %v6247_v9, %s4750_s23  ;;  %v6311_v35 = vpop.permute.xlu2 %3089 }
 0x8c5   : > { %v6309_v34 = vpop.permute.xlu0 %3255  ;;  %6837 = vst [vmem:[#allocation18_spill] sm:$0xff] %v6311_v35 }
 0x8c6   : > { %6836 = vst [vmem:[#allocation17_spill] sm:$0xff] %v6309_v34  ;;  %v6313_v36 = vpop.permute.xlu1 %2633 }
 0x8c7   : > { %6838 = vst [vmem:[#allocation19_spill] sm:$0xff] %v6313_v36 }
 0x8ca   : > { %3087 = vrot.lane.b32.xlu2 %v2594_v8, %s4750_s23 }
 0x8cb   : > { %2876 = vrot.lane.b32.xlu0 %v6097_v48, %s6819_s27 }
 0x8cc   : > { %2900 = vrot.lane.b32.xlu1 %v6095_v47, %s4750_s23  ;;  %v3212_v41 = vpop.permute.xlu2 %3211 }
 0x8cd   : > { %v6320_v39 = vpop.permute.xlu0 %3065  ;;  %v3291_v45 = vsel %vm495_vm0, %v6122_v59, %v3212_v41 }
 0x8ce   : > { %6839 = vst [vmem:[#allocation20_spill] sm:$0xff] %v6320_v39  ;;  %v6322_v43 = vpop.permute.xlu1 %3279  ;;  %v3299_v54 = vsel %vm877_vm5, %v3291_v45, %v6124_v55  ;;  %v6343_v55 = vld [vmem:[#allocation5 + $0x80] sm:$0xff] }
 0x8cf   : > { %6840 = vst [vmem:[#allocation21_spill] sm:$0xff] %v6322_v43  ;;  %v3307_v8 = vsel %vm895_vm7, %v3299_v54, %v6132_v57  ;;  %v3292_v57 = vsel %vm495_vm0, %v6011_v52, %v6136_v38 }
 0x8d0   : > { %4641 = vmatmul.msk.f32.vlgmr.msra.gmra.mxu2 %vm913_vm9, %v3307_v8 }
 0x8d2   : > { %v2782_v12 = vpop.f32.mrf.mxu3  ;;  %3223 = vrot.lane.b32.xlu2 %v6338_v21, %s6824_s22 }
 0x8d3   : > { %v2783_v22 = vadd.f32 %v6331_v5, %v2782_v12  ;;  %3257 = vrot.lane.b32.xlu0 %v6336_v16, %s6819_s27 }
 0x8d4   : > { %v2980_v24 = vpop.f32.mrf.mxu1  ;;  %2635 = vrot.lane.b32.xlu1 %v6343_v55, %s6824_s22  ;;  %v3030_v29 = vpop.permute.xlu2 %3029 }
 0x8d5   : > { %v3246_v30 = vpop.permute.xlu0 %3245  ;;  %v3393_v41 = vrot.slane %v2783_v22, 1  ;;  %v3394_v45 = vrot.slane %v2783_v22, 2  ;;  %v3395_v54 = vrot.slane %v2783_v22, 3  ;;  %v2981_v8 = vadd.f32 %v6331_v5, %v2980_v24 }
 0x8d6   : > { %v2624_v12 = vpop.permute.xlu1 %2623  ;;  %v3396_v35 = vrot.slane %v2783_v22, 4  ;;  %v3397_v39 = vrot.slane %v2783_v22, 5  ;;  %v3398_v28 = vrot.slane %v2783_v22, 6  ;;  %v3101_v43 = vsel %vm495_vm0, %v6142_v15, %v3030_v29 }
 0x8d7   : > { %v3513_v34 = vrot.slane %v2981_v8, 1  ;;  %v3514_v16 = vrot.slane %v2981_v8, 2  ;;  %v3515_v36 = vrot.slane %v2981_v8, 3  ;;  %v3516_v47 = vrot.slane %v2981_v8, 4 }
 0x8d8   : > { %v3517_v19 = vrot.slane %v2981_v8, 5  ;;  %v3518_v38 = vrot.slane %v2981_v8, 6  ;;  %v3519_v6 = vrot.slane %v2981_v8, 7  ;;  %v3569_v25 = vperm.slane %v2981_v8, 0 }
 0x8d9   : > { %v3570_v48 = vperm.slane %v3513_v34, 0  ;;  %v3571_v14 = vperm.slane %v3514_v16, 0  ;;  %v3572_v20 = vperm.slane %v3515_v36, 0  ;;  %v3573_v26 = vperm.slane %v3516_v47, 0 }
 0x8da   : > { %v3574_v24 = vperm.slane %v3517_v19, 0  ;;  %v3575_v5 = vperm.slane %v3518_v38, 0  ;;  %v3697_v18 = vsel %vm1113_vm12, %v2783_v22, %v3569_v25  ;;  %v2710_v13 = vsel %vm495_vm0, %v6142_v15, %v2624_v12  ;;  %3041 = vrot.lane.b32.xlu2 %v6343_v55, %s6824_s22 }
 0x8db   : > { %3067 = vrot.lane.b32.xlu0 %v6338_v21, %s6819_s27  ;;  %v3576_v29 = vperm.slane %v3519_v6, 0  ;;  %v3698_v8 = vsel %vm1113_vm12, %v3393_v41, %v3570_v48  ;;  %v3699_v34 = vsel %vm1113_vm12, %v3394_v45, %v3571_v14  ;;  %v3700_v47 = vsel %vm1113_vm12, %v3395_v54, %v3572_v20  ;;  %4265 = vst [vmem:[#allocation1] ss:$4 sm:$0xff] %v3697_v18  ;;  %s4652_s27 = sshll.u32 %s6862_s19, 8 }
 0x8dc   : > { %v3701_v19 = vsel %vm1113_vm12, %v3396_v35, %v3573_v26  ;;  %v3702_v25 = vsel %vm1113_vm12, %v3397_v39, %v3574_v24  ;;  %4267 = vst [vmem:[#allocation1 + $0x1] ss:$4 sm:$0xff] %v3698_v8  ;;  %v3300_v15 = vsel %vm877_vm5, %v3292_v57, %v3246_v30  ;;  %v3109_v36 = vsel %vm877_vm5, %v3101_v43, %v6144_v11  ;;  %v2833_v12 = vpop.permute.xlu2 %2832  ;;  %s6397_s25 = scalar_lea.vmem %s6798_s15, %s4652_s27  ;;  %v3020_v8 = vld [vmem:[#allocation5 + $0x90] sm:$0xff] }
 0x8dd   : > { %v3056_v16 = vpop.permute.xlu0 %3055  ;;  %v3399_v6 = vrot.slane %v2783_v22, 7  ;;  %v3703_v48 = vsel %vm1113_vm12, %v3398_v28, %v3575_v5  ;;  %4269 = vst [vmem:[#allocation1 + $0x2] ss:$4 sm:$0xff] %v3699_v34  ;;  %v2718_v14 = vsel %vm877_vm5, %v2710_v13, %v6156_v7  ;;  %v3117_v26 = vsel %vm895_vm7, %v3109_v36, %v6118_v27  ;;  %3281 = vrot.lane.b32.xlu1 %v6338_v21, %s4750_s23 }
 0x8de   : > { %v3270_v18 = vpop.permute.xlu1 %3269  ;;  %4271 = vst [vmem:[#allocation1 + $0x3] ss:$4 sm:$0xff] %v3700_v47  ;;  %v2726_v11 = vsel %vm895_vm7, %v2718_v14, %v6150_v0  ;;  %4629 = vmatmul.msk.f32.vlgmr.msrb.gmra.mxu0 %vm913_vm9, %v3117_v26  ;;  %v2911_v20 = vsel %vm495_vm0, %v6122_v59, %v2833_v12  ;;  %v3102_v59 = vsel %vm495_vm0, %v6004_v49, %v6154_v23 }
 0x8df   : > { %v3308_v28 = vsel %vm895_vm7, %v3300_v15, %v3270_v18  ;;  %v3704_v7 = vsel %vm1113_vm12, %v3399_v6, %v3576_v29  ;;  %4273 = vst [vmem:[#allocation1 + $0x20] ss:$4 sm:$0xff] %v3701_v19  ;;  %4606 = vmatmul.msk.f32.gmra.mxu3 %vm913_vm9, %v2726_v11  ;;  %v2919_v27 = vsel %vm877_vm5, %v2911_v20, %v6173_v44 }
 0x8e0   : > { %4642 = vmatmul.msk.f32.gmra.mxu2 %vm913_vm9, %v3308_v28  ;;  %4275 = vst [vmem:[#allocation1 + $0x21] ss:$4 sm:$0xff] %v3702_v25  ;;  %v2927_v0 = vsel %vm895_vm7, %v2919_v27, %v6167_v42  ;;  %v2711_v42 = vsel %vm495_vm0, %v6004_v49, %v6182_v50  ;;  %v3110_v44 = vsel %vm877_vm5, %v3102_v59, %v3056_v16  ;;  %v6415_v49 = vld [vmem:[#allocation5 + $0x91] sm:$0xff] }
 0x8e1   : > { %4277 = vst [vmem:[#allocation1 + $0x22] ss:$4 sm:$0xff] %v3703_v48  ;;  %4618 = vmatmul.msk.f32.gmra.mxu1 %vm913_vm9, %v2927_v0 }
 0x8e2   : > { %4279 = vst [vmem:[#allocation1 + $0x23] ss:$4 sm:$0xff] %v3704_v7  ;;  %2844 = vrot.lane.b32.xlu2 %v6338_v21, %s6824_s22 }
 0x8e4   : > { %v3080_v35 = vpop.permute.xlu2 %3079 }
 0x8e5   : > { %v2658_v13 = vpop.permute.xlu0 %2657  ;;  %v4280_v39 = vld.sshfl [vmem:[#allocation1] sm:$0xff pattern:$0x73625140]  ;;  %3091 = vrot.lane.b32.xlu1 %v6343_v55, %s4750_s23  ;;  %v3118_v22 = vsel %vm895_vm7, %v3110_v44, %v3080_v35  ;;  %v2912_v55 = vsel %vm495_vm0, %v6011_v52, %v6171_v10  ;;  %v6843_v35 = vld [vmem:[#allocation9_spill] sm:$0xff] }
 0x8e6   : > { %v2719_v43 = vsel %vm877_vm5, %v2711_v42, %v2658_v13  ;;  %v2690_v5 = vpop.permute.xlu1 %2689  ;;  %4464 = vst.msk [vmem:[%s6397_s25] sm:$0xff] %vm851_vm3, %v4280_v39  ;;  %4630 = vmatmul.msk.f32.gmra.mxu0 %vm913_vm9, %v3118_v22  ;;  %v6846_v22 = vld [vmem:[#allocation13_spill] sm:$0xff] }
 0x8e7   : > { %v2727_v23 = vsel %vm895_vm7, %v2719_v43, %v2690_v5  ;;  %v6845_v5 = vld [vmem:[#allocation8_spill] sm:$0xff] }
 0x8e8   : > { %4607 = vmatmul.msk.f32.gmra.mxu3 %vm913_vm9, %v2727_v23 }
 0x8e9   : > { %v4281_v50 = vld.sshfl [vmem:[#allocation1 + $0x20] sm:$0xff pattern:$0x73625140] }
 0x8ea   : > { %4465 = vst.msk [vmem:[%s6397_s25 + $0x8] sm:$0xff] %vm851_vm3, %v4281_v50  ;;  %3225 = vrot.lane.b32.xlu2 %v6415_v49, %s6824_s22  ;;  %v6847_v50 = vld [vmem:[#allocation10_spill] sm:$0xff] }
 0x8ec   : > { %v3216_v30 = vpop.permute.xlu2 %3215 }
 0x8ed   : > { %v2867_v57 = vpop.permute.xlu0 %2866  ;;  %v3293_v54 = vsel %vm495_vm0, %v6184_v51, %v3216_v30 }
 0x8ee   : > { %v2920_v41 = vsel %vm877_vm5, %v2912_v55, %v2867_v57  ;;  %v2891_v45 = vpop.permute.xlu1 %2890  ;;  %v3301_v24 = vsel %vm877_vm5, %v3293_v54, %v6186_v53  ;;  %v6848_v55 = vld [vmem:[#allocation7_spill] sm:$0xff] }
 0x8ef   : > { %v2928_v38 = vsel %vm895_vm7, %v2920_v41, %v2891_v45  ;;  %v3309_v29 = vsel %vm895_vm7, %v3301_v24, %v6195_v63  ;;  %v6849_v24 = vld [vmem:[#allocation14_spill] sm:$0xff] }
 0x8f0   : > { %4619 = vmatmul.msk.f32.gmra.mxu1 %vm913_vm9, %v2928_v38  ;;  %4643 = vmatmul.msk.f32.gmra.mxu2 %vm913_vm9, %v3309_v29 }
 0x8f2   : > { %3043 = vrot.lane.b32.xlu2 %v3020_v8, %s6824_s22  ;;  %v6850_v8 = vld [vmem:[#allocation16_spill] sm:$0xff] }
 0x8f4   : > { %v3034_v10 = vpop.permute.xlu2 %3033 }
 0x8f5   : > { %v3250_v52 = vpop.permute.xlu0 %3249  ;;  %v3103_v47 = vsel %vm495_vm0, %v6197_v46, %v3034_v10  ;;  %v6851_v10 = vld [vmem:[#allocation12_spill] sm:$0xff] }
 0x8f6   : > { %v2628_v34 = vpop.permute.xlu1 %2627  ;;  %v3111_v53 = vsel %vm877_vm5, %v3103_v47, %v6199_v17 }
 0x8f7   : > { %v2712_v19 = vsel %vm495_vm0, %v6197_v46, %v2628_v34  ;;  %v3119_v25 = vsel %vm895_vm7, %v3111_v53, %v6193_v56  ;;  %v3294_v46 = vsel %vm495_vm0, %v6062_v33, %v6207_v58  ;;  %v3104_v58 = vsel %vm495_vm0, %v6060_v32, %v6218_v61  ;;  %v6852_v34 = vld [vmem:[#allocation6_spill] sm:$0xff] }
 0x8f8   : > { %v2720_v63 = vsel %vm877_vm5, %v2712_v19, %v6209_v60  ;;  %4631 = vmatmul.msk.f32.gmra.mxu0 %vm913_vm9, %v3119_v25  ;;  %v3302_v17 = vsel %vm877_vm5, %v3294_v46, %v3250_v52  ;;  %v2914_v61 = vsel %vm495_vm0, %v6062_v33, %v6227_v37  ;;  %v3106_v47 = vsel %vm495_vm0, %v6852_v34, %v6851_v10  ;;  %v6853_v19 = vld [vmem:[#allocation19_spill] sm:$0xff] }
 0x8f9   : > { %v2728_v15 = vsel %vm895_vm7, %v2720_v63, %v6215_v31 }
 0x8fa   : > { %4608 = vmatmul.msk.f32.gmra.mxu3 %vm913_vm9, %v2728_v15 }
 0x8fc   : > { %v2837_v16 = vpop.permute.xlu2 %2836 }
 0x8fd   : > { %v3060_v36 = vpop.permute.xlu0 %3059  ;;  %v2913_v60 = vsel %vm495_vm0, %v6184_v51, %v2837_v16  ;;  %v2713_v51 = vsel %vm495_vm0, %v6060_v32, %v6242_v4 }
 0x8fe   : > { %v3274_v12 = vpop.permute.xlu1 %3273  ;;  %v2921_v31 = vsel %vm877_vm5, %v2913_v60, %v6225_v40  ;;  %v3112_v48 = vsel %vm877_vm5, %v3104_v58, %v3060_v36 }
 0x8ff   : > { %v3310_v56 = vsel %vm895_vm7, %v3302_v17, %v3274_v12  ;;  %v2929_v6 = vsel %vm895_vm7, %v2921_v31, %v6229_v62 }
 0x900   : > { %4644 = vmatmul.msk.f32.gmra.mxu2 %vm913_vm9, %v3310_v56  ;;  %4620 = vmatmul.msk.f32.gmra.mxu1 %vm913_vm9, %v2929_v6  ;;  %v6854_v56 = vld [vmem:[#allocation23_spill] sm:$0xff]  ;;  %v6855_v6 = vld [vmem:[#allocation17_spill] sm:$0xff] }
 0x904   : > { %v3084_v26 = vpop.permute.xlu2 %3083 }
 0x905   : > { %v2662_v14 = vpop.permute.xlu0 %2661  ;;  %v3120_v11 = vsel %vm895_vm7, %v3112_v48, %v3084_v26 }
 0x906   : > { %v2721_v40 = vsel %vm877_vm5, %v2713_v51, %v2662_v14  ;;  %v2694_v18 = vpop.permute.xlu1 %2693  ;;  %4632 = vmatmul.msk.f32.gmra.mxu0 %vm913_vm9, %v3120_v11  ;;  %v6856_v51 = vld [vmem:[#allocation21_spill] sm:$0xff]  ;;  %v6857_v14 = vld [vmem:[#allocation15_spill] sm:$0xff] }
 0x907   : > { %v2729_v62 = vsel %vm895_vm7, %v2721_v40, %v2694_v18  ;;  %v2916_v26 = vsel %vm495_vm0, %v6848_v55, %v6857_v14 }
 0x908   : > { %4609 = vmatmul.msk.f32.gmra.mxu3 %vm913_vm9, %v2729_v62 }
 0x90c   : > { %v3220_v4 = vpop.permute.xlu2 %3219 }
 0x90d   : > { %v2871_v32 = vpop.permute.xlu0 %2870  ;;  %v3295_v7 = vsel %vm495_vm0, %v6231_v1, %v3220_v4  ;;  %v6858_v4 = vld [vmem:[#allocation20_spill] sm:$0xff] }
 0x90e   : > { %v2922_v20 = vsel %vm877_vm5, %v2914_v61, %v2871_v32  ;;  %v2895_v28 = vpop.permute.xlu1 %2894  ;;  %v3303_v0 = vsel %vm877_vm5, %v3295_v7, %v6238_v3  ;;  %v6844_v3 = vld [vmem:[#allocation11_spill] sm:$0xff] }
 0x90f   : > { %v2930_v27 = vsel %vm895_vm7, %v2922_v20, %v2895_v28  ;;  %v3311_v59 = vsel %vm895_vm7, %v3303_v0, %v6261_v2  ;;  %v6859_v28 = vld [vmem:[#allocation18_spill] sm:$0xff] }
 0x910   : > { %4621 = vmatmul.msk.f32.gmra.mxu1 %vm913_vm9, %v2930_v27  ;;  %4645 = vmatmul.msk.f32.gmra.mxu2 %vm913_vm9, %v3311_v59 }
 0x914   : > { %v3038_v37 = vpop.permute.xlu2 %3037 }
 0x915   : > { %v3254_v33 = vpop.permute.xlu0 %3253  ;;  %v3105_v44 = vsel %vm495_vm0, %v6247_v9, %v3038_v37 }
 0x916   : > { %v2632_v42 = vpop.permute.xlu1 %2631  ;;  %v3113_v39 = vsel %vm877_vm5, %v3105_v44, %v6843_v35 }
 0x917   : > { %v2714_v13 = vsel %vm495_vm0, %v6247_v9, %v2632_v42  ;;  %v3121_v2 = vsel %vm895_vm7, %v3113_v39, %v6845_v5  ;;  %v3296_v9 = vsel %vm495_vm0, %v6848_v55, %v6847_v50 }
 0x918   : > { %v2722_v43 = vsel %vm877_vm5, %v2714_v13, %v6844_v3  ;;  %4633 = vmatmul.msk.f32.gmra.mxu0 %vm913_vm9, %v3121_v2  ;;  %v3304_v41 = vsel %vm877_vm5, %v3296_v9, %v3254_v33  ;;  %v6860_v9 = vld [vmem:[#allocation22_spill] sm:$0xff] }
 0x919   : > { %v2730_v23 = vsel %vm895_vm7, %v2722_v43, %v6846_v22  ;;  %v3202_v43 = vld [vmem:[#allocation5 + $0x92] sm:$0xff] }
 0x91a   : > { %4610 = vmatmul.msk.f32.gmra.mxu3 %vm913_vm9, %v2730_v23 }
 0x91c   : > { %v2841_v30 = vpop.permute.xlu2 %2840 }
 0x91d   : > { %v3064_v57 = vpop.permute.xlu0 %3063  ;;  %v2915_v54 = vsel %vm495_vm0, %v6231_v1, %v2841_v30  ;;  %v2715_v1 = vsel %vm495_vm0, %v6852_v34, %v6853_v19 }
 0x91e   : > { %v3278_v45 = vpop.permute.xlu1 %3277  ;;  %v2923_v29 = vsel %vm877_vm5, %v2915_v54, %v6849_v24  ;;  %v3114_v53 = vsel %vm877_vm5, %v3106_v47, %v3064_v57 }
 0x91f   : > { %v3312_v38 = vsel %vm895_vm7, %v3304_v41, %v3278_v45  ;;  %v2931_v52 = vsel %vm895_vm7, %v2923_v29, %v6850_v8 }
 0x920   : > { %4646 = vmatmul.msk.f32.gmra.mxu2 %vm913_vm9, %v3312_v38  ;;  %4622 = vmatmul.msk.f32.gmra.mxu1 %vm913_vm9, %v2931_v52 }
 0x924   : > { %v3088_v25 = vpop.permute.xlu2 %3087 }
 0x925   : > { %v2666_v63 = vpop.permute.xlu0 %2665  ;;  %v3122_v36 = vsel %vm895_vm7, %v3114_v53, %v3088_v25 }
 0x926   : > { %v2723_v15 = vsel %vm877_vm5, %v2715_v1, %v2666_v63  ;;  %v2698_v46 = vpop.permute.xlu1 %2697  ;;  %4634 = vmatmul.msk.f32.gmra.mxu0 %vm913_vm9, %v3122_v36 }
 0x927   : > { %v2731_v16 = vsel %vm895_vm7, %v2723_v15, %v2698_v46 }
 0x928   : > { %4611 = vmatmul.msk.f32.gmra.mxu3 %vm913_vm9, %v2731_v16 }
 0x92c   : > { %v3224_v12 = vpop.permute.xlu2 %3223 }
 0x92d   : > { %v2875_v17 = vpop.permute.xlu0 %2874  ;;  %v3297_v31 = vsel %vm495_vm0, %v6854_v56, %v3224_v12 }
 0x92e   : > { %v2700_v60 = vpop.permute.xlu1 %2699  ;;  %v3305_v58 = vsel %vm877_vm5, %v3297_v31, %v6855_v6  ;;  %v2924_v11 = vsel %vm877_vm5, %v2916_v26, %v2875_v17 }
 0x92f   : > { %v3313_v48 = vsel %vm895_vm7, %v3305_v58, %v6856_v51 }
 0x930   : > { %4647 = vmatmul.msk.f32.gmra.mxu2 %vm913_vm9, %v3313_v48 }
 0x934   : > { %v3042_v18 = vpop.permute.xlu2 %3041 }
 0x935   : > { %v2668_v40 = vpop.permute.xlu0 %2667  ;;  %v3107_v61 = vsel %vm495_vm0, %v6338_v21, %v3042_v18 }
 0x936   : > { %v2899_v62 = vpop.permute.xlu1 %2898  ;;  %v3115_v20 = vsel %vm877_vm5, %v3107_v61, %v6858_v4 }
 0x937   : > { %v2932_v32 = vsel %vm895_vm7, %v2924_v11, %v2899_v62  ;;  %v3123_v7 = vsel %vm895_vm7, %v3115_v20, %v6859_v28 }
 0x938   : > { %4623 = vmatmul.msk.f32.gmra.mxu1 %vm913_vm9, %v2932_v32  ;;  %4635 = vmatmul.msk.f32.gmra.mxu0 %vm913_vm9, %v3123_v7 }
 0x93c   : > { %v2845_v0 = vpop.permute.xlu2 %2844 }
 0x93d   : > { %v2877_v27 = vpop.permute.xlu0 %2876  ;;  %v2917_v33 = vsel %vm495_vm0, %v6854_v56, %v2845_v0 }
 0x93e   : > { %v2901_v59 = vpop.permute.xlu1 %2900  ;;  %v2925_v37 = vsel %vm877_vm5, %v2917_v33, %v2877_v27 }
 0x93f   : > { %v2933_v42 = vsel %vm895_vm7, %v2925_v37, %v2901_v59 }
 0x940   : > { %4624 = vmatmul.msk.f32.gmra.mxu1 %vm913_vm9, %v2933_v42 }
 0x944   : > { %v3226_v39 = vpop.permute.xlu2 %3225 }
 0x945   : > { %v3258_v5 = vpop.permute.xlu0 %3257  ;;  %v3298_v2 = vsel %vm495_vm0, %v3202_v43, %v3226_v39 }
 0x946   : > { %v2636_v44 = vpop.permute.xlu1 %2635  ;;  %v3306_v23 = vsel %vm877_vm5, %v3298_v2, %v3258_v5 }
 0x947   : > { %v2716_v13 = vsel %vm495_vm0, %v6338_v21, %v2636_v44 }
 0x948   : > { %v2724_v35 = vsel %vm877_vm5, %v2716_v13, %v2668_v40 }
 0x949   : > { %v2732_v3 = vsel %vm895_vm7, %v2724_v35, %v2700_v60 }
 0x94a   : > { %4612 = vmatmul.msk.f32.gmra.mxu3 %vm913_vm9, %v2732_v3 }
 0x94c   : > { %v3044_v55 = vpop.permute.xlu2 %3043 }
 0x94d   : > { %v3068_v30 = vpop.permute.xlu0 %3067  ;;  %v3108_v41 = vsel %vm495_vm0, %v6415_v49, %v3044_v55 }
 0x94e   : > { %v3116_v29 = vsel %vm877_vm5, %v3108_v41, %v3068_v30 }
 0x94f   : > { %v3282_v22 = vpop.permute.xlu1 %3281 }
 0x950   : > { %v3314_v50 = vsel %vm895_vm7, %v3306_v23, %v3282_v22 }
 0x951   : > { %4648 = vmatmul.msk.f32.gmra.mxu2 %vm913_vm9, %v3314_v50 }
 0x953   : > { %v3361_v21 = vpop.f32.mrf.mxu2 }
 0x954   : > { %v3362_v57 = vadd.f32 %v6860_v9, %v3361_v21 }
 0x956   : > { %v3889_v54 = vrot.slane %v3362_v57, 1  ;;  %v3890_v38 = vrot.slane %v3362_v57, 2  ;;  %v3891_v24 = vrot.slane %v3362_v57, 3  ;;  %v3892_v8 = vrot.slane %v3362_v57, 4 }
 0x957   : > { %v3092_v45 = vpop.permute.xlu1 %3091  ;;  %v3893_v52 = vrot.slane %v3362_v57, 5  ;;  %v3894_v10 = vrot.slane %v3362_v57, 6  ;;  %v3895_v47 = vrot.slane %v3362_v57, 7  ;;  %v3945_v19 = vperm.slane %v3362_v57, 0 }
 0x958   : > { %v3124_v34 = vsel %vm895_vm7, %v3116_v29, %v3092_v45  ;;  %v3946_v53 = vperm.slane %v3889_v54, 0  ;;  %v3947_v63 = vperm.slane %v3890_v38, 0  ;;  %v3948_v25 = vperm.slane %v3891_v24, 0 }
 0x959   : > { %4636 = vmatmul.msk.f32.gmra.mxu0 %vm913_vm9, %v3124_v34  ;;  %v3949_v15 = vperm.slane %v3892_v8, 0  ;;  %v3950_v46 = vperm.slane %v3893_v52, 0  ;;  %v3951_v36 = vperm.slane %v3894_v10, 0  ;;  %v3952_v31 = vperm.slane %v3895_v47, 0 }
 0x95b   : > { %v3171_v1 = vpop.f32.mrf.mxu0 }
 0x95c   : > { %v3172_v49 = vadd.f32 %v6860_v9, %v3171_v1 }
 0x95e   : > { %v3769_v16 = vrot.slane %v3172_v49, 1  ;;  %v3770_v17 = vrot.slane %v3172_v49, 2  ;;  %v3771_v12 = vrot.slane %v3172_v49, 3  ;;  %v3772_v60 = vrot.slane %v3172_v49, 4  ;;  %v2983_v56 = vpop.f32.mrf.mxu1 }
 0x95f   : > { %v3773_v6 = vrot.slane %v3172_v49, 5  ;;  %v3774_v58 = vrot.slane %v3172_v49, 6  ;;  %v4073_v51 = vsel %vm1113_vm12, %v3172_v49, %v3945_v19  ;;  %v3775_v48 = vrot.slane %v3172_v49, 7 }
 0x960   : > { %v4074_v14 = vsel %vm1113_vm12, %v3769_v16, %v3946_v53  ;;  %v4075_v26 = vsel %vm1113_vm12, %v3770_v17, %v3947_v63  ;;  %v4076_v40 = vsel %vm1113_vm12, %v3771_v12, %v3948_v25  ;;  %4282 = vst [vmem:[#allocation1] ss:$4 sm:$0xff] %v4073_v51  ;;  %v4077_v18 = vsel %vm1113_vm12, %v3772_v60, %v3949_v15 }
 0x961   : > { %4283 = vst [vmem:[#allocation1 + $0x1] ss:$4 sm:$0xff] %v4074_v14  ;;  %v2984_v11 = vadd.f32 %v6860_v9, %v2983_v56  ;;  %v4078_v62 = vsel %vm1113_vm12, %v3773_v6, %v3950_v46  ;;  %v4079_v32 = vsel %vm1113_vm12, %v3774_v58, %v3951_v36  ;;  %v4080_v28 = vsel %vm1113_vm12, %v3775_v48, %v3952_v31 }
 0x962   : > { %4284 = vst [vmem:[#allocation1 + $0x2] ss:$4 sm:$0xff] %v4075_v26  ;;  %v2785_v61 = vpop.f32.mrf.mxu3 }
 0x963   : > { %4285 = vst [vmem:[#allocation1 + $0x3] ss:$4 sm:$0xff] %v4076_v40  ;;  %v3520_v4 = vrot.slane %v2984_v11, 1  ;;  %v3521_v20 = vrot.slane %v2984_v11, 2  ;;  %v2786_v7 = vadd.f32 %v6860_v9, %v2785_v61  ;;  %v3522_v27 = vrot.slane %v2984_v11, 3  ;;  %v3364_v23 = vpop.f32.mrf.mxu2  ;;  %v3174_v52 = vpop.f32.mrf.mxu0 }
 0x964   : > { %4286 = vst [vmem:[#allocation1 + $0x20] ss:$4 sm:$0xff] %v4077_v18  ;;  %v3523_v0 = vrot.slane %v2984_v11, 4  ;;  %v3577_v59 = vperm.slane %v2984_v11, 0  ;;  %v3524_v33 = vrot.slane %v2984_v11, 5  ;;  %v3525_v13 = vrot.slane %v2984_v11, 6 }
 0x965   : > { %4287 = vst [vmem:[#allocation1 + $0x21] ss:$4 sm:$0xff] %v4078_v62  ;;  %v3578_v37 = vperm.slane %v3520_v4, 0  ;;  %v3579_v42 = vperm.slane %v3521_v20, 0  ;;  %v3400_v44 = vrot.slane %v2786_v7, 1  ;;  %v3401_v35 = vrot.slane %v2786_v7, 2 }
 0x966   : > { %4288 = vst [vmem:[#allocation1 + $0x22] ss:$4 sm:$0xff] %v4079_v32  ;;  %v3526_v39 = vrot.slane %v2984_v11, 7  ;;  %v3580_v3 = vperm.slane %v3522_v27, 0  ;;  %v3705_v43 = vsel %vm1113_vm12, %v2786_v7, %v3577_v59  ;;  %v3581_v2 = vperm.slane %v3523_v0, 0 }
 0x967   : > { %4289 = vst [vmem:[#allocation1 + $0x23] ss:$4 sm:$0xff] %v4080_v28  ;;  %v3706_v22 = vsel %vm1113_vm12, %v3400_v44, %v3578_v37  ;;  %v3402_v50 = vrot.slane %v2786_v7, 3  ;;  %v3582_v55 = vperm.slane %v3524_v33, 0  ;;  %v3707_v21 = vsel %vm1113_vm12, %v3401_v35, %v3579_v42 }
 0x968   : > { %v3403_v57 = vrot.slane %v2786_v7, 4  ;;  %v3583_v30 = vperm.slane %v3525_v13, 0  ;;  %v3404_v41 = vrot.slane %v2786_v7, 5  ;;  %v3584_v45 = vperm.slane %v3526_v39, 0 }
 0x969   : > { %v3708_v54 = vsel %vm1113_vm12, %v3402_v50, %v3580_v3  ;;  %v3365_v38 = vadd.f32 %v6860_v9, %v3364_v23  ;;  %v3405_v29 = vrot.slane %v2786_v7, 6  ;;  %v3406_v10 = vrot.slane %v2786_v7, 7 }
 0x96a   : > { %v4290_v5 = vld.sshfl [vmem:[#allocation1] sm:$0xff pattern:$0x73625140]  ;;  %v3709_v8 = vsel %vm1113_vm12, %v3403_v57, %v3581_v2  ;;  %v3710_v34 = vsel %vm1113_vm12, %v3404_v41, %v3582_v55  ;;  %v3175_v53 = vadd.f32 %v6860_v9, %v3174_v52 }
 0x96b   : > { %4466 = vst.msk [vmem:[%s6397_s25 + $0x10] sm:$0xff] %vm851_vm3, %v4290_v5  ;;  %v3711_v47 = vsel %vm1113_vm12, %v3405_v29, %v3583_v30  ;;  %v3712_v19 = vsel %vm1113_vm12, %v3406_v10, %v3584_v45  ;;  %v3896_v1 = vrot.slane %v3365_v38, 1  ;;  %v3897_v63 = vrot.slane %v3365_v38, 2  ;;  %v2788_v28 = vpop.f32.mrf.mxu3 }
 0x96c   : > { %4292 = vst [vmem:[#allocation1] ss:$4 sm:$0xff] %v3705_v43  ;;  %v3898_v25 = vrot.slane %v3365_v38, 3  ;;  %v3953_v49 = vperm.slane %v3365_v38, 0  ;;  %v3899_v15 = vrot.slane %v3365_v38, 4  ;;  %v3776_v36 = vrot.slane %v3175_v53, 1 }
 0x96d   : > { %4293 = vst [vmem:[#allocation1 + $0x1] ss:$4 sm:$0xff] %v3706_v22  ;;  %v3954_v46 = vperm.slane %v3896_v1, 0  ;;  %v2986_v16 = vpop.f32.mrf.mxu1  ;;  %v3900_v17 = vrot.slane %v3365_v38, 5  ;;  %v3901_v12 = vrot.slane %v3365_v38, 6  ;;  %v3955_v60 = vperm.slane %v3897_v63, 0 }
 0x96e   : > { %v4291_v24 = vld.sshfl [vmem:[#allocation1 + $0x20] sm:$0xff pattern:$0x73625140]  ;;  %4294 = vst [vmem:[#allocation1 + $0x2] ss:$4 sm:$0xff] %v3707_v21  ;;  %v3777_v56 = vrot.slane %v3175_v53, 2  ;;  %v4081_v48 = vsel %vm1113_vm12, %v3175_v53, %v3953_v49  ;;  %v2987_v14 = vadd.f32 %v6860_v9, %v2986_v16  ;;  %v2789_v44 = vadd.f32 %v6860_v9, %v2788_v28 }
 0x96f   : > { %4467 = vst.msk [vmem:[%s6397_s25 + $0x18] sm:$0xff] %vm851_vm3, %v4291_v24  ;;  %v3902_v6 = vrot.slane %v3365_v38, 7  ;;  %v3956_v58 = vperm.slane %v3898_v25, 0  ;;  %v3778_v51 = vrot.slane %v3175_v53, 3  ;;  %v3957_v26 = vperm.slane %v3899_v15, 0 }
 0x970   : > { %4295 = vst [vmem:[#allocation1 + $0x3] ss:$4 sm:$0xff] %v3708_v54  ;;  %v3779_v40 = vrot.slane %v3175_v53, 4  ;;  %v4082_v18 = vsel %vm1113_vm12, %v3776_v36, %v3954_v46  ;;  %v3958_v11 = vperm.slane %v3900_v17, 0  ;;  %v3959_v62 = vperm.slane %v3901_v12, 0 }
 0x971   : > { %4296 = vst [vmem:[#allocation1 + $0x20] ss:$4 sm:$0xff] %v3709_v8  ;;  %v3780_v61 = vrot.slane %v3175_v53, 5  ;;  %v4083_v32 = vsel %vm1113_vm12, %v3777_v56, %v3955_v60  ;;  %v3781_v20 = vrot.slane %v3175_v53, 6  ;;  %v3960_v7 = vperm.slane %v3902_v6, 0 }
 0x972   : > { %4297 = vst [vmem:[#allocation1 + $0x21] ss:$4 sm:$0xff] %v3710_v34  ;;  %v3782_v27 = vrot.slane %v3175_v53, 7  ;;  %v4084_v0 = vsel %vm1113_vm12, %v3778_v51, %v3956_v58  ;;  %v3527_v59 = vrot.slane %v2987_v14, 1  ;;  %v4085_v33 = vsel %vm1113_vm12, %v3779_v40, %v3957_v26 }
 0x973   : > { %4298 = vst [vmem:[#allocation1 + $0x22] ss:$4 sm:$0xff] %v3711_v47  ;;  %v3528_v37 = vrot.slane %v2987_v14, 2  ;;  %v4086_v42 = vsel %vm1113_vm12, %v3780_v61, %v3958_v11  ;;  %v4087_v13 = vsel %vm1113_vm12, %v3781_v20, %v3959_v62  ;;  %v3529_v35 = vrot.slane %v2987_v14, 3  ;;  %v3367_v54 = vpop.f32.mrf.mxu2 }
 0x974   : > { %4299 = vst [vmem:[#allocation1 + $0x23] ss:$4 sm:$0xff] %v3712_v19  ;;  %v4088_v39 = vsel %vm1113_vm12, %v3782_v27, %v3960_v7  ;;  %v3530_v3 = vrot.slane %v2987_v14, 4  ;;  %v3586_v43 = vperm.slane %v3527_v59, 0  ;;  %v3531_v5 = vrot.slane %v2987_v14, 5 }
 0x975   : > { %v3585_v2 = vperm.slane %v2987_v14, 0  ;;  %v3587_v22 = vperm.slane %v3528_v37, 0  ;;  %v3407_v23 = vrot.slane %v2789_v44, 1  ;;  %v3532_v50 = vrot.slane %v2987_v14, 6  ;;  %v3177_v49 = vpop.f32.mrf.mxu0 }
 0x976   : > { %v3408_v55 = vrot.slane %v2789_v44, 2  ;;  %v3533_v21 = vrot.slane %v2987_v14, 7  ;;  %v3588_v57 = vperm.slane %v3529_v35, 0  ;;  %v3589_v41 = vperm.slane %v3530_v3, 0 }
 0x977   : > { %v4300_v31 = vld.sshfl [vmem:[#allocation1] sm:$0xff pattern:$0x73625140]  ;;  %v3714_v45 = vsel %vm1113_vm12, %v3407_v23, %v3586_v43  ;;  %v3409_v38 = vrot.slane %v2789_v44, 3  ;;  %v3590_v24 = vperm.slane %v3531_v5, 0  ;;  %v3713_v29 = vsel %vm1113_vm12, %v2789_v44, %v3585_v2 }
 0x978   : > { %4468 = vst.msk [vmem:[%s6397_s25 + $0x20] sm:$0xff] %vm851_vm3, %v4300_v31  ;;  %v3715_v8 = vsel %vm1113_vm12, %v3408_v55, %v3587_v22  ;;  %v3410_v52 = vrot.slane %v2789_v44, 4  ;;  %v3591_v10 = vperm.slane %v3532_v50, 0  ;;  %v3411_v34 = vrot.slane %v2789_v44, 5 }
 0x979   : > { %4302 = vst [vmem:[#allocation1] ss:$4 sm:$0xff] %v4081_v48  ;;  %v3592_v47 = vperm.slane %v3533_v21, 0  ;;  %v3716_v19 = vsel %vm1113_vm12, %v3409_v38, %v3588_v57  ;;  %v3368_v1 = vadd.f32 %v6860_v9, %v3367_v54  ;;  %v3412_v63 = vrot.slane %v2789_v44, 6 }
 0x97a   : > { %4303 = vst [vmem:[#allocation1 + $0x1] ss:$4 sm:$0xff] %v4082_v18  ;;  %v3717_v25 = vsel %vm1113_vm12, %v3410_v52, %v3589_v41  ;;  %v3413_v15 = vrot.slane %v2789_v44, 7  ;;  %v3718_v46 = vsel %vm1113_vm12, %v3411_v34, %v3590_v24  ;;  %v3178_v12 = vadd.f32 %v6860_v9, %v3177_v49 }
 0x97b   : > { %v4301_v4 = vld.sshfl [vmem:[#allocation1 + $0x20] sm:$0xff pattern:$0x73625140]  ;;  %4304 = vst [vmem:[#allocation1 + $0x2] ss:$4 sm:$0xff] %v4083_v32  ;;  %v3719_v36 = vsel %vm1113_vm12, %v3412_v63, %v3591_v10  ;;  %v3903_v17 = vrot.slane %v3368_v1, 1 }
 0x97c   : > { %4469 = vst.msk [vmem:[%s6397_s25 + $0x28] sm:$0xff] %vm851_vm3, %v4301_v4  ;;  %v3720_v16 = vsel %vm1113_vm12, %v3413_v15, %v3592_v47  ;;  %v3904_v60 = vrot.slane %v3368_v1, 2  ;;  %v3905_v56 = vrot.slane %v3368_v1, 3  ;;  %v3961_v31 = vperm.slane %v3368_v1, 0 }
 0x97d   : > { %4305 = vst [vmem:[#allocation1 + $0x3] ss:$4 sm:$0xff] %v4084_v0  ;;  %v3906_v6 = vrot.slane %v3368_v1, 4  ;;  %v3962_v58 = vperm.slane %v3903_v17, 0  ;;  %v3783_v51 = vrot.slane %v3178_v12, 1  ;;  %v2989_v48 = vpop.f32.mrf.mxu1  ;;  %v3907_v14 = vrot.slane %v3368_v1, 5 }
 0x97e   : > { %4306 = vst [vmem:[#allocation1 + $0x20] ss:$4 sm:$0xff] %v4085_v33  ;;  %v3908_v26 = vrot.slane %v3368_v1, 6  ;;  %v3963_v40 = vperm.slane %v3904_v60, 0  ;;  %v3784_v18 = vrot.slane %v3178_v12, 2  ;;  %v3909_v62 = vrot.slane %v3368_v1, 7 }
 0x97f   : > { %4307 = vst [vmem:[#allocation1 + $0x21] ss:$4 sm:$0xff] %v4086_v42  ;;  %v3964_v61 = vperm.slane %v3905_v56, 0  ;;  %v3785_v32 = vrot.slane %v3178_v12, 3  ;;  %v4089_v4 = vsel %vm1113_vm12, %v3178_v12, %v3961_v31  ;;  %v2990_v20 = vadd.f32 %v6860_v9, %v2989_v48 }
 0x980   : > { %4308 = vst [vmem:[#allocation1 + $0x22] ss:$4 sm:$0xff] %v4087_v13  ;;  %v3965_v28 = vperm.slane %v3906_v6, 0  ;;  %v3786_v7 = vrot.slane %v3178_v12, 4  ;;  %v4090_v27 = vsel %vm1113_vm12, %v3783_v51, %v3962_v58  ;;  %v3966_v0 = vperm.slane %v3907_v14, 0  ;;  %v2791_v13 = vpop.f32.mrf.mxu3 }
 0x981   : > { %4309 = vst [vmem:[#allocation1 + $0x23] ss:$4 sm:$0xff] %v4088_v39  ;;  %v3967_v59 = vperm.slane %v3908_v26, 0  ;;  %v3787_v33 = vrot.slane %v3178_v12, 5  ;;  %v4091_v37 = vsel %vm1113_vm12, %v3784_v18, %v3963_v40  ;;  %v3788_v44 = vrot.slane %v3178_v12, 6 }
 0x982   : > { %v3968_v35 = vperm.slane %v3909_v62, 0  ;;  %v3789_v39 = vrot.slane %v3178_v12, 7  ;;  %v4092_v3 = vsel %vm1113_vm12, %v3785_v32, %v3964_v61  ;;  %v3534_v43 = vrot.slane %v2990_v20, 1 }
 0x983   : > { %v4093_v5 = vsel %vm1113_vm12, %v3786_v7, %v3965_v28  ;;  %v3535_v2 = vrot.slane %v2990_v20, 2  ;;  %v4094_v22 = vsel %vm1113_vm12, %v3787_v33, %v3966_v0  ;;  %v2792_v23 = vadd.f32 %v6860_v9, %v2791_v13  ;;  %v3180_v31 = vpop.f32.mrf.mxu0 }
 0x984   : > { %v4310_v30 = vld.sshfl [vmem:[#allocation1] sm:$0xff pattern:$0x73625140]  ;;  %v4095_v50 = vsel %vm1113_vm12, %v3788_v44, %v3967_v59  ;;  %v3536_v55 = vrot.slane %v2990_v20, 3  ;;  %v4096_v21 = vsel %vm1113_vm12, %v3789_v39, %v3968_v35  ;;  %v3537_v57 = vrot.slane %v2990_v20, 4 }
 0x985   : > { %4470 = vst.msk [vmem:[%s6397_s25 + $0x30] sm:$0xff] %vm851_vm3, %v4310_v30  ;;  %v3594_v30 = vperm.slane %v3534_v43, 0  ;;  %v3538_v41 = vrot.slane %v2990_v20, 5  ;;  %v3595_v54 = vperm.slane %v3535_v2, 0  ;;  %v3414_v38 = vrot.slane %v2792_v23, 1 }
 0x986   : > { %4312 = vst [vmem:[#allocation1] ss:$4 sm:$0xff] %v3713_v29  ;;  %v3539_v24 = vrot.slane %v2990_v20, 6  ;;  %v3415_v29 = vrot.slane %v2792_v23, 2  ;;  %v3596_v52 = vperm.slane %v3536_v55, 0  ;;  %v3597_v34 = vperm.slane %v3537_v57, 0 }
 0x987   : > { %4313 = vst [vmem:[#allocation1 + $0x1] ss:$4 sm:$0xff] %v3714_v45  ;;  %v3593_v45 = vperm.slane %v2990_v20, 0  ;;  %v3722_v47 = vsel %vm1113_vm12, %v3414_v38, %v3594_v30  ;;  %v3416_v1 = vrot.slane %v2792_v23, 3  ;;  %v3417_v49 = vrot.slane %v2792_v23, 4 }
 0x988   : > { %v4311_v53 = vld.sshfl [vmem:[#allocation1 + $0x20] sm:$0xff pattern:$0x73625140]  ;;  %4314 = vst [vmem:[#allocation1 + $0x2] ss:$4 sm:$0xff] %v3715_v8  ;;  %v3540_v8 = vrot.slane %v2990_v20, 7  ;;  %v3181_v26 = vadd.f32 %v6860_v9, %v3180_v31 }
 0x989   : > { %4471 = vst.msk [vmem:[%s6397_s25 + $0x38] sm:$0xff] %vm851_vm3, %v4311_v53  ;;  %v3598_v53 = vperm.slane %v3538_v41, 0  ;;  %v3721_v63 = vsel %vm1113_vm12, %v2792_v23, %v3593_v45  ;;  %v3599_v15 = vperm.slane %v3539_v24, 0  ;;  %v3419_v60 = vrot.slane %v2792_v23, 6 }
 0x98a   : > { %4315 = vst [vmem:[#allocation1 + $0x3] ss:$4 sm:$0xff] %v3716_v19  ;;  %v3370_v19 = vpop.f32.mrf.mxu2  ;;  %v3725_v56 = vsel %vm1113_vm12, %v3417_v49, %v3597_v34  ;;  %v3420_v6 = vrot.slane %v2792_v23, 7  ;;  %v3790_v32 = vrot.slane %v3181_v26, 1  ;;  %v3792_v33 = vrot.slane %v3181_v26, 3 }
 0x98b   : > { %4316 = vst [vmem:[#allocation1 + $0x20] ss:$4 sm:$0xff] %v3717_v25  ;;  %v3723_v25 = vsel %vm1113_vm12, %v3415_v29, %v3595_v54  ;;  %v3371_v17 = vadd.f32 %v6860_v9, %v3370_v19  ;;  %v3727_v51 = vsel %vm1113_vm12, %v3419_v60, %v3599_v15  ;;  %v3793_v35 = vrot.slane %v3181_v26, 4 }
 0x98c   : > { %4317 = vst [vmem:[#allocation1 + $0x21] ss:$4 sm:$0xff] %v3718_v46  ;;  %v3418_v46 = vrot.slane %v2792_v23, 5  ;;  %v3795_v23 = vrot.slane %v3181_v26, 6 }
 0x98d   : > { %4318 = vst [vmem:[#allocation1 + $0x22] ss:$4 sm:$0xff] %v3719_v36  ;;  %v3600_v36 = vperm.slane %v3540_v8, 0  ;;  %v3910_v14 = vrot.slane %v3371_v17, 1  ;;  %v3911_v40 = vrot.slane %v3371_v17, 2  ;;  %v3912_v18 = vrot.slane %v3371_v17, 3 }
 0x98e   : > { %4319 = vst [vmem:[#allocation1 + $0x23] ss:$4 sm:$0xff] %v3720_v16  ;;  %v3724_v16 = vsel %vm1113_vm12, %v3416_v1, %v3596_v52  ;;  %v3726_v58 = vsel %vm1113_vm12, %v3418_v46, %v3598_v53  ;;  %v3913_v62 = vrot.slane %v3371_v17, 4  ;;  %v3914_v20 = vrot.slane %v3371_v17, 5 }
 0x98f   : > { %v3728_v48 = vsel %vm1113_vm12, %v3420_v6, %v3600_v36  ;;  %v3970_v61 = vperm.slane %v3910_v14, 0  ;;  %v3915_v28 = vrot.slane %v3371_v17, 6  ;;  %v3971_v7 = vperm.slane %v3911_v40, 0 }
 0x990   : > { %v3916_v59 = vrot.slane %v3371_v17, 7  ;;  %v3972_v9 = vperm.slane %v3912_v18, 0  ;;  %v3973_v13 = vperm.slane %v3913_v62, 0 }
 0x991   : > { %v4320_v11 = vld.sshfl [vmem:[#allocation1] sm:$0xff pattern:$0x73625140]  ;;  %v4098_v39 = vsel %vm1113_vm12, %v3790_v32, %v3970_v61  ;;  %v3975_v43 = vperm.slane %v3915_v28, 0 }
 0x992   : > { %4472 = vst.msk [vmem:[%s6397_s25 + $0x40] sm:$0xff] %vm851_vm3, %v4320_v11  ;;  %v3969_v11 = vperm.slane %v3371_v17, 0  ;;  %v3976_v55 = vperm.slane %v3916_v59, 0  ;;  %v4100_v57 = vsel %vm1113_vm12, %v3792_v33, %v3972_v9  ;;  %v4101_v41 = vsel %vm1113_vm12, %v3793_v35, %v3973_v13 }
 0x993   : > { %4322 = vst [vmem:[#allocation1] ss:$4 sm:$0xff] %v4089_v4  ;;  %v2992_v4 = vpop.f32.mrf.mxu1  ;;  %v4103_v24 = vsel %vm1113_vm12, %v3795_v23, %v3975_v43 }
 0x994   : > { %4323 = vst [vmem:[#allocation1 + $0x1] ss:$4 sm:$0xff] %v4090_v27  ;;  %v3791_v27 = vrot.slane %v3181_v26, 2 }
 0x995   : > { %v4321_v42 = vld.sshfl [vmem:[#allocation1 + $0x20] sm:$0xff pattern:$0x73625140]  ;;  %4324 = vst [vmem:[#allocation1 + $0x2] ss:$4 sm:$0xff] %v4091_v37  ;;  %v4097_v37 = vsel %vm1113_vm12, %v3181_v26, %v3969_v11  ;;  %v3183_v11 = vpop.f32.mrf.mxu0 }
 0x996   : > { %4473 = vst.msk [vmem:[%s6397_s25 + $0x48] sm:$0xff] %vm851_vm3, %v4321_v42  ;;  %v6653_v42 = vld [vmem:[%s6797_s14] ss:$0 sm:$0xff]  ;;  %v4099_v2 = vsel %vm1113_vm12, %v3791_v27, %v3971_v7 }
 0x997   : > { %4325 = vst [vmem:[#allocation1 + $0x3] ss:$4 sm:$0xff] %v4092_v3  ;;  %v2993_v44 = vadd.f32 %v6653_v42, %v2992_v4  ;;  %v3974_v3 = vperm.slane %v3914_v20, 0  ;;  %v3184_v28 = vadd.f32 %v6653_v42, %v3183_v11 }
 0x998   : > { %4326 = vst [vmem:[#allocation1 + $0x20] ss:$4 sm:$0xff] %v4093_v5  ;;  %v3794_v5 = vrot.slane %v3181_v26, 5 }
 0x999   : > { %4327 = vst [vmem:[#allocation1 + $0x21] ss:$4 sm:$0xff] %v4094_v22  ;;  %v3541_v30 = vrot.slane %v2993_v44, 1  ;;  %v3542_v45 = vrot.slane %v2993_v44, 2  ;;  %v3543_v29 = vrot.slane %v2993_v44, 3  ;;  %v3544_v52 = vrot.slane %v2993_v44, 4 }
 0x99a   : > { %4328 = vst [vmem:[#allocation1 + $0x22] ss:$4 sm:$0xff] %v4095_v50  ;;  %v2794_v50 = vpop.f32.mrf.mxu3  ;;  %v4102_v54 = vsel %vm1113_vm12, %v3794_v5, %v3974_v3  ;;  %v3545_v34 = vrot.slane %v2993_v44, 5  ;;  %v3546_v53 = vrot.slane %v2993_v44, 6  ;;  %v3797_v33 = vrot.slane %v3184_v28, 1 }
 0x99b   : > { %4329 = vst [vmem:[#allocation1 + $0x23] ss:$4 sm:$0xff] %v4096_v21  ;;  %v3796_v21 = vrot.slane %v3181_v26, 7  ;;  %v2795_v38 = vadd.f32 %v6653_v42, %v2794_v50  ;;  %v3603_v19 = vperm.slane %v3542_v45, 0  ;;  %v3604_v49 = vperm.slane %v3543_v29, 0 }
 0x99c   : > { %v3605_v46 = vperm.slane %v3544_v52, 0  ;;  %v3607_v6 = vperm.slane %v3546_v53, 0 }
 0x99d   : > { %v4104_v8 = vsel %vm1113_vm12, %v3796_v21, %v3976_v55  ;;  %v3421_v1 = vrot.slane %v2795_v38, 1  ;;  %v3423_v17 = vrot.slane %v2795_v38, 3  ;;  %v3424_v31 = vrot.slane %v2795_v38, 4 }
 0x99e   : > { %v4330_v10 = vld.sshfl [vmem:[#allocation1] sm:$0xff pattern:$0x73625140]  ;;  %v3426_v40 = vrot.slane %v2795_v38, 6  ;;  %v3427_v62 = vrot.slane %v2795_v38, 7  ;;  %v3800_v55 = vrot.slane %v3184_v28, 4 }
 0x99f   : > { %4474 = vst.msk [vmem:[%s6397_s25 + $0x50] sm:$0xff] %vm851_vm3, %v4330_v10  ;;  %v3602_v10 = vperm.slane %v3541_v30, 0  ;;  %v3733_v18 = vsel %vm1113_vm12, %v3424_v31, %v3605_v46 }
 0x9a0   : > { %4332 = vst [vmem:[#allocation1] ss:$4 sm:$0xff] %v3721_v63  ;;  %v3422_v63 = vrot.slane %v2795_v38, 2  ;;  %v3735_v32 = vsel %vm1113_vm12, %v3426_v40, %v3607_v6 }
 0x9a1   : > { %4333 = vst [vmem:[#allocation1 + $0x1] ss:$4 sm:$0xff] %v3722_v47  ;;  %v3601_v47 = vperm.slane %v2993_v44, 0  ;;  %v3730_v36 = vsel %vm1113_vm12, %v3421_v1, %v3602_v10 }
 0x9a2   : > { %v4331_v12 = vld.sshfl [vmem:[#allocation1 + $0x20] sm:$0xff pattern:$0x73625140]  ;;  %4334 = vst [vmem:[#allocation1 + $0x2] ss:$4 sm:$0xff] %v3723_v25  ;;  %v3547_v25 = vrot.slane %v2993_v44, 7 }
 0x9a3   : > { %4475 = vst.msk [vmem:[%s6397_s25 + $0x58] sm:$0xff] %vm851_vm3, %v4331_v12  ;;  %v3606_v12 = vperm.slane %v3545_v34, 0  ;;  %v3729_v60 = vsel %vm1113_vm12, %v2795_v38, %v3601_v47 }
 0x9a4   : > { %4335 = vst [vmem:[#allocation1 + $0x3] ss:$4 sm:$0xff] %v3724_v16  ;;  %v3373_v16 = vpop.f32.mrf.mxu2 }
 0x9a5   : > { %4336 = vst [vmem:[#allocation1 + $0x20] ss:$4 sm:$0xff] %v3725_v56  ;;  %v3731_v56 = vsel %vm1113_vm12, %v3422_v63, %v3603_v19  ;;  %v3374_v14 = vadd.f32 %v6653_v42, %v3373_v16 }
 0x9a6   : > { %4337 = vst [vmem:[#allocation1 + $0x21] ss:$4 sm:$0xff] %v3726_v58  ;;  %v3425_v58 = vrot.slane %v2795_v38, 5  ;;  %v3802_v38 = vrot.slane %v3184_v28, 6 }
 0x9a7   : > { %4338 = vst [vmem:[#allocation1 + $0x22] ss:$4 sm:$0xff] %v3727_v51  ;;  %v3608_v51 = vperm.slane %v3547_v25, 0  ;;  %v3917_v20 = vrot.slane %v3374_v14, 1  ;;  %v3918_v7 = vrot.slane %v3374_v14, 2  ;;  %v3919_v27 = vrot.slane %v3374_v14, 3 }
 0x9a8   : > { %4339 = vst [vmem:[#allocation1 + $0x23] ss:$4 sm:$0xff] %v3728_v48  ;;  %v3732_v48 = vsel %vm1113_vm12, %v3423_v17, %v3604_v49  ;;  %v3734_v61 = vsel %vm1113_vm12, %v3425_v58, %v3606_v12  ;;  %v3920_v59 = vrot.slane %v3374_v14, 4  ;;  %v3921_v44 = vrot.slane %v3374_v14, 5 }
 0x9a9   : > { %v3736_v4 = vsel %vm1113_vm12, %v3427_v62, %v3608_v51  ;;  %v3978_v9 = vperm.slane %v3917_v20, 0  ;;  %v3922_v13 = vrot.slane %v3374_v14, 6  ;;  %v3979_v35 = vperm.slane %v3918_v7, 0 }
 0x9aa   : > { %v3923_v43 = vrot.slane %v3374_v14, 7  ;;  %v3980_v5 = vperm.slane %v3919_v27, 0  ;;  %v3981_v50 = vperm.slane %v3920_v59, 0 }
 0x9ab   : > { %v4340_v0 = vld.sshfl [vmem:[#allocation1] sm:$0xff pattern:$0x73625140]  ;;  %v4106_v21 = vsel %vm1113_vm12, %v3797_v33, %v3978_v9  ;;  %v3983_v30 = vperm.slane %v3922_v13, 0 }
 0x9ac   : > { %4476 = vst.msk [vmem:[%s6397_s25 + $0x60] sm:$0xff] %vm851_vm3, %v4340_v0  ;;  %v3977_v0 = vperm.slane %v3374_v14, 0  ;;  %v3984_v29 = vperm.slane %v3923_v43, 0  ;;  %v4109_v34 = vsel %vm1113_vm12, %v3800_v55, %v3981_v50 }
 0x9ad   : > { %4342 = vst [vmem:[#allocation1] ss:$4 sm:$0xff] %v4097_v37  ;;  %v2995_v37 = vpop.f32.mrf.mxu1  ;;  %v4111_v53 = vsel %vm1113_vm12, %v3802_v38, %v3983_v30 }
 0x9ae   : > { %4343 = vst [vmem:[#allocation1 + $0x1] ss:$4 sm:$0xff] %v4098_v39  ;;  %v3798_v39 = vrot.slane %v3184_v28, 2  ;;  %v2996_v23 = vadd.f32 %v6653_v42, %v2995_v37 }
 0x9af   : > { %v4341_v22 = vld.sshfl [vmem:[#allocation1 + $0x20] sm:$0xff pattern:$0x73625140]  ;;  %4344 = vst [vmem:[#allocation1 + $0x2] ss:$4 sm:$0xff] %v4099_v2  ;;  %v3799_v2 = vrot.slane %v3184_v28, 3 }
 0x9b0   : > { %4477 = vst.msk [vmem:[%s6397_s25 + $0x68] sm:$0xff] %vm851_vm3, %v4341_v22  ;;  %v4105_v22 = vsel %vm1113_vm12, %v3184_v28, %v3977_v0  ;;  %v4107_v45 = vsel %vm1113_vm12, %v3798_v39, %v3979_v35  ;;  %v3548_v10 = vrot.slane %v2996_v23, 1  ;;  %v3549_v47 = vrot.slane %v2996_v23, 2  ;;  %v3186_v0 = vpop.f32.mrf.mxu0 }
 0x9b1   : > { %4345 = vst [vmem:[#allocation1 + $0x3] ss:$4 sm:$0xff] %v4100_v57  ;;  %v3982_v57 = vperm.slane %v3921_v44, 0  ;;  %v4108_v52 = vsel %vm1113_vm12, %v3799_v2, %v3980_v5  ;;  %v3550_v63 = vrot.slane %v2996_v23, 3  ;;  %v3551_v49 = vrot.slane %v2996_v23, 4 }
 0x9b2   : > { %4346 = vst [vmem:[#allocation1 + $0x20] ss:$4 sm:$0xff] %v4101_v41  ;;  %v3801_v41 = vrot.slane %v3184_v28, 5  ;;  %v3552_v46 = vrot.slane %v2996_v23, 5  ;;  %v3611_v16 = vperm.slane %v3549_v47, 0  ;;  %v3553_v12 = vrot.slane %v2996_v23, 6 }
 0x9b3   : > { %4347 = vst [vmem:[#allocation1 + $0x21] ss:$4 sm:$0xff] %v4102_v54  ;;  %v3612_v31 = vperm.slane %v3550_v63, 0  ;;  %v3613_v58 = vperm.slane %v3551_v49, 0  ;;  %v3187_v13 = vadd.f32 %v6653_v42, %v3186_v0 }
 0x9b4   : > { %4348 = vst [vmem:[#allocation1 + $0x22] ss:$4 sm:$0xff] %v4103_v24  ;;  %v2797_v24 = vpop.f32.mrf.mxu3  ;;  %v4110_v19 = vsel %vm1113_vm12, %v3801_v41, %v3982_v57  ;;  %v3615_v62 = vperm.slane %v3553_v12, 0 }
 0x9b5   : > { %4349 = vst [vmem:[#allocation1 + $0x23] ss:$4 sm:$0xff] %v4104_v8  ;;  %v3803_v8 = vrot.slane %v3184_v28, 7  ;;  %v2798_v1 = vadd.f32 %v6653_v42, %v2797_v24  ;;  %v3804_v2 = vrot.slane %v3187_v13, 1 }
 0x9b7   : > { %v4112_v25 = vsel %vm1113_vm12, %v3803_v8, %v3984_v29  ;;  %v3428_v17 = vrot.slane %v2798_v1, 1  ;;  %v3430_v14 = vrot.slane %v2798_v1, 3  ;;  %v3431_v11 = vrot.slane %v2798_v1, 4 }
 0x9b8   : > { %v4350_v15 = vld.sshfl [vmem:[#allocation1] sm:$0xff pattern:$0x73625140]  ;;  %v3433_v7 = vrot.slane %v2798_v1, 6  ;;  %v3434_v59 = vrot.slane %v2798_v1, 7  ;;  %v3807_v29 = vrot.slane %v3187_v13, 4 }
 0x9b9   : > { %4478 = vst.msk [vmem:[%s6397_s25 + $0x70] sm:$0xff] %vm851_vm3, %v4350_v15  ;;  %v3610_v15 = vperm.slane %v3548_v10, 0  ;;  %v3741_v27 = vsel %vm1113_vm12, %v3431_v11, %v3613_v58 }
 0x9ba   : > { %4352 = vst [vmem:[#allocation1] ss:$4 sm:$0xff] %v3729_v60  ;;  %v3429_v60 = vrot.slane %v2798_v1, 2  ;;  %v3743_v33 = vsel %vm1113_vm12, %v3433_v7, %v3615_v62 }
 0x9bb   : > { %4353 = vst [vmem:[#allocation1 + $0x1] ss:$4 sm:$0xff] %v3730_v36  ;;  %v3609_v36 = vperm.slane %v2996_v23, 0  ;;  %v3738_v51 = vsel %vm1113_vm12, %v3428_v17, %v3610_v15 }
 0x9bc   : > { %v4351_v26 = vld.sshfl [vmem:[#allocation1 + $0x20] sm:$0xff pattern:$0x73625140]  ;;  %4354 = vst [vmem:[#allocation1 + $0x2] ss:$4 sm:$0xff] %v3731_v56  ;;  %v3554_v56 = vrot.slane %v2996_v23, 7 }
 0x9bd   : > { %4479 = vst.msk [vmem:[%s6397_s25 + $0x78] sm:$0xff] %vm851_vm3, %v4351_v26  ;;  %v3614_v26 = vperm.slane %v3552_v46, 0  ;;  %v3737_v40 = vsel %vm1113_vm12, %v2798_v1, %v3609_v36 }
 0x9be   : > { %4355 = vst [vmem:[#allocation1 + $0x3] ss:$4 sm:$0xff] %v3732_v48  ;;  %v3376_v48 = vpop.f32.mrf.mxu2 }
 0x9bf   : > { %4356 = vst [vmem:[#allocation1 + $0x20] ss:$4 sm:$0xff] %v3733_v18  ;;  %v3739_v18 = vsel %vm1113_vm12, %v3429_v60, %v3611_v16  ;;  %v3377_v20 = vadd.f32 %v6653_v42, %v3376_v48 }
 0x9c0   : > { %4357 = vst [vmem:[#allocation1 + $0x21] ss:$4 sm:$0xff] %v3734_v61  ;;  %v3432_v61 = vrot.slane %v2798_v1, 5  ;;  %v3809_v1 = vrot.slane %v3187_v13, 6 }
 0x9c1   : > { %4358 = vst [vmem:[#allocation1 + $0x22] ss:$4 sm:$0xff] %v3735_v32  ;;  %v3616_v32 = vperm.slane %v3554_v56, 0  ;;  %v3924_v44 = vrot.slane %v3377_v20, 1  ;;  %v3925_v35 = vrot.slane %v3377_v20, 2  ;;  %v3926_v39 = vrot.slane %v3377_v20, 3 }
 0x9c2   : > { %4359 = vst [vmem:[#allocation1 + $0x23] ss:$4 sm:$0xff] %v3736_v4  ;;  %v3740_v4 = vsel %vm1113_vm12, %v3430_v14, %v3612_v31  ;;  %v3742_v9 = vsel %vm1113_vm12, %v3432_v61, %v3614_v26  ;;  %v3927_v43 = vrot.slane %v3377_v20, 4  ;;  %v3928_v23 = vrot.slane %v3377_v20, 5 }
 0x9c3   : > { %v3744_v37 = vsel %vm1113_vm12, %v3434_v59, %v3616_v32  ;;  %v3986_v5 = vperm.slane %v3924_v44, 0  ;;  %v3929_v50 = vrot.slane %v3377_v20, 6  ;;  %v3987_v55 = vperm.slane %v3925_v35, 0 }
 0x9c4   : > { %v3930_v30 = vrot.slane %v3377_v20, 7  ;;  %v3988_v41 = vperm.slane %v3926_v39, 0  ;;  %v3989_v24 = vperm.slane %v3927_v43, 0 }
 0x9c5   : > { %v4360_v3 = vld.sshfl [vmem:[#allocation1] sm:$0xff pattern:$0x73625140]  ;;  %v4114_v8 = vsel %vm1113_vm12, %v3804_v2, %v3986_v5  ;;  %v3991_v10 = vperm.slane %v3929_v50, 0 }
 0x9c6   : > { %4480 = vst.msk [vmem:[%s6397_s25 + $0x80] sm:$0xff] %vm851_vm3, %v4360_v3  ;;  %v3985_v3 = vperm.slane %v3377_v20, 0  ;;  %v3992_v63 = vperm.slane %v3930_v30, 0  ;;  %v4117_v46 = vsel %vm1113_vm12, %v3807_v29, %v3989_v24  ;;  %v3379_v20 = vpop.f32.mrf.mxu2 }
 0x9c7   : > { %4362 = vst [vmem:[#allocation1] ss:$4 sm:$0xff] %v4105_v22  ;;  %v2998_v22 = vpop.f32.mrf.mxu1  ;;  %v4119_v12 = vsel %vm1113_vm12, %v3809_v1, %v3991_v10  ;;  %v3380_v44 = vadd.f32 %v6653_v42, %v3379_v20 }
 0x9c8   : > { %4363 = vst [vmem:[#allocation1 + $0x1] ss:$4 sm:$0xff] %v4106_v21  ;;  %v3805_v21 = vrot.slane %v3187_v13, 2  ;;  %v2999_v38 = vadd.f32 %v6653_v42, %v2998_v22 }
 0x9c9   : > { %v4361_v54 = vld.sshfl [vmem:[#allocation1 + $0x20] sm:$0xff pattern:$0x73625140]  ;;  %4364 = vst [vmem:[#allocation1 + $0x2] ss:$4 sm:$0xff] %v4107_v45  ;;  %v3806_v45 = vrot.slane %v3187_v13, 3 }
 0x9ca   : > { %4481 = vst.msk [vmem:[%s6397_s25 + $0x88] sm:$0xff] %vm851_vm3, %v4361_v54  ;;  %v4113_v54 = vsel %vm1113_vm12, %v3187_v13, %v3985_v3  ;;  %v4115_v47 = vsel %vm1113_vm12, %v3805_v21, %v3987_v55  ;;  %v3555_v15 = vrot.slane %v2999_v38, 1  ;;  %v3556_v36 = vrot.slane %v2999_v38, 2  ;;  %v3189_v3 = vpop.f32.mrf.mxu0 }
 0x9cb   : > { %4365 = vst [vmem:[#allocation1 + $0x3] ss:$4 sm:$0xff] %v4108_v52  ;;  %v3990_v52 = vperm.slane %v3928_v23, 0  ;;  %v4116_v49 = vsel %vm1113_vm12, %v3806_v45, %v3988_v41  ;;  %v3557_v60 = vrot.slane %v2999_v38, 3  ;;  %v3617_v56 = vperm.slane %v2999_v38, 0 }
 0x9cc   : > { %4366 = vst [vmem:[#allocation1 + $0x20] ss:$4 sm:$0xff] %v4109_v34  ;;  %v3808_v34 = vrot.slane %v3187_v13, 5  ;;  %v3618_v58 = vperm.slane %v3555_v15, 0  ;;  %v3619_v48 = vperm.slane %v3556_v36, 0  ;;  %v3560_v26 = vrot.slane %v2999_v38, 6 }
 0x9cd   : > { %4367 = vst [vmem:[#allocation1 + $0x21] ss:$4 sm:$0xff] %v4110_v19  ;;  %v3620_v11 = vperm.slane %v3557_v60, 0  ;;  %v3931_v23 = vrot.slane %v3380_v44, 1  ;;  %v3190_v50 = vadd.f32 %v6653_v42, %v3189_v3  ;;  %v3932_v55 = vrot.slane %v3380_v44, 2 }
 0x9ce   : > { %4368 = vst [vmem:[#allocation1 + $0x22] ss:$4 sm:$0xff] %v4111_v53  ;;  %v2800_v53 = vpop.f32.mrf.mxu3  ;;  %v4118_v16 = vsel %vm1113_vm12, %v3808_v34, %v3990_v52  ;;  %v3623_v59 = vperm.slane %v3560_v26, 0  ;;  %v3933_v21 = vrot.slane %v3380_v44, 3  ;;  %v3934_v30 = vrot.slane %v3380_v44, 4 }
 0x9cf   : > { %4369 = vst [vmem:[#allocation1 + $0x23] ss:$4 sm:$0xff] %v4112_v25  ;;  %v3810_v25 = vrot.slane %v3187_v13, 7  ;;  %v2801_v17 = vadd.f32 %v6653_v42, %v2800_v53  ;;  %v3935_v41 = vrot.slane %v3380_v44, 5  ;;  %v3994_v45 = vperm.slane %v3931_v23, 0  ;;  %v3001_v52 = vpop.f32.mrf.mxu1 }
 0x9d0   : > { %v3995_v24 = vperm.slane %v3932_v55, 0  ;;  %v3812_v29 = vrot.slane %v3190_v50, 2  ;;  %v3937_v10 = vrot.slane %v3380_v44, 7  ;;  %v3996_v34 = vperm.slane %v3933_v21, 0 }
 0x9d1   : > { %v4120_v31 = vsel %vm1113_vm12, %v3810_v25, %v3992_v63  ;;  %v3435_v14 = vrot.slane %v2801_v17, 1  ;;  %v3745_v62 = vsel %vm1113_vm12, %v2801_v17, %v3617_v56  ;;  %v3438_v0 = vrot.slane %v2801_v17, 4 }
 0x9d2   : > { %v4370_v6 = vld.sshfl [vmem:[#allocation1] sm:$0xff pattern:$0x73625140]  ;;  %v3440_v35 = vrot.slane %v2801_v17, 6  ;;  %v3441_v43 = vrot.slane %v2801_v17, 7  ;;  %v3997_v1 = vperm.slane %v3934_v30, 0  ;;  %v4123_v36 = vsel %vm1113_vm12, %v3812_v29, %v3995_v24 }
 0x9d3   : > { %4482 = vst.msk [vmem:[%s6397_s25 + $0x90] sm:$0xff] %vm851_vm3, %v4370_v6  ;;  %v3558_v6 = vrot.slane %v2999_v38, 4  ;;  %v3998_v53 = vperm.slane %v3935_v41, 0  ;;  %v3814_v63 = vrot.slane %v3190_v50, 4  ;;  %v4000_v60 = vperm.slane %v3937_v10, 0 }
 0x9d4   : > { %4372 = vst [vmem:[#allocation1] ss:$4 sm:$0xff] %v3737_v40  ;;  %v3436_v40 = vrot.slane %v2801_v17, 2  ;;  %v3751_v2 = vsel %vm1113_vm12, %v3440_v35, %v3623_v59  ;;  %v3817_v56 = vrot.slane %v3190_v50, 7  ;;  %v3382_v20 = vpop.f32.mrf.mxu2 }
 0x9d5   : > { %4373 = vst [vmem:[#allocation1 + $0x1] ss:$4 sm:$0xff] %v3738_v51  ;;  %v3559_v51 = vrot.slane %v2999_v38, 5  ;;  %v3621_v32 = vperm.slane %v3558_v6, 0  ;;  %v3383_v3 = vadd.f32 %v6653_v42, %v3382_v20 }
 0x9d6   : > { %v4371_v28 = vld.sshfl [vmem:[#allocation1 + $0x20] sm:$0xff pattern:$0x73625140]  ;;  %4374 = vst [vmem:[#allocation1 + $0x2] ss:$4 sm:$0xff] %v3739_v18  ;;  %v3561_v18 = vrot.slane %v2999_v38, 7 }
 0x9d7   : > { %4483 = vst.msk [vmem:[%s6397_s25 + $0x98] sm:$0xff] %vm851_vm3, %v4371_v28  ;;  %v3437_v28 = vrot.slane %v2801_v17, 3  ;;  %v3622_v7 = vperm.slane %v3559_v51, 0  ;;  %v3749_v39 = vsel %vm1113_vm12, %v3438_v0, %v3621_v32  ;;  %v3936_v38 = vrot.slane %v3380_v44, 6 }
 0x9d8   : > { %4375 = vst [vmem:[#allocation1 + $0x3] ss:$4 sm:$0xff] %v3740_v4  ;;  %v3746_v4 = vsel %vm1113_vm12, %v3435_v14, %v3618_v58  ;;  %v4125_v58 = vsel %vm1113_vm12, %v3814_v63, %v3997_v1  ;;  %v3939_v24 = vrot.slane %v3383_v3, 2  ;;  %v3944_v63 = vrot.slane %v3383_v3, 7 }
 0x9d9   : > { %4376 = vst [vmem:[#allocation1 + $0x20] ss:$4 sm:$0xff] %v3741_v27  ;;  %v3747_v27 = vsel %vm1113_vm12, %v3436_v40, %v3619_v48  ;;  %v3999_v15 = vperm.slane %v3936_v38, 0  ;;  %v4128_v40 = vsel %vm1113_vm12, %v3817_v56, %v4000_v60 }
 0x9da   : > { %4377 = vst [vmem:[#allocation1 + $0x21] ss:$4 sm:$0xff] %v3742_v9  ;;  %v3439_v9 = vrot.slane %v2801_v17, 5  ;;  %v4003_v1 = vperm.slane %v3939_v24, 0 }
 0x9db   : > { %4378 = vst [vmem:[#allocation1 + $0x22] ss:$4 sm:$0xff] %v3743_v33  ;;  %v3624_v33 = vperm.slane %v3561_v18, 0 }
 0x9dc   : > { %4379 = vst [vmem:[#allocation1 + $0x23] ss:$4 sm:$0xff] %v3744_v37  ;;  %v3748_v37 = vsel %vm1113_vm12, %v3437_v28, %v3620_v11  ;;  %v3750_v5 = vsel %vm1113_vm12, %v3439_v9, %v3622_v7 }
 0x9dd   : > { %v3752_v22 = vsel %vm1113_vm12, %v3441_v43, %v3624_v33 }
 0x9df   : > { %v4380_v57 = vld.sshfl [vmem:[#allocation1] sm:$0xff pattern:$0x73625140] }
 0x9e0   : > { %4484 = vst.msk [vmem:[%s6397_s25 + $0xa0] sm:$0xff] %vm851_vm3, %v4380_v57  ;;  %v3993_v57 = vperm.slane %v3380_v44, 0 }
 0x9e1   : > { %4382 = vst [vmem:[#allocation1] ss:$4 sm:$0xff] %v4113_v54  ;;  %v3811_v54 = vrot.slane %v3190_v50, 1 }
 0x9e2   : > { %4383 = vst [vmem:[#allocation1 + $0x1] ss:$4 sm:$0xff] %v4114_v8 }
 0x9e3   : > { %v4381_v19 = vld.sshfl [vmem:[#allocation1 + $0x20] sm:$0xff pattern:$0x73625140]  ;;  %4384 = vst [vmem:[#allocation1 + $0x2] ss:$4 sm:$0xff] %v4115_v47  ;;  %v3813_v47 = vrot.slane %v3190_v50, 3  ;;  %v4122_v25 = vsel %vm1113_vm12, %v3811_v54, %v3994_v45 }
 0x9e4   : > { %4485 = vst.msk [vmem:[%s6397_s25 + $0xa8] sm:$0xff] %vm851_vm3, %v4381_v19  ;;  %v4121_v19 = vsel %vm1113_vm12, %v3190_v50, %v3993_v57  ;;  %v3938_v45 = vrot.slane %v3383_v3, 1 }
 0x9e5   : > { %4385 = vst [vmem:[#allocation1 + $0x3] ss:$4 sm:$0xff] %v4116_v49  ;;  %v2803_v49 = vpop.f32.mrf.mxu3 }
 0x9e6   : > { %4386 = vst [vmem:[#allocation1 + $0x20] ss:$4 sm:$0xff] %v4117_v46  ;;  %v3815_v46 = vrot.slane %v3190_v50, 5  ;;  %v2804_v6 = vadd.f32 %v6653_v42, %v2803_v49  ;;  %v4002_v10 = vperm.slane %v3938_v45, 0 }
 0x9e7   : > { %4387 = vst [vmem:[#allocation1 + $0x21] ss:$4 sm:$0xff] %v4118_v16  ;;  %v3002_v16 = vadd.f32 %v6653_v42, %v3001_v52  ;;  %v3941_v52 = vrot.slane %v3383_v3, 4 }
 0x9e8   : > { %4388 = vst [vmem:[#allocation1 + $0x22] ss:$4 sm:$0xff] %v4119_v12  ;;  %v3816_v12 = vrot.slane %v3190_v50, 6  ;;  %v4126_v51 = vsel %vm1113_vm12, %v3815_v46, %v3998_v53  ;;  %v3442_v18 = vrot.slane %v2804_v6, 1  ;;  %v3446_v35 = vrot.slane %v2804_v6, 5 }
 0x9e9   : > { %4389 = vst [vmem:[#allocation1 + $0x23] ss:$4 sm:$0xff] %v4120_v31  ;;  %v4124_v31 = vsel %vm1113_vm12, %v3813_v47, %v3996_v34  ;;  %v3562_v48 = vrot.slane %v3002_v16, 1  ;;  %v3563_v26 = vrot.slane %v3002_v16, 2  ;;  %v3564_v11 = vrot.slane %v3002_v16, 3 }
 0x9ea   : > { %v4127_v14 = vsel %vm1113_vm12, %v3816_v12, %v3999_v15  ;;  %v3565_v32 = vrot.slane %v3002_v16, 4  ;;  %v3566_v28 = vrot.slane %v3002_v16, 5  ;;  %v3567_v9 = vrot.slane %v3002_v16, 6 }
 0x9eb   : > { %v3627_v7 = vperm.slane %v3563_v26, 0  ;;  %v3568_v33 = vrot.slane %v3002_v16, 7  ;;  %v3448_v23 = vrot.slane %v2804_v6, 7  ;;  %v3942_v47 = vrot.slane %v3383_v3, 5 }
 0x9ec   : > { %v4390_v61 = vld.sshfl [vmem:[#allocation1] sm:$0xff pattern:$0x73625140]  ;;  %v3629_v43 = vperm.slane %v3565_v32, 0  ;;  %v3631_v21 = vperm.slane %v3567_v9, 0  ;;  %v4005_v46 = vperm.slane %v3941_v52, 0 }
 0x9ed   : > { %4486 = vst.msk [vmem:[%s6397_s25 + $0xb0] sm:$0xff] %vm851_vm3, %v4390_v61  ;;  %v3443_v61 = vrot.slane %v2804_v6, 2  ;;  %v3632_v30 = vperm.slane %v3568_v33, 0 }
 0x9ee   : > { %4392 = vst [vmem:[#allocation1] ss:$4 sm:$0xff] %v3745_v62  ;;  %v3625_v62 = vperm.slane %v3002_v16, 0 }
 0x9ef   : > { %4393 = vst [vmem:[#allocation1 + $0x1] ss:$4 sm:$0xff] %v3746_v4  ;;  %v3626_v4 = vperm.slane %v3562_v48, 0  ;;  %v3760_v29 = vsel %vm1113_vm12, %v3448_v23, %v3632_v30 }
 0x9f0   : > { %v4391_v13 = vld.sshfl [vmem:[#allocation1 + $0x20] sm:$0xff pattern:$0x73625140]  ;;  %4394 = vst [vmem:[#allocation1 + $0x2] ss:$4 sm:$0xff] %v3747_v27  ;;  %v3444_v27 = vrot.slane %v2804_v6, 3  ;;  %v3753_v0 = vsel %vm1113_vm12, %v2804_v6, %v3625_v62 }
 0x9f1   : > { %4487 = vst.msk [vmem:[%s6397_s25 + $0xb8] sm:$0xff] %vm851_vm3, %v4391_v13  ;;  %v3754_v44 = vsel %vm1113_vm12, %v3442_v18, %v3626_v4  ;;  %v3628_v13 = vperm.slane %v3564_v11, 0 }
 0x9f2   : > { %4395 = vst [vmem:[#allocation1 + $0x3] ss:$4 sm:$0xff] %v3748_v37  ;;  %v3445_v37 = vrot.slane %v2804_v6, 4 }
 0x9f3   : > { %4396 = vst [vmem:[#allocation1 + $0x20] ss:$4 sm:$0xff] %v3749_v39  ;;  %v3755_v39 = vsel %vm1113_vm12, %v3443_v61, %v3627_v7  ;;  %v3756_v50 = vsel %vm1113_vm12, %v3444_v27, %v3628_v13 }
 0x9f4   : > { %4397 = vst [vmem:[#allocation1 + $0x21] ss:$4 sm:$0xff] %v3750_v5  ;;  %v3447_v5 = vrot.slane %v2804_v6, 6  ;;  %v3757_v57 = vsel %vm1113_vm12, %v3445_v37, %v3629_v43 }
 0x9f5   : > { %4398 = vst [vmem:[#allocation1 + $0x22] ss:$4 sm:$0xff] %v3751_v2  ;;  %v3192_v2 = vpop.f32.mrf.mxu0 }
 0x9f6   : > { %4399 = vst [vmem:[#allocation1 + $0x23] ss:$4 sm:$0xff] %v3752_v22  ;;  %v3630_v22 = vperm.slane %v3566_v28, 0  ;;  %v3193_v54 = vadd.f32 %v6653_v42, %v3192_v2  ;;  %v3759_v38 = vsel %vm1113_vm12, %v3447_v5, %v3631_v21  ;;  %v3943_v42 = vrot.slane %v3383_v3, 6 }
 0x9f8   : > { %v3758_v41 = vsel %vm1113_vm12, %v3446_v35, %v3630_v22  ;;  %v3818_v34 = vrot.slane %v3193_v54, 1  ;;  %v3819_v53 = vrot.slane %v3193_v54, 2  ;;  %v3820_v49 = vrot.slane %v3193_v54, 3 }
 0x9f9   : > { %v4400_v8 = vld.sshfl [vmem:[#allocation1] sm:$0xff pattern:$0x73625140]  ;;  %v3822_v12 = vrot.slane %v3193_v54, 5  ;;  %v3823_v6 = vrot.slane %v3193_v54, 6 }
 0x9fa   : > { %4488 = vst.msk [vmem:[%s6397_s25 + $0xc0] sm:$0xff] %vm851_vm3, %v4400_v8  ;;  %v3940_v8 = vrot.slane %v3383_v3, 3  ;;  %v4130_v16 = vsel %vm1113_vm12, %v3818_v34, %v4002_v10  ;;  %v4131_v56 = vsel %vm1113_vm12, %v3819_v53, %v4003_v1 }
 0x9fb   : > { %4402 = vst [vmem:[#allocation1] ss:$4 sm:$0xff] %v4121_v19  ;;  %v4001_v19 = vperm.slane %v3383_v3, 0 }
 0x9fc   : > { %4403 = vst [vmem:[#allocation1 + $0x1] ss:$4 sm:$0xff] %v4122_v25  ;;  %v4004_v25 = vperm.slane %v3940_v8, 0 }
 0x9fd   : > { %v4401_v17 = vld.sshfl [vmem:[#allocation1 + $0x20] sm:$0xff pattern:$0x73625140]  ;;  %4404 = vst [vmem:[#allocation1 + $0x2] ss:$4 sm:$0xff] %v4123_v36  ;;  %v3821_v36 = vrot.slane %v3193_v54, 4  ;;  %v4129_v60 = vsel %vm1113_vm12, %v3193_v54, %v4001_v19 }
 0x9fe   : > { %4489 = vst.msk [vmem:[%s6397_s25 + $0xc8] sm:$0xff] %vm851_vm3, %v4401_v17  ;;  %v4006_v17 = vperm.slane %v3942_v47, 0  ;;  %v4132_v48 = vsel %vm1113_vm12, %v3820_v49, %v4004_v25 }
 0x9ff   : > { %4405 = vst [vmem:[#allocation1 + $0x3] ss:$4 sm:$0xff] %v4124_v31  ;;  %v4007_v31 = vperm.slane %v3943_v42, 0  ;;  %v4133_v26 = vsel %vm1113_vm12, %v3821_v36, %v4005_v46 }
 0xa00   : > { %4406 = vst [vmem:[#allocation1 + $0x20] ss:$4 sm:$0xff] %v4125_v58  ;;  %v4008_v58 = vperm.slane %v3944_v63, 0 }
 0xa01   : > { %4407 = vst [vmem:[#allocation1 + $0x21] ss:$4 sm:$0xff] %v4126_v51  ;;  %v3824_v51 = vrot.slane %v3193_v54, 7  ;;  %v4135_v18 = vsel %vm1113_vm12, %v3823_v6, %v4007_v31 }
 0xa02   : > { %4408 = vst [vmem:[#allocation1 + $0x22] ss:$4 sm:$0xff] %v4127_v14 }
 0xa03   : > { %4409 = vst [vmem:[#allocation1 + $0x23] ss:$4 sm:$0xff] %v4128_v40  ;;  %v4134_v40 = vsel %vm1113_vm12, %v3822_v12, %v4006_v17  ;;  %v4136_v11 = vsel %vm1113_vm12, %v3824_v51, %v4008_v58 }
 0xa06   : > { %v4410_v59 = vld.sshfl [vmem:[#allocation1] sm:$0xff pattern:$0x73625140] }
 0xa07   : > { %4490 = vst.msk [vmem:[%s6397_s25 + $0xd0] sm:$0xff] %vm851_vm3, %v4410_v59 }
 0xa08   : > { %4412 = vst [vmem:[#allocation1] ss:$4 sm:$0xff] %v3753_v0 }
 0xa09   : > { %4413 = vst [vmem:[#allocation1 + $0x1] ss:$4 sm:$0xff] %v3754_v44 }
 0xa0a   : > { %v4411_v55 = vld.sshfl [vmem:[#allocation1 + $0x20] sm:$0xff pattern:$0x73625140]  ;;  %4414 = vst [vmem:[#allocation1 + $0x2] ss:$4 sm:$0xff] %v3755_v39 }
 0xa0b   : > { %4491 = vst.msk [vmem:[%s6397_s25 + $0xd8] sm:$0xff] %vm851_vm3, %v4411_v55 }
 0xa0c   : > { %4415 = vst [vmem:[#allocation1 + $0x3] ss:$4 sm:$0xff] %v3756_v50 }
 0xa0d   : > { %4416 = vst [vmem:[#allocation1 + $0x20] ss:$4 sm:$0xff] %v3757_v57 }
 0xa0e   : > { %4417 = vst [vmem:[#allocation1 + $0x21] ss:$4 sm:$0xff] %v3758_v41 }
 0xa0f   : > { %4418 = vst [vmem:[#allocation1 + $0x22] ss:$4 sm:$0xff] %v3759_v38 }
 0xa10   : > { %4419 = vst [vmem:[#allocation1 + $0x23] ss:$4 sm:$0xff] %v3760_v29 }
 0xa13   : > { %v4420_v15 = vld.sshfl [vmem:[#allocation1] sm:$0xff pattern:$0x73625140] }
 0xa14   : > { %4492 = vst.msk [vmem:[%s6397_s25 + $0xe0] sm:$0xff] %vm851_vm3, %v4420_v15 }
 0xa15   : > { %4422 = vst [vmem:[#allocation1] ss:$4 sm:$0xff] %v4129_v60 }
 0xa16   : > { %4423 = vst [vmem:[#allocation1 + $0x1] ss:$4 sm:$0xff] %v4130_v16 }
 0xa17   : > { %v4421_v14 = vld.sshfl [vmem:[#allocation1 + $0x20] sm:$0xff pattern:$0x73625140]  ;;  %4424 = vst [vmem:[#allocation1 + $0x2] ss:$4 sm:$0xff] %v4131_v56 }
 0xa18   : > { %4493 = vst.msk [vmem:[%s6397_s25 + $0xe8] sm:$0xff] %vm851_vm3, %v4421_v14 }
 0xa19   : > { %4425 = vst [vmem:[#allocation1 + $0x3] ss:$4 sm:$0xff] %v4132_v48 }
 0xa1a   : > { %4426 = vst [vmem:[#allocation1 + $0x20] ss:$4 sm:$0xff] %v4133_v26 }
 0xa1b   : > { %4427 = vst [vmem:[#allocation1 + $0x21] ss:$4 sm:$0xff] %v4134_v40 }
 0xa1c   : > { %4428 = vst [vmem:[#allocation1 + $0x22] ss:$4 sm:$0xff] %v4135_v18 }
 0xa1d   : > { %4429 = vst [vmem:[#allocation1 + $0x23] ss:$4 sm:$0xff] %v4136_v11 }
 0xa20   : > { %v4430_v62 = vld.sshfl [vmem:[#allocation1] sm:$0xff pattern:$0x73625140] }
 0xa21   : > { %4494 = vst.msk [vmem:[%s6397_s25 + $0xf0] sm:$0xff] %vm851_vm3, %v4430_v62 }
 0xa24   : > { %v4431_v61 = vld.sshfl [vmem:[#allocation1 + $0x20] sm:$0xff pattern:$0x73625140] }
 0xa25   : > { %4495 = vst.msk [vmem:[%s6397_s25 + $0xf8] sm:$0xff] %vm851_vm3, %v4431_v61 }
 0xa26 PF: > { %s25_s18 = sadd.s32 1, %s4732_s18  }
 0xa27   : > { %p22_p4 = scmp.ge.s32.totalorder %s25_s18, 4  }
 0xa29   :  { %24 = sbr.rel (!%p22_p4) target bundleno = 1 (0x1), region = 215 }

</bundles_post_ra>
